<compile_context>
chip_gen: v6e
topology: v6e:2x2x1
jax: 0.10.0
libtpu: 0.0.40
codegen_flags: <defaults>
</compile_context>

<pallas_src>
import jax
import jax.numpy as jnp
from jax import lax
from jax.experimental import pallas as pl
from jax.experimental.pallas import tpu as pltpu

_VMEM_LIMIT = 32 * 1024 * 1024  # safe on v5e/v6e (128 MiB phys) and v7x (64 MiB)


# ----------------------------------------------------------------------------
# Plain-JAX glue
# ----------------------------------------------------------------------------
def _pick_tile(m, candidates):
    for c in candidates:          # all candidates are multiples of 8
        if m % c == 0:
            return c
    return m                      # full-dim block (always layout-legal)


def _pick_head_tile(n):
    # Prefer >=2 grid steps (DMA/compute overlap + v7x megacore) with a
    # multiple-of-8 tile so the (tb, 1) output block stays layout-legal;
    # fall back to the full batch for tiny batches.
    for c in (64, 32, 16, 8):
        if n % c == 0 and n // c >= 2:
            return c
    return n


def _im2col_nhwc(x, k, s, p):
    """x: (N, H, W, C) -> (N*OH*OW, k*k*C); columns ordered (kh, kw, C)."""
    n, h, w, c = x.shape
    oh = (h + 2 * p - k) // s + 1
    ow = (w + 2 * p - k) // s + 1
    xp = jnp.pad(x, ((0, 0), (p, p), (p, p), (0, 0)))
    patches = []
    for kh in range(k):
        for kw in range(k):
            patches.append(
                xp[:, kh:kh + s * (oh - 1) + 1:s, kw:kw + s * (ow - 1) + 1:s, :])
    col = jnp.stack(patches, axis=3)              # (N, OH, OW, k*k, C)
    return col.reshape(n * oh * ow, k * k * c)


# ----------------------------------------------------------------------------
# Kernel A: conv1 matmul + bias + LeakyReLU(0.2), lane-dense (128-wide) output
# ----------------------------------------------------------------------------
def _conv1_kernel(x_ref, w_ref, b_ref, o_ref):
    z = jnp.dot(x_ref[...], w_ref[...], preferred_element_type=jnp.float32)
    z = z + b_ref[...]                        # (1, 128) broadcast, f32
    z = jnp.where(z > 0, z, 0.2 * z)          # LeakyReLU on the VPU
    o_ref[...] = z.astype(o_ref.dtype)


def _conv1_matmul(x, w, b, *, tm):
    m, kdim = x.shape
    n = w.shape[1]
    return pl.pallas_call(
        _conv1_kernel,
        out_shape=jax.ShapeDtypeStruct((m, n), jnp.bfloat16),
        grid_spec=pltpu.PrefetchScalarGridSpec(
            num_scalar_prefetch=0,
            grid=(m // tm,),
            in_specs=[
                pl.BlockSpec((tm, kdim), lambda i: (i, 0)),
                pl.BlockSpec((kdim, n), lambda i: (0, 0)),
                pl.BlockSpec((1, n), lambda i: (0, 0)),
            ],
            out_specs=pl.BlockSpec((tm, n), lambda i: (i, 0)),
        ),
        compiler_params=pltpu.CompilerParams(
            dimension_semantics=("parallel",),
            vmem_limit_bytes=_VMEM_LIMIT),
    )(x, w, b)


# ----------------------------------------------------------------------------
# Kernel B: conv2 matmul (single K block) + bias, with per-tile BN partial sums
# ----------------------------------------------------------------------------
def _conv2_kernel(x_ref, w_ref, b_ref, y_ref, sum_ref, ssq_ref):
    z = jnp.dot(x_ref[...], w_ref[...], preferred_element_type=jnp.float32)
    z = z + b_ref[...]                                   # f32 epilogue
    y_ref[...] = z.astype(y_ref.dtype)                   # pre-BN conv2 output
    s = jnp.sum(z, axis=0, keepdims=True)                # (1, 128)
    q = jnp.sum(z * z, axis=0, keepdims=True)            # (1, 128)
    # Per-M-tile partials, replicated across the 8-row block so the output
    # block keeps a layout-legal (8, 128) trailing shape.  Keeps the M axis
    # fully "parallel" (v7x megacore); the wrapper finishes the reduction.
    sum_ref[...] = jnp.broadcast_to(s, sum_ref.shape)
    ssq_ref[...] = jnp.broadcast_to(q, ssq_ref.shape)


def _conv2_matmul(x, w, b, *, tm):
    m, kdim = x.shape
    n = w.shape[1]
    nm = m // tm
    out_shape = (
        jax.ShapeDtypeStruct((m, n), jnp.float32),       # pre-BN conv2 output
        jax.ShapeDtypeStruct((nm * 8, n), jnp.float32),  # per-tile channel sum
        jax.ShapeDtypeStruct((nm * 8, n), jnp.float32),  # per-tile channel ssq
    )
    return pl.pallas_call(
        _conv2_kernel,
        out_shape=out_shape,
        grid_spec=pltpu.PrefetchScalarGridSpec(
            num_scalar_prefetch=0,
            grid=(nm,),
            in_specs=[
                pl.BlockSpec((tm, kdim), lambda i: (i, 0)),
                pl.BlockSpec((kdim, n), lambda i: (0, 0)),
                pl.BlockSpec((1, n), lambda i: (0, 0)),
            ],
            out_specs=[
                pl.BlockSpec((tm, n), lambda i: (i, 0)),
                pl.BlockSpec((8, n), lambda i: (i, 0)),
                pl.BlockSpec((8, n), lambda i: (i, 0)),
            ],
        ),
        compiler_params=pltpu.CompilerParams(
            dimension_semantics=("parallel",),
            vmem_limit_bytes=_VMEM_LIMIT),
    )(x, w, b)


# ----------------------------------------------------------------------------
# Kernel C: BN normalize + LeakyReLU + Linear(8192 -> 1) + sigmoid, one pass
# ----------------------------------------------------------------------------
def _head_kernel(x_ref, scale_ref, shift_ref, w_ref, b_ref, o_ref):
    x = x_ref[...]                                # (tb, 64, 128) f32
    xn = x * scale_ref[...] + shift_ref[...]      # BatchNorm (batch statistics)
    a = jnp.where(xn > 0, xn, 0.2 * xn)           # LeakyReLU(0.2)
    s = jnp.sum(a * w_ref[...], axis=2)           # lane reduction    -> (tb, 64)
    s = jnp.sum(s, axis=1, keepdims=True)         # sublane reduction -> (tb, 1)
    logits = s + b_ref[...]
    o_ref[...] = 1.0 / (1.0 + jnp.exp(-logits))   # sigmoid on the EUP


def _head(x, scale, shift, w_hwc, b, *, tb):
    batch = x.shape[0]
    return pl.pallas_call(
        _head_kernel,
        out_shape=jax.ShapeDtypeStruct((batch, 1), jnp.float32),
        grid_spec=pltpu.PrefetchScalarGridSpec(
            num_scalar_prefetch=0,
            grid=(batch // tb,),
            in_specs=[
                pl.BlockSpec((tb, 64, 128), lambda i: (i, 0, 0)),
                pl.BlockSpec((1, 1, 128), lambda i: (0, 0, 0)),
                pl.BlockSpec((1, 1, 128), lambda i: (0, 0, 0)),
                pl.BlockSpec((1, 64, 128), lambda i: (0, 0, 0)),
                pl.BlockSpec((1, 1), lambda i: (0, 0)),
            ],
            out_specs=pl.BlockSpec((tb, 1), lambda i: (i, 0)),
        ),
        compiler_params=pltpu.CompilerParams(
            dimension_semantics=("parallel",),
            vmem_limit_bytes=_VMEM_LIMIT),
    )(x, scale, shift, w_hwc, b)


# ----------------------------------------------------------------------------
# Parameters + full forward
# ----------------------------------------------------------------------------
def init_params(key):
    ks = jax.random.split(key, 6)
    return {
        "w1": jax.random.normal(ks[0], (64, 2, 4, 4), jnp.float32) * 0.1,
        "b1": jax.random.normal(ks[1], (64,), jnp.float32) * 0.1,
        "w2": jax.random.normal(ks[2], (128, 64, 4, 4), jnp.float32) * 0.05,
        "b2": jax.random.normal(ks[3], (128,), jnp.float32) * 0.05,
        "gamma": jnp.ones((128,), jnp.float32),
        "beta": jnp.zeros((128,), jnp.float32),
        "wl": jax.random.normal(ks[4], (1, 128 * 8 * 8), jnp.float32) * 0.01,
        "bl": jax.random.normal(ks[5], (1,), jnp.float32) * 0.01,
    }


@jax.jit
def discriminator_forward(params, cap_img, recon_img):
    n = cap_img.shape[0]
    eps = 1e-5

    # ---- conv1: im2col + fused matmul/LeakyReLU, lane-dense output ----------
    # C==1 per input, so NCHW->NHWC is a free reshape; concatenating the two
    # single-channel im2cols along K reproduces PyTorch's (C, kh, kw) weight
    # flatten without ever materializing cat([cap, recon], dim=1).
    cap_hwc = cap_img.reshape(n, 32, 32, 1)
    rec_hwc = recon_img.reshape(n, 32, 32, 1)
    x1 = jnp.concatenate(
        [_im2col_nhwc(cap_hwc, 4, 2, 1), _im2col_nhwc(rec_hwc, 4, 2, 1)],
        axis=1)                                                     # (N*256, 32)
    m1 = x1.shape[0]
    # Lane-dense trick: pack two adjacent output pixels per row.  (N*256,32)
    # row-major == (N*128,64) row-major, and a block-diagonal (64,128) weight
    # makes the kernel emit full 128-lane rows (no masked partial stores).
    x1p = x1.reshape(m1 // 2, 64).astype(jnp.bfloat16)              # (N*128, 64)
    w1m = params["w1"].reshape(64, 32).T                            # (32, 64)
    w1big = jnp.kron(jnp.eye(2, dtype=jnp.float32), w1m).astype(jnp.bfloat16)
    b1big = jnp.tile(params["b1"], 2).reshape(1, 128)
    m1p = x1p.shape[0]
    tm1 = _pick_tile(m1p, (4096, 2048, 1024, 512, 256, 128))
    y1p = _conv1_matmul(x1p, w1big, b1big, tm=tm1)                  # (N*128, 128)
    # y1p row-major bytes == NHWC (N,16,16,64) conv1 activation.

    # ---- conv2: im2col (XLA glue) + single-K matmul with fused BN stats -----
    # TODO(synk): fuse this patch gather (and conv1->conv2) into the kernel via
    # in-VMEM slicing / manual DMA to eliminate the x2 HBM round trip.
    x2 = _im2col_nhwc(y1p.reshape(n, 16, 16, 64), 4, 2, 1).astype(jnp.bfloat16)
    # fold the (C, kh, kw) -> (kh, kw, C) column reorder into the weight:
    w2 = params["w2"].transpose(2, 3, 1, 0).reshape(1024, 128).astype(jnp.bfloat16)
    b2 = params["b2"].reshape(1, 128)
    m2 = x2.shape[0]
    tm2 = _pick_tile(m2, (1024, 512, 256, 128, 64))
    y2, psum, pssq = _conv2_matmul(x2, w2, b2, tm=tm2)

    # ---- BatchNorm affine coefficients from the per-tile batch statistics ---
    ch_sum = jnp.sum(psum[0::8, :], axis=0)          # (128,)  tiny reduction
    ch_ssq = jnp.sum(pssq[0::8, :], axis=0)
    cnt = jnp.float32(m2)                            # N * 8 * 8 samples/channel
    mean = ch_sum / cnt
    var = jnp.maximum(ch_ssq / cnt - mean * mean, 0.0)   # clamp: avoid rsqrt NaN
    inv_std = lax.rsqrt(var + eps)
    scale = (params["gamma"] * inv_std).reshape(1, 1, 128)
    shift = (params["beta"] - mean * params["gamma"] * inv_std).reshape(1, 1, 128)

    # ---- head: BN + LeakyReLU + Linear + sigmoid, single fused pass ---------
    # Fold PyTorch's NCHW flatten order into the constant Linear weight so the
    # activation never needs an NHWC->NCHW transpose on the hot path.
    w_hwc = params["wl"].reshape(128, 8, 8).transpose(1, 2, 0).reshape(1, 64, 128)
    bl = params["bl"].reshape(1, 1)
    tb = _pick_head_tile(n)
    return _head(y2.reshape(n, 64, 128), scale, shift, w_hwc, bl, tb=tb)


# ----------------------------------------------------------------------------
# Pure-JAX reference (numerical sanity check)
# ----------------------------------------------------------------------------
def _reference_forward(params, cap_img, recon_img):
    x = jnp.concatenate([cap_img, recon_img], axis=1)
    dn = ("NCHW", "OIHW", "NCHW")
    y = lax.conv_general_dilated(x, params["w1"], (2, 2), ((1, 1), (1, 1)),
                                 dimension_numbers=dn)
    y = y + params["b1"][None, :, None, None]
    y = jnp.where(y > 0, y, 0.2 * y)
    z = lax.conv_general_dilated(y, params["w2"], (2, 2), ((1, 1), (1, 1)),
                                 dimension_numbers=dn)
    z = z + params["b2"][None, :, None, None]
    mean = z.mean(axis=(0, 2, 3), keepdims=True)
    var = z.var(axis=(0, 2, 3), keepdims=True)              # biased variance
    zn = (z - mean) * lax.rsqrt(var + 1e-5)
    zn = zn * params["gamma"][None, :, None, None] + params["beta"][None, :, None, None]
    zn = jnp.where(zn > 0, zn, 0.2 * zn)
    flat = zn.reshape(z.shape[0], -1)                       # NCHW flatten
    logits = flat @ params["wl"].T + params["bl"]
    return 1.0 / (1.0 + jnp.exp(-logits))


if __name__ == "__main__":
    key = jax.random.PRNGKey(0)
    k_cap, k_rec, k_par = jax.random.split(key, 3)
    batch = 4
    cap_img = jax.random.normal(k_cap, (batch, 1, 32, 32), jnp.float32)
    recon_img = jax.random.normal(k_rec, (batch, 1, 32, 32), jnp.float32)
    params = init_params(k_par)

    out = jax.block_until_ready(discriminator_forward(params, cap_img, recon_img))
    assert out.shape == (batch, 1), out.shape

    ref = jax.block_until_ready(jax.jit(_reference_forward)(params, cap_img, recon_img))
    max_err = float(jnp.max(jnp.abs(out - ref)))
    assert max_err < 5e-2, f"mismatch vs reference: max abs err = {max_err}"

    print("KERNEL_OK")
</pallas_src>

<mosaic_0001>
module attributes {stable_mosaic.version = 11 : i64} {
  func.func @_conv1_kernel(%arg0: i32, %arg1: memref<512x64xbf16, #tpu.memory_space<vmem>>, %arg2: memref<64x128xbf16, #tpu.memory_space<vmem>>, %arg3: memref<1x128xf32, #tpu.memory_space<vmem>>, %arg4: memref<512x128xbf16, #tpu.memory_space<vmem>>) attributes {dimension_semantics = [#tpu.dimension_semantics<parallel>], iteration_bounds = array<i64: 1>, scalar_prefetch = 0 : i64, scratch_operands = 0 : i64, tpu.core_type = #tpu.core_type<tc>, window_params = [{transform_indices = @transform_0, window_bounds = array<i64: 512, 64>}, {pipeline_mode = #tpu.pipeline_mode<synchronous>, transform_indices = @transform_1, window_bounds = array<i64: 64, 128>}, {pipeline_mode = #tpu.pipeline_mode<synchronous>, transform_indices = @transform_2, window_bounds = array<i64: 1, 128>}, {transform_indices = @transform_3, window_bounds = array<i64: 512, 128>}]} {
    %c0 = arith.constant 0 : index
    %c0_0 = arith.constant 0 : index
    %0 = vector.load %arg1[%c0, %c0_0] : memref<512x64xbf16, #tpu.memory_space<vmem>>, vector<512x64xbf16>
    %c0_1 = arith.constant 0 : index
    %c0_2 = arith.constant 0 : index
    %1 = vector.load %arg2[%c0_1, %c0_2] : memref<64x128xbf16, #tpu.memory_space<vmem>>, vector<64x128xbf16>
    %cst = arith.constant dense<0.000000e+00> : vector<512x128xf32>
    %2 = tpu.matmul %0, %1, %cst {dimension_numbers = #tpu.dot_dimension_numbers<[1], [0], [0], [1], [0, 0, 1, 1], [], []>} : vector<512x64xbf16>, vector<64x128xbf16>, vector<512x128xf32> -> vector<512x128xf32>
    %c0_3 = arith.constant 0 : index
    %c0_4 = arith.constant 0 : index
    %3 = vector.load %arg3[%c0_3, %c0_4] : memref<1x128xf32, #tpu.memory_space<vmem>>, vector<1x128xf32>
    %4 = vector.broadcast %3 : vector<1x128xf32> to vector<512x128xf32>
    %5 = arith.addf %2, %4 : vector<512x128xf32>
    %cst_5 = arith.constant 0.000000e+00 : f32
    %6 = vector.broadcast %cst_5 : f32 to vector<512x128xf32>
    %7 = arith.cmpf ogt, %5, %6 : vector<512x128xf32>
    %cst_6 = arith.constant 2.000000e-01 : f32
    %8 = vector.broadcast %cst_6 : f32 to vector<512x128xf32>
    %9 = arith.mulf %8, %5 : vector<512x128xf32>
    %10 = arith.select %7, %5, %9 : vector<512x128xi1>, vector<512x128xf32>
    %11 = arith.truncf %10 : vector<512x128xf32> to vector<512x128xbf16>
    %c0_7 = arith.constant 0 : index
    %c0_8 = arith.constant 0 : index
    %12 = vector.load %arg4[%c0_7, %c0_8] : memref<512x128xbf16, #tpu.memory_space<vmem>>, vector<512x128xbf16>
    tpu.vector_store %arg4[%c0_7, %c0_8], %11 {strides = array<i32>} : memref<512x128xbf16, #tpu.memory_space<vmem>>, vector<512x128xbf16>,
    return
  }
  func.func @transform_0(%arg0: i32) -> (i32, i32) {
    %c0_i32 = arith.constant 0 : i32
    %c0_i32_0 = arith.constant 0 : i32
    return %arg0, %c0_i32 : i32, i32
  }
  func.func @transform_1(%arg0: i32) -> (i32, i32) {
    %c0_i32 = arith.constant 0 : i32
    %c0_i32_0 = arith.constant 0 : i32
    %c0_i32_1 = arith.constant 0 : i32
    return %c0_i32, %c0_i32_0 : i32, i32
  }
  func.func @transform_2(%arg0: i32) -> (i32, i32) {
    %c0_i32 = arith.constant 0 : i32
    %c0_i32_0 = arith.constant 0 : i32
    %c0_i32_1 = arith.constant 0 : i32
    return %c0_i32, %c0_i32_0 : i32, i32
  }
  func.func @transform_3(%arg0: i32) -> (i32, i32) {
    %c0_i32 = arith.constant 0 : i32
    %c0_i32_0 = arith.constant 0 : i32
    return %arg0, %c0_i32 : i32, i32
  }
}

module attributes {stable_mosaic.version = 11 : i64} {
  func.func @_conv2_kernel(%arg0: i32, %arg1: memref<256x1024xbf16, #tpu.memory_space<vmem>>, %arg2: memref<1024x128xbf16, #tpu.memory_space<vmem>>, %arg3: memref<1x128xf32, #tpu.memory_space<vmem>>, %arg4: memref<256x128xf32, #tpu.memory_space<vmem>>, %arg5: memref<8x128xf32, #tpu.memory_space<vmem>>, %arg6: memref<8x128xf32, #tpu.memory_space<vmem>>) attributes {dimension_semantics = [#tpu.dimension_semantics<parallel>], iteration_bounds = array<i64: 1>, scalar_prefetch = 0 : i64, scratch_operands = 0 : i64, tpu.core_type = #tpu.core_type<tc>, window_params = [{transform_indices = @transform_0, window_bounds = array<i64: 256, 1024>}, {pipeline_mode = #tpu.pipeline_mode<synchronous>, transform_indices = @transform_1, window_bounds = array<i64: 1024, 128>}, {pipeline_mode = #tpu.pipeline_mode<synchronous>, transform_indices = @transform_2, window_bounds = array<i64: 1, 128>}, {transform_indices = @transform_3, window_bounds = array<i64: 256, 128>}, {transform_indices = @transform_4, window_bounds = array<i64: 8, 128>}, {transform_indices = @transform_5, window_bounds = array<i64: 8, 128>}]} {
    %c0 = arith.constant 0 : index
    %c0_0 = arith.constant 0 : index
    %0 = vector.load %arg1[%c0, %c0_0] : memref<256x1024xbf16, #tpu.memory_space<vmem>>, vector<256x1024xbf16>
    %c0_1 = arith.constant 0 : index
    %c0_2 = arith.constant 0 : index
    %1 = vector.load %arg2[%c0_1, %c0_2] : memref<1024x128xbf16, #tpu.memory_space<vmem>>, vector<1024x128xbf16>
    %cst = arith.constant dense<0.000000e+00> : vector<256x128xf32>
    %2 = tpu.matmul %0, %1, %cst {dimension_numbers = #tpu.dot_dimension_numbers<[1], [0], [0], [1], [0, 0, 1, 1], [], []>} : vector<256x1024xbf16>, vector<1024x128xbf16>, vector<256x128xf32> -> vector<256x128xf32>
    %c0_3 = arith.constant 0 : index
    %c0_4 = arith.constant 0 : index
    %3 = vector.load %arg3[%c0_3, %c0_4] : memref<1x128xf32, #tpu.memory_space<vmem>>, vector<1x128xf32>
    %4 = vector.broadcast %3 : vector<1x128xf32> to vector<256x128xf32>
    %5 = arith.addf %2, %4 : vector<256x128xf32>
    %c0_5 = arith.constant 0 : index
    %c0_6 = arith.constant 0 : index
    %6 = vector.load %arg4[%c0_5, %c0_6] : memref<256x128xf32, #tpu.memory_space<vmem>>, vector<256x128xf32>
    tpu.vector_store %arg4[%c0_5, %c0_6], %5 {strides = array<i32>} : memref<256x128xf32, #tpu.memory_space<vmem>>, vector<256x128xf32>,
    %cst_7 = arith.constant dense<0.000000e+00> : vector<128xf32>
    %7 = vector.multi_reduction <add>, %5, %cst_7 [0] : vector<256x128xf32> to vector<128xf32>
    %8 = vector.shape_cast %7 : vector<128xf32> to vector<1x128xf32>
    %9 = arith.mulf %5, %5 : vector<256x128xf32>
    %cst_8 = arith.constant dense<0.000000e+00> : vector<128xf32>
    %10 = vector.multi_reduction <add>, %9, %cst_8 [0] : vector<256x128xf32> to vector<128xf32>
    %11 = vector.shape_cast %10 : vector<128xf32> to vector<1x128xf32>
    %12 = vector.shape_cast %8 : vector<1x128xf32> to vector<1x128xf32>
    %13 = vector.broadcast %12 : vector<1x128xf32> to vector<8x128xf32>
    %c0_9 = arith.constant 0 : index
    %c0_10 = arith.constant 0 : index
    %14 = vector.load %arg5[%c0_9, %c0_10] : memref<8x128xf32, #tpu.memory_space<vmem>>, vector<8x128xf32>
    tpu.vector_store %arg5[%c0_9, %c0_10], %13 {strides = array<i32>} : memref<8x128xf32, #tpu.memory_space<vmem>>, vector<8x128xf32>,
    %15 = vector.shape_cast %11 : vector<1x128xf32> to vector<1x128xf32>
    %16 = vector.broadcast %15 : vector<1x128xf32> to vector<8x128xf32>
    %c0_11 = arith.constant 0 : index
    %c0_12 = arith.constant 0 : index
    %17 = vector.load %arg6[%c0_11, %c0_12] : memref<8x128xf32, #tpu.memory_space<vmem>>, vector<8x128xf32>
    tpu.vector_store %arg6[%c0_11, %c0_12], %16 {strides = array<i32>} : memref<8x128xf32, #tpu.memory_space<vmem>>, vector<8x128xf32>,
    return
  }
  func.func @transform_0(%arg0: i32) -> (i32, i32) {
    %c0_i32 = arith.constant 0 : i32
    %c0_i32_0 = arith.constant 0 : i32
    return %arg0, %c0_i32 : i32, i32
  }
  func.func @transform_1(%arg0: i32) -> (i32, i32) {
    %c0_i32 = arith.constant 0 : i32
    %c0_i32_0 = arith.constant 0 : i32
    %c0_i32_1 = arith.constant 0 : i32
    return %c0_i32, %c0_i32_0 : i32, i32
  }
  func.func @transform_2(%arg0: i32) -> (i32, i32) {
    %c0_i32 = arith.constant 0 : i32
    %c0_i32_0 = arith.constant 0 : i32
    %c0_i32_1 = arith.constant 0 : i32
    return %c0_i32, %c0_i32_0 : i32, i32
  }
  func.func @transform_3(%arg0: i32) -> (i32, i32) {
    %c0_i32 = arith.constant 0 : i32
    %c0_i32_0 = arith.constant 0 : i32
    return %arg0, %c0_i32 : i32, i32
  }
  func.func @transform_4(%arg0: i32) -> (i32, i32) {
    %c0_i32 = arith.constant 0 : i32
    %c0_i32_0 = arith.constant 0 : i32
    return %arg0, %c0_i32 : i32, i32
  }
  func.func @transform_5(%arg0: i32) -> (i32, i32) {
    %c0_i32 = arith.constant 0 : i32
    %c0_i32_0 = arith.constant 0 : i32
    return %arg0, %c0_i32 : i32, i32
  }
}

module attributes {stable_mosaic.version = 11 : i64} {
  func.func @_head_kernel(%arg0: i32, %arg1: memref<4x64x128xf32, #tpu.memory_space<vmem>>, %arg2: memref<1x1x128xf32, #tpu.memory_space<vmem>>, %arg3: memref<1x1x128xf32, #tpu.memory_space<vmem>>, %arg4: memref<1x64x128xf32, #tpu.memory_space<vmem>>, %arg5: memref<1x1xf32, #tpu.memory_space<vmem>>, %arg6: memref<4x1xf32, #tpu.memory_space<vmem>>) attributes {dimension_semantics = [#tpu.dimension_semantics<parallel>], iteration_bounds = array<i64: 1>, scalar_prefetch = 0 : i64, scratch_operands = 0 : i64, tpu.core_type = #tpu.core_type<tc>, window_params = [{transform_indices = @transform_0, window_bounds = array<i64: 4, 64, 128>}, {pipeline_mode = #tpu.pipeline_mode<synchronous>, transform_indices = @transform_1, window_bounds = array<i64: 1, 1, 128>}, {pipeline_mode = #tpu.pipeline_mode<synchronous>, transform_indices = @transform_2, window_bounds = array<i64: 1, 1, 128>}, {pipeline_mode = #tpu.pipeline_mode<synchronous>, transform_indices = @transform_3, window_bounds = array<i64: 1, 64, 128>}, {pipeline_mode = #tpu.pipeline_mode<synchronous>, transform_indices = @transform_4, window_bounds = array<i64: 1, 1>}, {transform_indices = @transform_5, window_bounds = array<i64: 4, 1>}]} {
    %c0 = arith.constant 0 : index
    %c0_0 = arith.constant 0 : index
    %c0_1 = arith.constant 0 : index
    %0 = vector.load %arg1[%c0, %c0_0, %c0_1] : memref<4x64x128xf32, #tpu.memory_space<vmem>>, vector<4x64x128xf32>
    %c0_2 = arith.constant 0 : index
    %c0_3 = arith.constant 0 : index
    %c0_4 = arith.constant 0 : index
    %1 = vector.load %arg2[%c0_2, %c0_3, %c0_4] : memref<1x1x128xf32, #tpu.memory_space<vmem>>, vector<1x1x128xf32>
    %2 = vector.broadcast %1 : vector<1x1x128xf32> to vector<4x64x128xf32>
    %3 = arith.mulf %0, %2 : vector<4x64x128xf32>
    %c0_5 = arith.constant 0 : index
    %c0_6 = arith.constant 0 : index
    %c0_7 = arith.constant 0 : index
    %4 = vector.load %arg3[%c0_5, %c0_6, %c0_7] : memref<1x1x128xf32, #tpu.memory_space<vmem>>, vector<1x1x128xf32>
    %5 = vector.broadcast %4 : vector<1x1x128xf32> to vector<4x64x128xf32>
    %6 = arith.addf %3, %5 : vector<4x64x128xf32>
    %cst = arith.constant 0.000000e+00 : f32
    %7 = vector.broadcast %cst : f32 to vector<4x64x128xf32>
    %8 = arith.cmpf ogt, %6, %7 : vector<4x64x128xf32>
    %cst_8 = arith.constant 2.000000e-01 : f32
    %9 = vector.broadcast %cst_8 : f32 to vector<4x64x128xf32>
    %10 = arith.mulf %9, %6 : vector<4x64x128xf32>
    %11 = arith.select %8, %6, %10 : vector<4x64x128xi1>, vector<4x64x128xf32>
    %c0_9 = arith.constant 0 : index
    %c0_10 = arith.constant 0 : index
    %c0_11 = arith.constant 0 : index
    %12 = vector.load %arg4[%c0_9, %c0_10, %c0_11] : memref<1x64x128xf32, #tpu.memory_space<vmem>>, vector<1x64x128xf32>
    %13 = vector.broadcast %12 : vector<1x64x128xf32> to vector<4x64x128xf32>
    %14 = arith.mulf %11, %13 : vector<4x64x128xf32>
    %cst_12 = arith.constant dense<0.000000e+00> : vector<4x64xf32>
    %15 = vector.multi_reduction <add>, %14, %cst_12 [2] : vector<4x64x128xf32> to vector<4x64xf32>
    %cst_13 = arith.constant dense<0.000000e+00> : vector<4xf32>
    %16 = vector.multi_reduction <add>, %15, %cst_13 [1] : vector<4x64xf32> to vector<4xf32>
    %17 = vector.shape_cast %16 : vector<4xf32> to vector<4x1xf32>
    %c0_14 = arith.constant 0 : index
    %c0_15 = arith.constant 0 : index
    %18 = vector.load %arg5[%c0_14, %c0_15] : memref<1x1xf32, #tpu.memory_space<vmem>>, vector<1x1xf32>
    %19 = vector.broadcast %18 : vector<1x1xf32> to vector<4x1xf32>
    %20 = arith.addf %17, %19 : vector<4x1xf32>
    %cst_16 = arith.constant 0.000000e+00 : f32
    %21 = vector.broadcast %cst_16 : f32 to vector<4x1xf32>
    %22 = arith.subf %21, %20 : vector<4x1xf32>
    %23 = math.exp %22 : vector<4x1xf32>
    %cst_17 = arith.constant 1.000000e+00 : f32
    %24 = vector.broadcast %cst_17 : f32 to vector<4x1xf32>
    %25 = arith.addf %24, %23 : vector<4x1xf32>
    %cst_18 = arith.constant 1.000000e+00 : f32
    %26 = vector.broadcast %cst_18 : f32 to vector<4x1xf32>
    %27 = arith.divf %26, %25 : vector<4x1xf32>
    %c0_19 = arith.constant 0 : index
    %c0_20 = arith.constant 0 : index
    %28 = vector.load %arg6[%c0_19, %c0_20] : memref<4x1xf32, #tpu.memory_space<vmem>>, vector<4x1xf32>
    tpu.vector_store %arg6[%c0_19, %c0_20], %27 {strides = array<i32>} : memref<4x1xf32, #tpu.memory_space<vmem>>, vector<4x1xf32>,
    return
  }
  func.func @transform_0(%arg0: i32) -> (i32, i32, i32) {
    %c0_i32 = arith.constant 0 : i32
    %c0_i32_0 = arith.constant 0 : i32
    %c0_i32_1 = arith.constant 0 : i32
    return %arg0, %c0_i32, %c0_i32_0 : i32, i32, i32
  }
  func.func @transform_1(%arg0: i32) -> (i32, i32, i32) {
    %c0_i32 = arith.constant 0 : i32
    %c0_i32_0 = arith.constant 0 : i32
    %c0_i32_1 = arith.constant 0 : i32
    %c0_i32_2 = arith.constant 0 : i32
    return %c0_i32, %c0_i32_0, %c0_i32_1 : i32, i32, i32
  }
  func.func @transform_2(%arg0: i32) -> (i32, i32, i32) {
    %c0_i32 = arith.constant 0 : i32
    %c0_i32_0 = arith.constant 0 : i32
    %c0_i32_1 = arith.constant 0 : i32
    %c0_i32_2 = arith.constant 0 : i32
    return %c0_i32, %c0_i32_0, %c0_i32_1 : i32, i32, i32
  }
  func.func @transform_3(%arg0: i32) -> (i32, i32, i32) {
    %c0_i32 = arith.constant 0 : i32
    %c0_i32_0 = arith.constant 0 : i32
    %c0_i32_1 = arith.constant 0 : i32
    %c0_i32_2 = arith.constant 0 : i32
    return %c0_i32, %c0_i32_0, %c0_i32_1 : i32, i32, i32
  }
  func.func @transform_4(%arg0: i32) -> (i32, i32) {
    %c0_i32 = arith.constant 0 : i32
    %c0_i32_0 = arith.constant 0 : i32
    %c0_i32_1 = arith.constant 0 : i32
    return %c0_i32, %c0_i32_0 : i32, i32
  }
  func.func @transform_5(%arg0: i32) -> (i32, i32) {
    %c0_i32 = arith.constant 0 : i32
    %c0_i32_0 = arith.constant 0 : i32
    return %arg0, %c0_i32 : i32, i32
  }
}

</mosaic_0001>

<bundles_post_ra>
// kernel: tile.8
= control target key start
LH: loop header
LB: loop body
LE: loop exit
PB: predicated region body
PF: predicated region fallthrough
CT: control target
= control target key end

     0   :  { %s22_s0 = inlined_call_operand.vmem [shape: f32[64], index: 0, kind: input, shape index: {}]   ;;  %s23_s1 = inlined_call_operand.vmem [shape: f32[2,64], index: 1, kind: output, shape index: {}]  }
   0x1   :  { %v4_v0 = vld [vmem:[%s22_s0] ss:$0 sm:$0xff] }
   0x2   :  { %5 = vst [vmem:[%s23_s1] sm:$0x3] %v4_v0 }

// kernel: tile.9
= control target key start
LH: loop header
LB: loop body
LE: loop exit
PB: predicated region body
PF: predicated region fallthrough
CT: control target
= control target key end

     0   :  { %vm8_vm0 = vcmask 523264   ;;  %vm14_vm1 = vcmask 1048064   ;;  %s42_s0 = inlined_call_operand.vmem [shape: f32[2,64], index: 0, kind: input, shape index: {}]   ;;  %s43_s1 = inlined_call_operand.vmem [shape: f32[1,128], index: 1, kind: output, shape index: {}]  }
   0x1   :  { %v5_v0 = vld [vmem:[%s42_s0] sm:$0x3]  ;;  %s25_s0 = smov 64  }
   0x2   :  { %6 = vst [vmem:[#allocation1] sm:$0x3] %v5_v0 }
   0x9   :  { %v11_v1 = vld [vmem:[#allocation1 + $0x1] sm:$0x1]   ;;  %v7_v2 = vld [vmem:[#allocation1] sm:$0x1]  }
   0xa   :  { %12 = vrot.lane.b32.xlu0 %v11_v1, %s25_s0  ;;  %9 = vst.msk [vmem:[#allocation0] sm:$0x1] %vm8_vm0, %v7_v2  }
  0x7c   :  { %v13_v3 = vpop.permute.xlu0 %12  }
  0x7d   :  { %15 = vst.msk [vmem:[#allocation0] sm:$0x1] %vm14_vm1, %v13_v3  }
  0x84   :  { %v20_v4 = vld [vmem:[#allocation0] sm:$0x1] }
  0x85   :  { %23 = vst [vmem:[%s43_s1] sm:$0x1] %v20_v4 }

// kernel: discriminator_forward.3
= control target key start
LH: loop header
LB: loop body
LE: loop exit
PB: predicated region body
PF: predicated region fallthrough
CT: control target
= control target key end

     0   :  { %vm278_vm0 = vcmask 523264   ;;  %s2048_s1 = inlined_call_operand.vmem [shape: bf16[64,128], index: 1, kind: input, shape index: {}]   ;;  %s2049_s0 = inlined_call_operand.vmem [shape: bf16[512,64], index: 0, kind: input, shape index: {}]   ;;  %s2050_s2 = inlined_call_operand.vmem [shape: f32[1,128], index: 2, kind: input, shape index: {}]   ;;  %s2051_s3 = inlined_call_operand.vmem [shape: bf16[512,128], index: 3, kind: output, shape index: {}]  }
   0x1   :  { %v1684_v0 = vld [vmem:[%s2048_s1 + $0x18] sm:$0xff]   ;;  %v1685_v1 = vld [vmem:[%s2048_s1 + $0x10] sm:$0xff]   ;;  %v1686_v2 = vld [vmem:[%s2048_s1 + $0x8] sm:$0xff]  }
   0x2   :  { %1604 = vmatprep.subr.bf16.mxu0 %v1684_v0  ;;  %1676 = vmatprep.subr.bf16.mxu1 %v1684_v0  ;;  %v1688_v3 = vld [vmem:[%s2049_s0] sm:$0xff]   ;;  %v1690_v6 = vld [vmem:[%s2049_s0 + $0x8] sm:$0xff]   ;;  %v1692_v8 = vld [vmem:[%s2049_s0 + $0x10] sm:$0xff]  }
   0x3   :  { %1605 = vmatpush3.bf16.msra.mxu0 %v1684_v0  ;;  %1680 = vmatpush3.bf16.msra.mxu1 %v1684_v0  ;;  %v1689_v4 = vld [vmem:[%s2049_s0 + $0x80] sm:$0xff]   ;;  %v1691_v7 = vld [vmem:[%s2049_s0 + $0x88] sm:$0xff]   ;;  %v1693_v9 = vld [vmem:[%s2049_s0 + $0x90] sm:$0xff]  }
   0x4   :  { %1606 = vmatprep.subr.bf16.mxu0 %v1685_v1  ;;  %1677 = vmatprep.subr.bf16.mxu1 %v1685_v1  ;;  %v1687_v5 = vld [vmem:[%s2048_s1] sm:$0xff]   ;;  %v1694_v10 = vld [vmem:[%s2049_s0 + $0x18] sm:$0xff]   ;;  %v1698_v14 = vld [vmem:[%s2049_s0 + $0x28] sm:$0xff]  }
   0x5   :  { %1612 = vmatprep.mubr.msk.bf16.mxu0 %vm278_vm0, %v1688_v3  ;;  %1644 = vmatprep.mubr.msk.bf16.mxu1 %vm278_vm0, %v1689_v4  ;;  %v1695_v11 = vld [vmem:[%s2049_s0 + $0x98] sm:$0xff]   ;;  %v1696_v12 = vld [vmem:[%s2049_s0 + $0x20] sm:$0xff]   ;;  %v1699_v15 = vld [vmem:[%s2049_s0 + $0xa8] sm:$0xff]  }
   0x6   :  { %v1697_v13 = vld [vmem:[%s2049_s0 + $0xa0] sm:$0xff]   ;;  %v1700_v16 = vld [vmem:[%s2049_s0 + $0x30] sm:$0xff]   ;;  %v1702_v18 = vld [vmem:[%s2049_s0 + $0x38] sm:$0xff]  }
   0x7   :  { %1607 = vmatpush3.bf16.msra.mxu0 %v1685_v1  ;;  %1681 = vmatpush3.bf16.msra.mxu1 %v1685_v1  ;;  %v1701_v17 = vld [vmem:[%s2049_s0 + $0xb0] sm:$0xff]   ;;  %v1703_v19 = vld [vmem:[%s2049_s0 + $0xb8] sm:$0xff]   ;;  %v1704_v20 = vld [vmem:[%s2049_s0 + $0x40] sm:$0xff]  }
   0x8   :  { %1608 = vmatprep.subr.bf16.mxu0 %v1686_v2  ;;  %1678 = vmatprep.subr.bf16.mxu1 %v1686_v2  ;;  %v1705_v21 = vld [vmem:[%s2049_s0 + $0xc0] sm:$0xff]   ;;  %v1706_v22 = vld [vmem:[%s2049_s0 + $0x48] sm:$0xff]   ;;  %v1708_v24 = vld [vmem:[%s2049_s0 + $0x50] sm:$0xff]  }
   0x9   :  { %v1707_v23 = vld [vmem:[%s2049_s0 + $0xc8] sm:$0xff]   ;;  %v1709_v25 = vld [vmem:[%s2049_s0 + $0xd0] sm:$0xff]   ;;  %v1710_v26 = vld [vmem:[%s2049_s0 + $0x58] sm:$0xff]  }
   0xa   :  { %v1711_v27 = vld [vmem:[%s2049_s0 + $0xd8] sm:$0xff]   ;;  %v1712_v28 = vld [vmem:[%s2049_s0 + $0x60] sm:$0xff]   ;;  %v1714_v30 = vld [vmem:[%s2049_s0 + $0x68] sm:$0xff]  }
   0xb   :  { %1609 = vmatpush3.bf16.msra.mxu0 %v1686_v2  ;;  %1682 = vmatpush3.bf16.msra.mxu1 %v1686_v2  ;;  %v1713_v29 = vld [vmem:[%s2049_s0 + $0xe0] sm:$0xff]   ;;  %v1715_v31 = vld [vmem:[%s2049_s0 + $0xe8] sm:$0xff]   ;;  %v1716_v32 = vld [vmem:[%s2049_s0 + $0x70] sm:$0xff]  }
   0xc   :  { %1610 = vmatprep.subr.bf16.mxu0 %v1687_v5  ;;  %1679 = vmatprep.subr.bf16.mxu1 %v1687_v5  ;;  %v1717_v33 = vld [vmem:[%s2049_s0 + $0xf0] sm:$0xff]   ;;  %v1718_v34 = vld [vmem:[%s2049_s0 + $0x78] sm:$0xff]   ;;  %v1883_v36 = vld [vmem:[%s2050_s2] ss:$0 sm:$0xff] }
   0xd   :  { %v1719_v35 = vld [vmem:[%s2049_s0 + $0xf8] sm:$0xff]  }
   0xf   :  { %1611 = vmatpush3.bf16.msra.mxu0 %v1687_v5  ;;  %1683 = vmatpush3.bf16.msra.mxu1 %v1687_v5 }
  0x12   :  { %1613 = vmatmul.mubr.msk.bf16.vlgmr.msra.gmra.mxu0 %vm278_vm0, %v1690_v6  ;;  %1645 = vmatmul.mubr.msk.bf16.vlgmr.msra.gmra.mxu1 %vm278_vm0, %v1691_v7 }
  0x13   :  { %1616 = vmatprep.mubr.msk.bf16.mxu0 %vm278_vm0, %v1692_v8  ;;  %1648 = vmatprep.mubr.msk.bf16.mxu1 %vm278_vm0, %v1693_v9 }
  0x1a   :  { %1617 = vmatmul.mubr.msk.bf16.gmra.mxu0 %vm278_vm0, %v1694_v10  ;;  %1649 = vmatmul.mubr.msk.bf16.gmra.mxu1 %vm278_vm0, %v1695_v11 }
  0x1b   :  { %1620 = vmatprep.mubr.msk.bf16.mxu0 %vm278_vm0, %v1696_v12  ;;  %1652 = vmatprep.mubr.msk.bf16.mxu1 %vm278_vm0, %v1697_v13 }
  0x22   :  { %1621 = vmatmul.mubr.msk.bf16.gmra.mxu0 %vm278_vm0, %v1698_v14  ;;  %1653 = vmatmul.mubr.msk.bf16.gmra.mxu1 %vm278_vm0, %v1699_v15 }
  0x23   :  { %1624 = vmatprep.mubr.msk.bf16.mxu0 %vm278_vm0, %v1700_v16  ;;  %1656 = vmatprep.mubr.msk.bf16.mxu1 %vm278_vm0, %v1701_v17 }
  0x2a   :  { %1625 = vmatmul.mubr.msk.bf16.gmra.mxu0 %vm278_vm0, %v1702_v18  ;;  %1657 = vmatmul.mubr.msk.bf16.gmra.mxu1 %vm278_vm0, %v1703_v19 }
  0x2b   :  { %1628 = vmatprep.mubr.msk.bf16.mxu0 %vm278_vm0, %v1704_v20  ;;  %1660 = vmatprep.mubr.msk.bf16.mxu1 %vm278_vm0, %v1705_v21 }
  0x32   :  { %1629 = vmatmul.mubr.msk.bf16.gmra.mxu0 %vm278_vm0, %v1706_v22  ;;  %1661 = vmatmul.mubr.msk.bf16.gmra.mxu1 %vm278_vm0, %v1707_v23 }
  0x33   :  { %1632 = vmatprep.mubr.msk.bf16.mxu0 %vm278_vm0, %v1708_v24  ;;  %1664 = vmatprep.mubr.msk.bf16.mxu1 %vm278_vm0, %v1709_v25 }
  0x3a   :  { %1633 = vmatmul.mubr.msk.bf16.gmra.mxu0 %vm278_vm0, %v1710_v26  ;;  %1665 = vmatmul.mubr.msk.bf16.gmra.mxu1 %vm278_vm0, %v1711_v27 }
  0x3b   :  { %1636 = vmatprep.mubr.msk.bf16.mxu0 %vm278_vm0, %v1712_v28  ;;  %1668 = vmatprep.mubr.msk.bf16.mxu1 %vm278_vm0, %v1713_v29 }
  0x42   :  { %1637 = vmatmul.mubr.msk.bf16.gmra.mxu0 %vm278_vm0, %v1714_v30  ;;  %1669 = vmatmul.mubr.msk.bf16.gmra.mxu1 %vm278_vm0, %v1715_v31 }
  0x43   :  { %1640 = vmatprep.mubr.msk.bf16.mxu0 %vm278_vm0, %v1716_v32  ;;  %1672 = vmatprep.mubr.msk.bf16.mxu1 %vm278_vm0, %v1717_v33 }
  0x4a   :  { %1641 = vmatmul.mubr.msk.bf16.gmra.mxu0 %vm278_vm0, %v1718_v34  ;;  %1673 = vmatmul.mubr.msk.bf16.gmra.mxu1 %vm278_vm0, %v1719_v35 }
  0xd2   :  { %v1614_v37 = vpop.f32.mrf.mxu0  ;;  %v1646_v38 = vpop.f32.mrf.mxu1 }
  0xd3   :  { %v418_v39 = vadd.f32 %v1614_v37, %v1883_v36  ;;  %v546_v40 = vadd.f32 %v1646_v38, %v1883_v36 }
  0xd4   :  { %v409_v41 = vpop.f32.mrf.mxu0  ;;  %v537_v42 = vpop.f32.mrf.mxu1 }
  0xd5   :  { %vm666_vm1 = vcmp.gt.f32.partialorder %v418_v39, 0.0  ;;  %v730_v43 = vmul.f32 0.2, %v418_v39  ;;  %vm698_vm2 = vcmp.gt.f32.partialorder %v546_v40, 0.0  ;;  %v762_v44 = vmul.f32 0.2, %v546_v40 }
  0xd6   :  { %v410_v45 = vadd.f32 %v1883_v36, %v409_v41  ;;  %v538_v46 = vadd.f32 %v1883_v36, %v537_v42  ;;  %v1615_v47 = vpop.f32.mrf.mxu0  ;;  %v1647_v48 = vpop.f32.mrf.mxu1 }
  0xd7   :  { %v794_v49 = vsel %vm666_vm1, %v418_v39, %v730_v43  ;;  %v421_v50 = vadd.f32 %v1615_v47, %v1883_v36  ;;  %v549_v51 = vadd.f32 %v1647_v48, %v1883_v36  ;;  %v826_v52 = vsel %vm698_vm2, %v546_v40, %v762_v44 }
  0xd8   :  { %vm664_vm3 = vcmp.gt.f32.partialorder %v410_v45, 0.0  ;;  %v728_v53 = vmul.f32 0.2, %v410_v45  ;;  %vm696_vm4 = vcmp.gt.f32.partialorder %v538_v46, 0.0  ;;  %v412_v54 = vpop.f32.mrf.mxu0  ;;  %v540_v55 = vpop.f32.mrf.mxu1  ;;  %v760_v59 = vmul.f32 0.2, %v538_v46 }
  0xd9   :  { %vm667_vm5 = vcmp.gt.f32.partialorder %v421_v50, 0.0  ;;  %v731_v56 = vmul.f32 0.2, %v421_v50  ;;  %vm699_vm6 = vcmp.gt.f32.partialorder %v549_v51, 0.0  ;;  %v763_v57 = vmul.f32 0.2, %v549_v51 }
  0xda   :  { %v792_v58 = vsel %vm664_vm3, %v410_v45, %v728_v53  ;;  %v413_v60 = vadd.f32 %v1883_v36, %v412_v54  ;;  %v541_v61 = vadd.f32 %v1883_v36, %v540_v55  ;;  %v1618_v62 = vpop.f32.mrf.mxu0  ;;  %v1650_v63 = vpop.f32.mrf.mxu1  ;;  %v824_v11 = vsel %vm696_vm4, %v538_v46, %v760_v59 }
  0xdb   :  { %v795_v0 = vsel %vm667_vm5, %v421_v50, %v731_v56  ;;  %v827_v1 = vsel %vm699_vm6, %v549_v51, %v763_v57  ;;  %v434_v2 = vadd.f32 %v1618_v62, %v1883_v36  ;;  %v562_v3 = vadd.f32 %v1650_v63, %v1883_v36 }
  0xdc   :  { %v1385_v4 = vpack.c.bf16 %v795_v0, %v794_v49  ;;  %v1465_v5 = vpack.c.bf16 %v827_v1, %v826_v52  ;;  %vm665_vm7 = vcmp.gt.f32.partialorder %v413_v60, 0.0  ;;  %v729_v6 = vmul.f32 0.2, %v413_v60  ;;  %v425_v7 = vpop.f32.mrf.mxu0  ;;  %v553_v8 = vpop.f32.mrf.mxu1 }
  0xdd   :  { %vm697_vm8 = vcmp.gt.f32.partialorder %v541_v61, 0.0  ;;  %v761_v9 = vmul.f32 0.2, %v541_v61  ;;  %vm670_vm9 = vcmp.gt.f32.partialorder %v434_v2, 0.0  ;;  %v734_v10 = vmul.f32 0.2, %v434_v2 }
  0xde   :  { %1537 = vst [vmem:[%s2051_s3 + $0x8] sm:$0xff] %v1385_v4   ;;  %1553 = vst [vmem:[%s2051_s3 + $0x88] sm:$0xff] %v1465_v5   ;;  %v793_v12 = vsel %vm665_vm7, %v413_v60, %v729_v6  ;;  %v766_v13 = vmul.f32 0.2, %v562_v3  ;;  %v426_v14 = vadd.f32 %v1883_v36, %v425_v7  ;;  %v1619_v15 = vpop.f32.mrf.mxu0  ;;  %v1651_v16 = vpop.f32.mrf.mxu1  ;;  %vm702_vm10 = vcmp.gt.f32.partialorder %v562_v3, 0.0 }
  0xdf   :  { %v1380_v17 = vpack.c.bf16 %v793_v12, %v792_v58  ;;  %v825_v18 = vsel %vm697_vm8, %v541_v61, %v761_v9  ;;  %v554_v19 = vadd.f32 %v1883_v36, %v553_v8  ;;  %v798_v21 = vsel %vm670_vm9, %v434_v2, %v734_v10 }
  0xe0   :  { %v1460_v20 = vpack.c.bf16 %v825_v18, %v824_v11  ;;  %vm668_vm11 = vcmp.gt.f32.partialorder %v426_v14, 0.0  ;;  %v732_v22 = vmul.f32 0.2, %v426_v14  ;;  %v428_v23 = vpop.f32.mrf.mxu0  ;;  %v556_v24 = vpop.f32.mrf.mxu1  ;;  %v437_v26 = vadd.f32 %v1619_v15, %v1883_v36 }
  0xe1   :  { %1381 = vst [vmem:[%s2051_s3] sm:$0xff] %v1380_v17   ;;  %vm700_vm12 = vcmp.gt.f32.partialorder %v554_v19, 0.0  ;;  %v764_v25 = vmul.f32 0.2, %v554_v19  ;;  %v565_v27 = vadd.f32 %v1651_v16, %v1883_v36  ;;  %v830_v28 = vsel %vm702_vm10, %v562_v3, %v766_v13 }
  0xe2   :  { %1552 = vst [vmem:[%s2051_s3 + $0x80] sm:$0xff] %v1460_v20   ;;  %v796_v29 = vsel %vm668_vm11, %v426_v14, %v732_v22  ;;  %v429_v30 = vadd.f32 %v1883_v36, %v428_v23  ;;  %v557_v31 = vadd.f32 %v1883_v36, %v556_v24  ;;  %v1622_v32 = vpop.f32.mrf.mxu0  ;;  %v1654_v33 = vpop.f32.mrf.mxu1  ;;  %vm671_vm13 = vcmp.gt.f32.partialorder %v437_v26, 0.0 }
  0xe3   :  { %v828_v34 = vsel %vm700_vm12, %v554_v19, %v764_v25  ;;  %v735_v35 = vmul.f32 0.2, %v437_v26  ;;  %vm703_vm14 = vcmp.gt.f32.partialorder %v565_v27, 0.0  ;;  %v767_v37 = vmul.f32 0.2, %v565_v27 }
  0xe4   :  { %vm669_vm15 = vcmp.gt.f32.partialorder %v429_v30, 0.0  ;;  %v733_v38 = vmul.f32 0.2, %v429_v30  ;;  %vm701_vm0 = vcmp.gt.f32.partialorder %v557_v31, 0.0  ;;  %v441_v39 = vpop.f32.mrf.mxu0  ;;  %v569_v40 = vpop.f32.mrf.mxu1  ;;  %v765_v42 = vmul.f32 0.2, %v557_v31 }
  0xe5   :  { %v799_v41 = vsel %vm671_vm13, %v437_v26, %v735_v35  ;;  %v450_v43 = vadd.f32 %v1622_v32, %v1883_v36  ;;  %v578_v44 = vadd.f32 %v1654_v33, %v1883_v36  ;;  %v831_v46 = vsel %vm703_vm14, %v565_v27, %v767_v37 }
  0xe6   :  { %v1395_v45 = vpack.c.bf16 %v799_v41, %v798_v21  ;;  %v797_v47 = vsel %vm669_vm15, %v429_v30, %v733_v38  ;;  %v442_v48 = vadd.f32 %v1883_v36, %v441_v39  ;;  %v1623_v49 = vpop.f32.mrf.mxu0  ;;  %v1655_v50 = vpop.f32.mrf.mxu1  ;;  %v1475_v51 = vpack.c.bf16 %v831_v46, %v830_v28 }
  0xe7   :  { %v1390_v52 = vpack.c.bf16 %v797_v47, %v796_v29  ;;  %v829_v53 = vsel %vm701_vm0, %v557_v31, %v765_v42  ;;  %vm674_vm1 = vcmp.gt.f32.partialorder %v450_v43, 0.0  ;;  %v738_v55 = vmul.f32 0.2, %v450_v43 }
  0xe8   :  { %1539 = vst [vmem:[%s2051_s3 + $0x18] sm:$0xff] %v1395_v45   ;;  %v1470_v54 = vpack.c.bf16 %v829_v53, %v828_v34  ;;  %vm706_vm2 = vcmp.gt.f32.partialorder %v578_v44, 0.0  ;;  %v770_v56 = vmul.f32 0.2, %v578_v44  ;;  %v444_v57 = vpop.f32.mrf.mxu0  ;;  %v572_v58 = vpop.f32.mrf.mxu1  ;;  %1555 = vst [vmem:[%s2051_s3 + $0x98] sm:$0xff] %v1475_v51   ;;  %vm672_vm3 = vcmp.gt.f32.partialorder %v442_v48, 0.0 }
  0xe9   :  { %1538 = vst [vmem:[%s2051_s3 + $0x10] sm:$0xff] %v1390_v52   ;;  %v736_v59 = vmul.f32 0.2, %v442_v48  ;;  %v570_v60 = vadd.f32 %v1883_v36, %v569_v40  ;;  %v453_v61 = vadd.f32 %v1623_v49, %v1883_v36  ;;  %v802_v62 = vsel %vm674_vm1, %v450_v43, %v738_v55 }
  0xea   :  { %1554 = vst [vmem:[%s2051_s3 + $0x90] sm:$0xff] %v1470_v54   ;;  %v834_v63 = vsel %vm706_vm2, %v578_v44, %v770_v56  ;;  %v581_v0 = vadd.f32 %v1655_v50, %v1883_v36  ;;  %v445_v1 = vadd.f32 %v1883_v36, %v444_v57  ;;  %v1626_v2 = vpop.f32.mrf.mxu0  ;;  %v1658_v3 = vpop.f32.mrf.mxu1  ;;  %v573_v12 = vadd.f32 %v1883_v36, %v572_v58 }
  0xeb   :  { %v800_v4 = vsel %vm672_vm3, %v442_v48, %v736_v59  ;;  %vm704_vm4 = vcmp.gt.f32.partialorder %v570_v60, 0.0  ;;  %v768_v5 = vmul.f32 0.2, %v570_v60  ;;  %vm675_vm5 = vcmp.gt.f32.partialorder %v453_v61, 0.0 }
  0xec   :  { %v739_v6 = vmul.f32 0.2, %v453_v61  ;;  %vm707_vm6 = vcmp.gt.f32.partialorder %v581_v0, 0.0  ;;  %v771_v7 = vmul.f32 0.2, %v581_v0  ;;  %vm673_vm7 = vcmp.gt.f32.partialorder %v445_v1, 0.0  ;;  %v457_v8 = vpop.f32.mrf.mxu0  ;;  %v585_v9 = vpop.f32.mrf.mxu1 }
  0xed   :  { %v832_v10 = vsel %vm704_vm4, %v570_v60, %v768_v5  ;;  %v737_v11 = vmul.f32 0.2, %v445_v1  ;;  %v466_v13 = vadd.f32 %v1626_v2, %v1883_v36  ;;  %v594_v16 = vadd.f32 %v1658_v3, %v1883_v36 }
  0xee   :  { %v803_v14 = vsel %vm675_vm5, %v453_v61, %v739_v6  ;;  %v835_v15 = vsel %vm707_vm6, %v581_v0, %v771_v7  ;;  %v458_v17 = vadd.f32 %v1883_v36, %v457_v8  ;;  %v1627_v18 = vpop.f32.mrf.mxu0  ;;  %v1659_v19 = vpop.f32.mrf.mxu1  ;;  %vm705_vm8 = vcmp.gt.f32.partialorder %v573_v12, 0.0 }
  0xef   :  { %v1405_v20 = vpack.c.bf16 %v803_v14, %v802_v62  ;;  %v1485_v21 = vpack.c.bf16 %v835_v15, %v834_v63  ;;  %v801_v22 = vsel %vm673_vm7, %v445_v1, %v737_v11  ;;  %v769_v24 = vmul.f32 0.2, %v573_v12 }
  0xf0   :  { %v1400_v23 = vpack.c.bf16 %v801_v22, %v800_v4  ;;  %vm678_vm9 = vcmp.gt.f32.partialorder %v466_v13, 0.0  ;;  %v742_v25 = vmul.f32 0.2, %v466_v13  ;;  %v460_v26 = vpop.f32.mrf.mxu0  ;;  %v588_v27 = vpop.f32.mrf.mxu1  ;;  %vm710_vm10 = vcmp.gt.f32.partialorder %v594_v16, 0.0 }
  0xf1   :  { %1541 = vst [vmem:[%s2051_s3 + $0x28] sm:$0xff] %v1405_v20   ;;  %1557 = vst [vmem:[%s2051_s3 + $0xa8] sm:$0xff] %v1485_v21   ;;  %v774_v28 = vmul.f32 0.2, %v594_v16  ;;  %vm676_vm11 = vcmp.gt.f32.partialorder %v458_v17, 0.0  ;;  %v833_v30 = vsel %vm705_vm8, %v573_v12, %v769_v24  ;;  %v586_v32 = vadd.f32 %v1883_v36, %v585_v9 }
  0xf2   :  { %v740_v29 = vmul.f32 0.2, %v458_v17  ;;  %1540 = vst [vmem:[%s2051_s3 + $0x20] sm:$0xff] %v1400_v23   ;;  %v806_v31 = vsel %vm678_vm9, %v466_v13, %v742_v25  ;;  %v469_v33 = vadd.f32 %v1627_v18, %v1883_v36  ;;  %v1630_v34 = vpop.f32.mrf.mxu0  ;;  %v1662_v35 = vpop.f32.mrf.mxu1  ;;  %v1480_v37 = vpack.c.bf16 %v833_v30, %v832_v10 }
  0xf3   :  { %v838_v38 = vsel %vm710_vm10, %v594_v16, %v774_v28  ;;  %v597_v40 = vadd.f32 %v1659_v19, %v1883_v36  ;;  %vm708_vm12 = vcmp.gt.f32.partialorder %v586_v32, 0.0  ;;  %v772_v41 = vmul.f32 0.2, %v586_v32 }
  0xf4   :  { %v804_v39 = vsel %vm676_vm11, %v458_v17, %v740_v29  ;;  %vm679_vm13 = vcmp.gt.f32.partialorder %v469_v33, 0.0  ;;  %v743_v42 = vmul.f32 0.2, %v469_v33  ;;  %v473_v43 = vpop.f32.mrf.mxu0  ;;  %v601_v44 = vpop.f32.mrf.mxu1  ;;  %1556 = vst [vmem:[%s2051_s3 + $0xa0] sm:$0xff] %v1480_v37   ;;  %v461_v46 = vadd.f32 %v1883_v36, %v460_v26 }
  0xf5   :  { %vm711_vm14 = vcmp.gt.f32.partialorder %v597_v40, 0.0  ;;  %v775_v45 = vmul.f32 0.2, %v597_v40  ;;  %v589_v47 = vadd.f32 %v1883_v36, %v588_v27  ;;  %v836_v48 = vsel %vm708_vm12, %v586_v32, %v772_v41 }
  0xf6   :  { %v807_v49 = vsel %vm679_vm13, %v469_v33, %v743_v42  ;;  %v482_v50 = vadd.f32 %v1630_v34, %v1883_v36  ;;  %v610_v51 = vadd.f32 %v1662_v35, %v1883_v36  ;;  %v1631_v52 = vpop.f32.mrf.mxu0  ;;  %v1663_v53 = vpop.f32.mrf.mxu1  ;;  %vm677_vm15 = vcmp.gt.f32.partialorder %v461_v46, 0.0 }
  0xf7   :  { %v1415_v54 = vpack.c.bf16 %v807_v49, %v806_v31  ;;  %v839_v55 = vsel %vm711_vm14, %v597_v40, %v775_v45  ;;  %v741_v56 = vmul.f32 0.2, %v461_v46  ;;  %vm709_vm0 = vcmp.gt.f32.partialorder %v589_v47, 0.0 }
  0xf8   :  { %v1495_v57 = vpack.c.bf16 %v839_v55, %v838_v38  ;;  %v773_v58 = vmul.f32 0.2, %v589_v47  ;;  %vm682_vm1 = vcmp.gt.f32.partialorder %v482_v50, 0.0  ;;  %v476_v59 = vpop.f32.mrf.mxu0  ;;  %v604_v60 = vpop.f32.mrf.mxu1  ;;  %v746_v62 = vmul.f32 0.2, %v482_v50 }
  0xf9   :  { %1543 = vst [vmem:[%s2051_s3 + $0x38] sm:$0xff] %v1415_v54   ;;  %v805_v61 = vsel %vm677_vm15, %v461_v46, %v741_v56  ;;  %vm714_vm2 = vcmp.gt.f32.partialorder %v610_v51, 0.0  ;;  %v778_v63 = vmul.f32 0.2, %v610_v51  ;;  %v474_v2 = vadd.f32 %v1883_v36, %v473_v43 }
  0xfa   :  { %1559 = vst [vmem:[%s2051_s3 + $0xb8] sm:$0xff] %v1495_v57   ;;  %v1410_v0 = vpack.c.bf16 %v805_v61, %v804_v39  ;;  %v837_v1 = vsel %vm709_vm0, %v589_v47, %v773_v58  ;;  %v602_v3 = vadd.f32 %v1883_v36, %v601_v44  ;;  %v1634_v4 = vpop.f32.mrf.mxu0  ;;  %v1666_v5 = vpop.f32.mrf.mxu1  ;;  %v810_v7 = vsel %vm682_vm1, %v482_v50, %v746_v62 }
  0xfb   :  { %v1490_v6 = vpack.c.bf16 %v837_v1, %v836_v48  ;;  %v842_v8 = vsel %vm714_vm2, %v610_v51, %v778_v63  ;;  %v485_v9 = vadd.f32 %v1631_v52, %v1883_v36  ;;  %vm680_vm3 = vcmp.gt.f32.partialorder %v474_v2, 0.0 }
  0xfc   :  { %1542 = vst [vmem:[%s2051_s3 + $0x30] sm:$0xff] %v1410_v0   ;;  %v744_v10 = vmul.f32 0.2, %v474_v2  ;;  %vm712_vm4 = vcmp.gt.f32.partialorder %v602_v3, 0.0  ;;  %v776_v11 = vmul.f32 0.2, %v602_v3  ;;  %v489_v12 = vpop.f32.mrf.mxu0  ;;  %v617_v13 = vpop.f32.mrf.mxu1  ;;  %v613_v15 = vadd.f32 %v1663_v53, %v1883_v36 }
  0xfd   :  { %1558 = vst [vmem:[%s2051_s3 + $0xb0] sm:$0xff] %v1490_v6   ;;  %vm683_vm5 = vcmp.gt.f32.partialorder %v485_v9, 0.0  ;;  %v747_v14 = vmul.f32 0.2, %v485_v9  ;;  %v477_v16 = vadd.f32 %v1883_v36, %v476_v59  ;;  %v605_v19 = vadd.f32 %v1883_v36, %v604_v60 }
  0xfe   :  { %v808_v17 = vsel %vm680_vm3, %v474_v2, %v744_v10  ;;  %v840_v18 = vsel %vm712_vm4, %v602_v3, %v776_v11  ;;  %v498_v20 = vadd.f32 %v1634_v4, %v1883_v36  ;;  %v1635_v21 = vpop.f32.mrf.mxu0  ;;  %v1667_v22 = vpop.f32.mrf.mxu1  ;;  %vm715_vm6 = vcmp.gt.f32.partialorder %v613_v15, 0.0 }
  0xff   :  { %v811_v23 = vsel %vm683_vm5, %v485_v9, %v747_v14  ;;  %v779_v24 = vmul.f32 0.2, %v613_v15  ;;  %vm681_vm7 = vcmp.gt.f32.partialorder %v477_v16, 0.0  ;;  %v745_v26 = vmul.f32 0.2, %v477_v16 }
 0x100   :  { %v1425_v25 = vpack.c.bf16 %v811_v23, %v810_v7  ;;  %vm713_vm8 = vcmp.gt.f32.partialorder %v605_v19, 0.0  ;;  %v777_v27 = vmul.f32 0.2, %v605_v19  ;;  %v492_v28 = vpop.f32.mrf.mxu0  ;;  %v620_v29 = vpop.f32.mrf.mxu1  ;;  %vm686_vm9 = vcmp.gt.f32.partialorder %v498_v20, 0.0 }
 0x101   :  { %v843_v30 = vsel %vm715_vm6, %v613_v15, %v779_v24  ;;  %v750_v31 = vmul.f32 0.2, %v498_v20  ;;  %v626_v32 = vadd.f32 %v1666_v5, %v1883_v36  ;;  %v809_v34 = vsel %vm681_vm7, %v477_v16, %v745_v26 }
 0x102   :  { %1545 = vst [vmem:[%s2051_s3 + $0x48] sm:$0xff] %v1425_v25   ;;  %v1505_v33 = vpack.c.bf16 %v843_v30, %v842_v8  ;;  %v841_v35 = vsel %vm713_vm8, %v605_v19, %v777_v27  ;;  %v490_v37 = vadd.f32 %v1883_v36, %v489_v12  ;;  %v1638_v38 = vpop.f32.mrf.mxu0  ;;  %v1670_v39 = vpop.f32.mrf.mxu1  ;;  %v1420_v40 = vpack.c.bf16 %v809_v34, %v808_v17 }
 0x103   :  { %v1500_v41 = vpack.c.bf16 %v841_v35, %v840_v18  ;;  %v814_v42 = vsel %vm686_vm9, %v498_v20, %v750_v31  ;;  %vm718_vm10 = vcmp.gt.f32.partialorder %v626_v32, 0.0  ;;  %v782_v43 = vmul.f32 0.2, %v626_v32 }
 0x104   :  { %1561 = vst [vmem:[%s2051_s3 + $0xc8] sm:$0xff] %v1505_v33   ;;  %vm684_vm11 = vcmp.gt.f32.partialorder %v490_v37, 0.0  ;;  %v748_v44 = vmul.f32 0.2, %v490_v37  ;;  %v618_v45 = vadd.f32 %v1883_v36, %v617_v13  ;;  %v505_v46 = vpop.f32.mrf.mxu0  ;;  %v633_v47 = vpop.f32.mrf.mxu1  ;;  %1544 = vst [vmem:[%s2051_s3 + $0x40] sm:$0xff] %v1420_v40   ;;  %v501_v48 = vadd.f32 %v1635_v21, %v1883_v36 }
 0x105   :  { %1560 = vst [vmem:[%s2051_s3 + $0xc0] sm:$0xff] %v1500_v41   ;;  %v629_v49 = vadd.f32 %v1667_v22, %v1883_v36  ;;  %v493_v50 = vadd.f32 %v1883_v36, %v492_v28  ;;  %v621_v51 = vadd.f32 %v1883_v36, %v620_v29  ;;  %v846_v52 = vsel %vm718_vm10, %v626_v32, %v782_v43 }
 0x106   :  { %v812_v53 = vsel %vm684_vm11, %v490_v37, %v748_v44  ;;  %vm716_vm12 = vcmp.gt.f32.partialorder %v618_v45, 0.0  ;;  %v780_v54 = vmul.f32 0.2, %v618_v45  ;;  %v1639_v55 = vpop.f32.mrf.mxu0  ;;  %v1671_v56 = vpop.f32.mrf.mxu1  ;;  %vm687_vm13 = vcmp.gt.f32.partialorder %v501_v48, 0.0 }
 0x107   :  { %v751_v57 = vmul.f32 0.2, %v501_v48  ;;  %vm719_vm14 = vcmp.gt.f32.partialorder %v629_v49, 0.0  ;;  %v783_v58 = vmul.f32 0.2, %v629_v49  ;;  %vm685_vm15 = vcmp.gt.f32.partialorder %v493_v50, 0.0 }
 0x108   :  { %v844_v59 = vsel %vm716_vm12, %v618_v45, %v780_v54  ;;  %v749_v60 = vmul.f32 0.2, %v493_v50  ;;  %vm717_vm0 = vcmp.gt.f32.partialorder %v621_v51, 0.0  ;;  %v508_v61 = vpop.f32.mrf.mxu0  ;;  %v636_v62 = vpop.f32.mrf.mxu1  ;;  %v781_v1 = vmul.f32 0.2, %v621_v51 }
 0x109   :  { %v815_v63 = vsel %vm687_vm13, %v501_v48, %v751_v57  ;;  %v847_v0 = vsel %vm719_vm14, %v629_v49, %v783_v58  ;;  %v514_v2 = vadd.f32 %v1638_v38, %v1883_v36  ;;  %v642_v6 = vadd.f32 %v1670_v39, %v1883_v36 }
 0x10a   :  { %v1435_v3 = vpack.c.bf16 %v815_v63, %v814_v42  ;;  %v1515_v4 = vpack.c.bf16 %v847_v0, %v846_v52  ;;  %v813_v5 = vsel %vm685_vm15, %v493_v50, %v749_v60  ;;  %v1642_v7 = vpop.f32.mrf.mxu0  ;;  %v1674_v8 = vpop.f32.mrf.mxu1  ;;  %v845_v10 = vsel %vm717_vm0, %v621_v51, %v781_v1 }
 0x10b   :  { %v1430_v9 = vpack.c.bf16 %v813_v5, %v812_v53  ;;  %vm690_vm1 = vcmp.gt.f32.partialorder %v514_v2, 0.0  ;;  %v754_v11 = vmul.f32 0.2, %v514_v2  ;;  %v1510_v12 = vpack.c.bf16 %v845_v10, %v844_v59 }
 0x10c   :  { %1547 = vst [vmem:[%s2051_s3 + $0x58] sm:$0xff] %v1435_v3   ;;  %1563 = vst [vmem:[%s2051_s3 + $0xd8] sm:$0xff] %v1515_v4   ;;  %vm722_vm2 = vcmp.gt.f32.partialorder %v642_v6, 0.0  ;;  %v786_v13 = vmul.f32 0.2, %v642_v6  ;;  %v506_v14 = vadd.f32 %v1883_v36, %v505_v46  ;;  %v634_v15 = vadd.f32 %v1883_v36, %v633_v47  ;;  %v521_v21 = vpop.f32.mrf.mxu0  ;;  %v649_v22 = vpop.f32.mrf.mxu1 }
 0x10d   :  { %1546 = vst [vmem:[%s2051_s3 + $0x50] sm:$0xff] %v1430_v9   ;;  %v517_v16 = vadd.f32 %v1639_v55, %v1883_v36  ;;  %v645_v17 = vadd.f32 %v1671_v56, %v1883_v36  ;;  %1562 = vst [vmem:[%s2051_s3 + $0xd0] sm:$0xff] %v1510_v12   ;;  %v818_v18 = vsel %vm690_vm1, %v514_v2, %v754_v11 }
 0x10e   :  { %vm688_vm3 = vcmp.gt.f32.partialorder %v506_v14, 0.0  ;;  %v752_v19 = vmul.f32 0.2, %v506_v14  ;;  %v509_v20 = vadd.f32 %v1883_v36, %v508_v61  ;;  %v850_v23 = vsel %vm722_vm2, %v642_v6, %v786_v13  ;;  %v1643_v35 = vpop.f32.mrf.mxu0  ;;  %v1675_v37 = vpop.f32.mrf.mxu1 }
 0x10f   :  { %vm720_vm4 = vcmp.gt.f32.partialorder %v634_v15, 0.0  ;;  %vm691_vm5 = vcmp.gt.f32.partialorder %v517_v16, 0.0  ;;  %v755_v24 = vmul.f32 0.2, %v517_v16  ;;  %v784_v25 = vmul.f32 0.2, %v634_v15 }
 0x110   :  { %vm723_vm6 = vcmp.gt.f32.partialorder %v645_v17, 0.0  ;;  %v787_v26 = vmul.f32 0.2, %v645_v17  ;;  %vm689_vm7 = vcmp.gt.f32.partialorder %v509_v20, 0.0  ;;  %v816_v27 = vsel %vm688_vm3, %v506_v14, %v752_v19  ;;  %v524_v51 = vpop.f32.mrf.mxu0  ;;  %v652_v52 = vpop.f32.mrf.mxu1 }
 0x111   :  { %v819_v28 = vsel %vm691_vm5, %v517_v16, %v755_v24  ;;  %v753_v29 = vmul.f32 0.2, %v509_v20  ;;  %v637_v30 = vadd.f32 %v1883_v36, %v636_v62  ;;  %v530_v33 = vadd.f32 %v1642_v7, %v1883_v36 }
 0x112   :  { %v1445_v31 = vpack.c.bf16 %v819_v28, %v818_v18  ;;  %v851_v32 = vsel %vm723_vm6, %v645_v17, %v787_v26  ;;  %v658_v34 = vadd.f32 %v1674_v8, %v1883_v36  ;;  %v848_v41 = vsel %vm720_vm4, %v634_v15, %v784_v25 }
 0x113   :  { %v1525_v38 = vpack.c.bf16 %v851_v32, %v850_v23  ;;  %v817_v39 = vsel %vm689_vm7, %v509_v20, %v753_v29  ;;  %vm721_vm8 = vcmp.gt.f32.partialorder %v637_v30, 0.0  ;;  %v785_v40 = vmul.f32 0.2, %v637_v30 }
 0x114   :  { %1549 = vst [vmem:[%s2051_s3 + $0x68] sm:$0xff] %v1445_v31   ;;  %v1440_v42 = vpack.c.bf16 %v817_v39, %v816_v27  ;;  %vm694_vm9 = vcmp.gt.f32.partialorder %v530_v33, 0.0  ;;  %v758_v43 = vmul.f32 0.2, %v530_v33  ;;  %vm726_vm10 = vcmp.gt.f32.partialorder %v658_v34, 0.0 }
 0x115   :  { %1565 = vst [vmem:[%s2051_s3 + $0xe8] sm:$0xff] %v1525_v38   ;;  %v849_v44 = vsel %vm721_vm8, %v637_v30, %v785_v40  ;;  %v790_v45 = vmul.f32 0.2, %v658_v34  ;;  %v522_v46 = vadd.f32 %v1883_v36, %v521_v21  ;;  %v650_v48 = vadd.f32 %v1883_v36, %v649_v22 }
 0x116   :  { %1548 = vst [vmem:[%s2051_s3 + $0x60] sm:$0xff] %v1440_v42   ;;  %v1520_v47 = vpack.c.bf16 %v849_v44, %v848_v41  ;;  %v533_v49 = vadd.f32 %v1643_v35, %v1883_v36  ;;  %v661_v50 = vadd.f32 %v1675_v37, %v1883_v36  ;;  %v822_v53 = vsel %vm694_vm9, %v530_v33, %v758_v43 }
 0x117   :  { %v854_v54 = vsel %vm726_vm10, %v658_v34, %v790_v45  ;;  %v756_v56 = vmul.f32 0.2, %v522_v46  ;;  %v525_v58 = vadd.f32 %v1883_v36, %v524_v51  ;;  %v653_v59 = vadd.f32 %v1883_v36, %v652_v52 }
 0x118   :  { %1564 = vst [vmem:[%s2051_s3 + $0xe0] sm:$0xff] %v1520_v47   ;;  %vm695_vm11 = vcmp.gt.f32.partialorder %v533_v49, 0.0  ;;  %v759_v55 = vmul.f32 0.2, %v533_v49  ;;  %vm727_vm12 = vcmp.gt.f32.partialorder %v661_v50, 0.0  ;;  %vm692_vm13 = vcmp.gt.f32.partialorder %v522_v46, 0.0 }
 0x119   :  { %v791_v57 = vmul.f32 0.2, %v661_v50  ;;  %vm724_vm14 = vcmp.gt.f32.partialorder %v650_v48, 0.0  ;;  %v788_v60 = vmul.f32 0.2, %v650_v48  ;;  %vm693_vm15 = vcmp.gt.f32.partialorder %v525_v58, 0.0 }
 0x11a   :  { %v823_v61 = vsel %vm695_vm11, %v533_v49, %v759_v55  ;;  %v757_v0 = vmul.f32 0.2, %v525_v58  ;;  %vm725_vm0 = vcmp.gt.f32.partialorder %v653_v59, 0.0  ;;  %v789_v2 = vmul.f32 0.2, %v653_v59 }
 0x11b   :  { %v1455_v62 = vpack.c.bf16 %v823_v61, %v822_v53  ;;  %v855_v63 = vsel %vm727_vm12, %v661_v50, %v791_v57  ;;  %v820_v3 = vsel %vm692_vm13, %v522_v46, %v756_v56  ;;  %v852_v5 = vsel %vm724_vm14, %v650_v48, %v788_v60 }
 0x11c   :  { %v1535_v1 = vpack.c.bf16 %v855_v63, %v854_v54  ;;  %v821_v4 = vsel %vm693_vm15, %v525_v58, %v757_v0  ;;  %v853_v6 = vsel %vm725_vm0, %v653_v59, %v789_v2 }
 0x11d   :  { %1551 = vst [vmem:[%s2051_s3 + $0x78] sm:$0xff] %v1455_v62   ;;  %v1450_v36 = vpack.c.bf16 %v821_v4, %v820_v3  ;;  %v1530_v7 = vpack.c.bf16 %v853_v6, %v852_v5 }
 0x11e   :  { %1567 = vst [vmem:[%s2051_s3 + $0xf8] sm:$0xff] %v1535_v1  }
 0x11f   :  { %1550 = vst [vmem:[%s2051_s3 + $0x70] sm:$0xff] %v1450_v36   ;;  %1566 = vst [vmem:[%s2051_s3 + $0xf0] sm:$0xff] %v1530_v7  }

// kernel: discriminator_forward.4
= control target key start
LH: loop header
LB: loop body
LE: loop exit
PB: predicated region body
PF: predicated region fallthrough
CT: control target
= control target key end

     0   :  { %s3647_s1 = inlined_call_operand.vmem [shape: bf16[1024,128], index: 1, kind: input, shape index: {}]   ;;  %s3648_s0 = inlined_call_operand.vmem [shape: bf16[256,1024], index: 0, kind: input, shape index: {}]   ;;  %s3649_s2 = inlined_call_operand.vmem [shape: f32[1,128], index: 2, kind: input, shape index: {}]   ;;  %s3650_s3 = inlined_call_operand.vmem [shape: f32[256,128], index: 3, kind: output, shape index: {0}]   ;;  %s3651_s4 = inlined_call_operand.vmem [shape: f32[8,128], index: 4, kind: output, shape index: {1}]   ;;  %s3652_s5 = inlined_call_operand.vmem [shape: f32[8,128], index: 5, kind: output, shape index: {2}]  }
   0x1   :  { %v2742_v0 = vld [vmem:[%s3647_s1 + $0x78] sm:$0xff]   ;;  %v2746_v4 = vld [vmem:[%s3647_s1 + $0x70] sm:$0xff]   ;;  %v2750_v8 = vld [vmem:[%s3647_s1 + $0x68] sm:$0xff]  }
   0x2   :  { %v2743_v1 = vld [vmem:[%s3647_s1 + $0xf8] sm:$0xff]   ;;  %2294 = vmatprep.subr.bf16.mxu0 %v2742_v0  ;;  %v2747_v5 = vld [vmem:[%s3647_s1 + $0xf0] sm:$0xff]   ;;  %v2751_v9 = vld [vmem:[%s3647_s1 + $0xe8] sm:$0xff]  }
   0x3   :  { %v2744_v2 = vld [vmem:[%s3647_s1 + $0x38] sm:$0xff]   ;;  %2406 = vmatprep.subr.bf16.mxu1 %v2743_v1  ;;  %v2748_v6 = vld [vmem:[%s3647_s1 + $0x30] sm:$0xff]   ;;  %v2752_v10 = vld [vmem:[%s3647_s1 + $0x28] sm:$0xff]  }
   0x4   :  { %v2745_v3 = vld [vmem:[%s3647_s1 + $0xb8] sm:$0xff]   ;;  %2295 = vmatpush3.bf16.msra.mxu0 %v2744_v2  ;;  %v2749_v7 = vld [vmem:[%s3647_s1 + $0xb0] sm:$0xff]   ;;  %v2753_v11 = vld [vmem:[%s3647_s1 + $0xa8] sm:$0xff]  }
   0x5   :  { %2407 = vmatpush3.bf16.msra.mxu1 %v2745_v3  ;;  %2296 = vmatprep.subr.bf16.mxu0 %v2746_v4  ;;  %v2754_v12 = vld [vmem:[%s3647_s1 + $0x60] sm:$0xff]   ;;  %v2758_v16 = vld [vmem:[%s3647_s1 + $0x58] sm:$0xff]   ;;  %v2762_v20 = vld [vmem:[%s3647_s1 + $0x50] sm:$0xff]  }
   0x6   :  { %2408 = vmatprep.subr.bf16.mxu1 %v2747_v5  ;;  %v2755_v13 = vld [vmem:[%s3647_s1 + $0xe0] sm:$0xff]   ;;  %v2759_v17 = vld [vmem:[%s3647_s1 + $0xd8] sm:$0xff]   ;;  %v2763_v21 = vld [vmem:[%s3647_s1 + $0xd0] sm:$0xff]  }
   0x7   :  { %v2756_v14 = vld [vmem:[%s3647_s1 + $0x20] sm:$0xff]   ;;  %v2760_v18 = vld [vmem:[%s3647_s1 + $0x18] sm:$0xff]   ;;  %v2764_v22 = vld [vmem:[%s3647_s1 + $0x10] sm:$0xff]  }
   0x8   :  { %2297 = vmatpush3.bf16.msra.mxu0 %v2748_v6  ;;  %v2757_v15 = vld [vmem:[%s3647_s1 + $0xa0] sm:$0xff]   ;;  %v2761_v19 = vld [vmem:[%s3647_s1 + $0x98] sm:$0xff]   ;;  %v2765_v23 = vld [vmem:[%s3647_s1 + $0x90] sm:$0xff]  }
   0x9   :  { %2409 = vmatpush3.bf16.msra.mxu1 %v2749_v7  ;;  %2298 = vmatprep.subr.bf16.mxu0 %v2750_v8  ;;  %v2766_v24 = vld [vmem:[%s3647_s1 + $0x48] sm:$0xff]   ;;  %v2770_v28 = vld [vmem:[%s3647_s1 + $0x40] sm:$0xff]   ;;  %v2774_v40 = vld [vmem:[%s3647_s1 + $0x178] sm:$0xff]  }
   0xa   :  { %2410 = vmatprep.subr.bf16.mxu1 %v2751_v9  ;;  %v2767_v25 = vld [vmem:[%s3647_s1 + $0xc8] sm:$0xff]   ;;  %v2771_v29 = vld [vmem:[%s3647_s1 + $0xc0] sm:$0xff]   ;;  %v2775_v41 = vld [vmem:[%s3647_s1 + $0x138] sm:$0xff]  }
   0xb   :  { %v2768_v26 = vld [vmem:[%s3647_s1 + $0x8] sm:$0xff]   ;;  %v2772_v30 = vld [vmem:[%s3647_s1] sm:$0xff]   ;;  %v2776_v42 = vld [vmem:[%s3647_s1 + $0x1f8] sm:$0xff]  }
   0xc   :  { %2299 = vmatpush3.bf16.msra.mxu0 %v2752_v10  ;;  %v2769_v27 = vld [vmem:[%s3647_s1 + $0x88] sm:$0xff]   ;;  %v2773_v31 = vld [vmem:[%s3647_s1 + $0x80] sm:$0xff]   ;;  %v2777_v43 = vld [vmem:[%s3647_s1 + $0x1b8] sm:$0xff]  }
   0xd   :  { %2411 = vmatpush3.bf16.msra.mxu1 %v2753_v11  ;;  %2300 = vmatprep.subr.bf16.mxu0 %v2754_v12  ;;  %v18_v32 = vld [vmem:[%s3648_s0] sm:$0xff]  ;;  %v19_v34 = vld [vmem:[%s3648_s0 + $0x8] sm:$0xff]  ;;  %v2778_v55 = vld [vmem:[%s3647_s1 + $0x170] sm:$0xff]  }
   0xe   :  { %2412 = vmatprep.subr.bf16.mxu1 %v2755_v13  ;;  %v22_v33 = vld [vmem:[%s3648_s0 + $0x20] sm:$0xff]  ;;  %v23_v37 = vld [vmem:[%s3648_s0 + $0x28] sm:$0xff]  ;;  %v2779_v58 = vld [vmem:[%s3647_s1 + $0x130] sm:$0xff]  }
   0xf   :  { %v2102_v35 = vcombine.low %v18_v32, %v22_v33  ;;  %v2103_v36 = vcombine.high %v18_v32, %v22_v33  ;;  %v2104_v38 = vcombine.low %v19_v34, %v23_v37  ;;  %v2105_v39 = vcombine.high %v19_v34, %v23_v37  ;;  %v26_v44 = vld [vmem:[%s3648_s0 + $0x40] sm:$0xff]  ;;  %v27_v47 = vld [vmem:[%s3648_s0 + $0x48] sm:$0xff]  ;;  %v2780_v60 = vld [vmem:[%s3647_s1 + $0x1f0] sm:$0xff]  }
  0x10   :  { %2301 = vmatpush3.bf16.msra.mxu0 %v2756_v14  ;;  %v30_v45 = vld [vmem:[%s3648_s0 + $0x60] sm:$0xff]  ;;  %v31_v48 = vld [vmem:[%s3648_s0 + $0x68] sm:$0xff]  ;;  %v2781_v61 = vld [vmem:[%s3647_s1 + $0x1b0] sm:$0xff]  }
  0x11   :  { %2413 = vmatpush3.bf16.msra.mxu1 %v2757_v15  ;;  %2302 = vmatprep.subr.bf16.mxu0 %v2758_v16  ;;  %v2111_v46 = vcombine.high %v26_v44, %v30_v45  ;;  %v34_v49 = vld [vmem:[%s3648_s0 + $0x80] sm:$0xff]  ;;  %v2113_v50 = vcombine.high %v27_v47, %v31_v48  ;;  %v35_v52 = vld [vmem:[%s3648_s0 + $0x88] sm:$0xff]  ;;  %v2110_v54 = vcombine.low %v26_v44, %v30_v45  ;;  %v2794_v34 = vld [vmem:[%s3647_s1 + $0x150] sm:$0xff]  }
  0x12   :  { %2414 = vmatprep.subr.bf16.mxu1 %v2759_v17  ;;  %1337 = vmatprep.mubr.bf16.mxu0 %v2103_v36  ;;  %v38_v51 = vld [vmem:[%s3648_s0 + $0xa0] sm:$0xff]  ;;  %v39_v53 = vld [vmem:[%s3648_s0 + $0xa8] sm:$0xff]  ;;  %v2112_v56 = vcombine.low %v27_v47, %v31_v48  ;;  %v2795_v36 = vld [vmem:[%s3647_s1 + $0x110] sm:$0xff]  }
  0x13   :  { %1498 = vmatprep.mubr.bf16.mxu1 %v2105_v39  ;;  %v2119_v57 = vcombine.high %v34_v49, %v38_v51  ;;  %v2121_v59 = vcombine.high %v35_v52, %v39_v53  ;;  %v42_v62 = vld [vmem:[%s3648_s0 + $0xc0] sm:$0xff]  ;;  %v43_v0 = vld [vmem:[%s3648_s0 + $0xc8] sm:$0xff]  ;;  %v2118_v3 = vcombine.low %v34_v49, %v38_v51  ;;  %v2120_v5 = vcombine.low %v35_v52, %v39_v53  ;;  %v2796_v37 = vld [vmem:[%s3647_s1 + $0x1d0] sm:$0xff]  }
  0x14   :  { %2303 = vmatpush3.bf16.msra.mxu0 %v2760_v18  ;;  %v46_v63 = vld [vmem:[%s3648_s0 + $0xe0] sm:$0xff]  ;;  %v47_v1 = vld [vmem:[%s3648_s0 + $0xe8] sm:$0xff]  ;;  %v2797_v39 = vld [vmem:[%s3647_s1 + $0x190] sm:$0xff]  }
  0x15   :  { %2415 = vmatpush3.bf16.msra.mxu1 %v2761_v19  ;;  %2304 = vmatprep.subr.bf16.mxu0 %v2762_v20  ;;  %v2782_v2 = vld [vmem:[%s3647_s1 + $0x168] sm:$0xff]   ;;  %v2127_v6 = vcombine.high %v42_v62, %v46_v63  ;;  %v2129_v8 = vcombine.high %v43_v0, %v47_v1  ;;  %v50_v10 = vld [vmem:[%s3648_s0 + $0x100] sm:$0xff]  ;;  %v2126_v16 = vcombine.low %v42_v62, %v46_v63 }
  0x16   :  { %2416 = vmatprep.subr.bf16.mxu1 %v2763_v21  ;;  %v2783_v4 = vld [vmem:[%s3647_s1 + $0x128] sm:$0xff]   ;;  %v54_v11 = vld [vmem:[%s3648_s0 + $0x120] sm:$0xff]  ;;  %v2128_v18 = vcombine.low %v43_v0, %v47_v1 }
  0x17   :  { %v2784_v7 = vld [vmem:[%s3647_s1 + $0x1e8] sm:$0xff]   ;;  %v2786_v14 = vld [vmem:[%s3647_s1 + $0x160] sm:$0xff]   ;;  %v2135_v19 = vcombine.high %v50_v10, %v54_v11 }
  0x18   :  { %2305 = vmatpush3.bf16.msra.mxu0 %v2764_v22  ;;  %v2785_v9 = vld [vmem:[%s3647_s1 + $0x1a8] sm:$0xff]   ;;  %v2787_v15 = vld [vmem:[%s3647_s1 + $0x120] sm:$0xff]  }
  0x19   :  { %2417 = vmatpush3.bf16.msra.mxu1 %v2765_v23  ;;  %2306 = vmatprep.subr.bf16.mxu0 %v2766_v24  ;;  %v51_v12 = vld [vmem:[%s3648_s0 + $0x108] sm:$0xff]  ;;  %v2788_v17 = vld [vmem:[%s3647_s1 + $0x1e0] sm:$0xff]   ;;  %v2790_v24 = vld [vmem:[%s3647_s1 + $0x158] sm:$0xff]  }
  0x1a   :  { %2418 = vmatprep.subr.bf16.mxu1 %v2767_v25  ;;  %v55_v13 = vld [vmem:[%s3648_s0 + $0x128] sm:$0xff]  ;;  %v2789_v20 = vld [vmem:[%s3647_s1 + $0x1a0] sm:$0xff]  }
  0x1b   :  { %v2137_v21 = vcombine.high %v51_v12, %v55_v13  ;;  %v58_v22 = vld [vmem:[%s3648_s0 + $0x140] sm:$0xff]  ;;  %v59_v25 = vld [vmem:[%s3648_s0 + $0x148] sm:$0xff] }
  0x1c   :  { %2307 = vmatpush3.bf16.msra.mxu0 %v2768_v26  ;;  %v62_v23 = vld [vmem:[%s3648_s0 + $0x160] sm:$0xff]  ;;  %v63_v26 = vld [vmem:[%s3648_s0 + $0x168] sm:$0xff] }
  0x1d   :  { %2419 = vmatpush3.bf16.msra.mxu1 %v2769_v27  ;;  %2308 = vmatprep.subr.bf16.mxu0 %v2770_v28  ;;  %v2791_v27 = vld [vmem:[%s3647_s1 + $0x118] sm:$0xff]   ;;  %v2143_v32 = vcombine.high %v58_v22, %v62_v23  ;;  %v2145_v33 = vcombine.high %v59_v25, %v63_v26  ;;  %v2799_v47 = vld [vmem:[%s3647_s1 + $0x108] sm:$0xff]   ;;  %v78_v51 = vld [vmem:[%s3648_s0 + $0x1e0] sm:$0xff] }
  0x1e   :  { %2420 = vmatprep.subr.bf16.mxu1 %v2771_v29  ;;  %v2792_v28 = vld [vmem:[%s3647_s1 + $0x1d8] sm:$0xff]   ;;  %v2800_v48 = vld [vmem:[%s3647_s1 + $0x1c8] sm:$0xff]   ;;  %v82_v62 = vld [vmem:[%s3648_s0 + $0x200] sm:$0xff] }
  0x1f   :  { %v2793_v29 = vld [vmem:[%s3647_s1 + $0x198] sm:$0xff]   ;;  %v2801_v49 = vld [vmem:[%s3647_s1 + $0x188] sm:$0xff]   ;;  %v86_v63 = vld [vmem:[%s3648_s0 + $0x220] sm:$0xff] }
  0x20   :  { %2309 = vmatpush3.bf16.msra.mxu0 %v2772_v30  ;;  %v2134_v30 = vcombine.low %v50_v10, %v54_v11  ;;  %v75_v52 = vld [vmem:[%s3648_s0 + $0x1c8] sm:$0xff]  ;;  %v2166_v10 = vcombine.low %v82_v62, %v86_v63 }
  0x21   :  { %2421 = vmatpush3.bf16.msra.mxu1 %v2773_v31  ;;  %2518 = vmatprep.subr.bf16.mxu0 %v2774_v40  ;;  %v2136_v31 = vcombine.low %v51_v12, %v55_v13  ;;  %v67_v40 = vld [vmem:[%s3648_s0 + $0x188] sm:$0xff] }
  0x22   :  { %2630 = vmatprep.subr.bf16.mxu1 %v2776_v42  ;;  %v2142_v42 = vcombine.low %v58_v22, %v62_v23  ;;  %v79_v53 = vld [vmem:[%s3648_s0 + $0x1e8] sm:$0xff]  ;;  %v106_v22 = vld [vmem:[%s3648_s0 + $0x2c0] sm:$0xff] }
  0x23   :  { %1338 = vmatmul.mubr.bf16.vlgmr.msra.gmra.mxu0 %v2102_v35  ;;  %v66_v35 = vld [vmem:[%s3648_s0 + $0x180] sm:$0xff]  ;;  %v83_v0 = vld [vmem:[%s3648_s0 + $0x208] sm:$0xff] }
  0x24   :  { %1499 = vmatmul.mubr.bf16.vlgmr.msra.gmra.mxu1 %v2104_v38  ;;  %2519 = vmatpush3.bf16.msra.mxu0 %v2775_v41  ;;  %v70_v38 = vld [vmem:[%s3648_s0 + $0x1a0] sm:$0xff]  ;;  %v71_v41 = vld [vmem:[%s3648_s0 + $0x1a8] sm:$0xff] }
  0x25   :  { %2631 = vmatpush3.bf16.msra.mxu1 %v2777_v43  ;;  %1345 = vmatprep.mubr.bf16.mxu0 %v2111_v46  ;;  %v2144_v43 = vcombine.low %v59_v25, %v63_v26  ;;  %v2151_v44 = vcombine.high %v66_v35, %v70_v38  ;;  %v2153_v45 = vcombine.high %v67_v40, %v71_v41  ;;  %v2798_v46 = vld [vmem:[%s3647_s1 + $0x148] sm:$0xff]   ;;  %v110_v23 = vld [vmem:[%s3648_s0 + $0x2e0] sm:$0xff] }
  0x26   :  { %1506 = vmatprep.mubr.bf16.mxu1 %v2113_v50  ;;  %2520 = vmatprep.subr.bf16.mxu0 %v2778_v55  ;;  %v74_v50 = vld [vmem:[%s3648_s0 + $0x1c0] sm:$0xff]  ;;  %v87_v1 = vld [vmem:[%s3648_s0 + $0x228] sm:$0xff] }
  0x27   :  { %2632 = vmatprep.subr.bf16.mxu1 %v2780_v60  ;;  %v2802_v55 = vld [vmem:[%s3647_s1 + $0x140] sm:$0xff]   ;;  %v2168_v11 = vcombine.low %v83_v0, %v87_v1  ;;  %v111_v25 = vld [vmem:[%s3648_s0 + $0x2e8] sm:$0xff] }
  0x28   :  { %2521 = vmatpush3.bf16.msra.mxu0 %v2779_v58  ;;  %v2803_v58 = vld [vmem:[%s3647_s1 + $0x100] sm:$0xff]  }
  0x29   :  { %2633 = vmatpush3.bf16.msra.mxu1 %v2781_v61  ;;  %2522 = vmatprep.subr.bf16.mxu0 %v2782_v2  ;;  %v2804_v60 = vld [vmem:[%s3647_s1 + $0x1c0] sm:$0xff]   ;;  %v2158_v2 = vcombine.low %v74_v50, %v78_v51 }
  0x2a   :  { %2634 = vmatprep.subr.bf16.mxu1 %v2784_v7  ;;  %v2805_v61 = vld [vmem:[%s3647_s1 + $0x180] sm:$0xff]  }
  0x2b   :  { %1346 = vmatmul.mubr.bf16.gmra.mxu0 %v2110_v54  ;;  %v2150_v54 = vcombine.low %v66_v35, %v70_v38  ;;  %v94_v7 = vld [vmem:[%s3648_s0 + $0x260] sm:$0xff] }
  0x2c   :  { %1507 = vmatmul.mubr.bf16.gmra.mxu1 %v2112_v56  ;;  %1353 = vmatprep.mubr.bf16.mxu0 %v2119_v57  ;;  %v2152_v56 = vcombine.low %v67_v40, %v71_v41  ;;  %v2159_v57 = vcombine.high %v74_v50, %v78_v51  ;;  %v122_v38 = vld [vmem:[%s3648_s0 + $0x340] sm:$0xff]  ;;  %v123_v40 = vld [vmem:[%s3648_s0 + $0x348] sm:$0xff] }
  0x2d   :  { %1514 = vmatprep.mubr.bf16.mxu1 %v2121_v59  ;;  %2523 = vmatpush3.bf16.msra.mxu0 %v2783_v4  ;;  %v2161_v59 = vcombine.high %v75_v52, %v79_v53  ;;  %v2167_v4 = vcombine.high %v82_v62, %v86_v63  ;;  %v127_v41 = vld [vmem:[%s3648_s0 + $0x368] sm:$0xff]  ;;  %v20_v62 = vld [vmem:[%s3648_s0 + $0x10] sm:$0xff] }
  0x2e   :  { %2635 = vmatpush3.bf16.msra.mxu1 %v2785_v9  ;;  %2524 = vmatprep.subr.bf16.mxu0 %v2786_v14  ;;  %v95_v9 = vld [vmem:[%s3648_s0 + $0x268] sm:$0xff]  ;;  %v98_v14 = vld [vmem:[%s3648_s0 + $0x280] sm:$0xff]  ;;  %v2208_v51 = vcombine.low %v123_v40, %v127_v41  ;;  %v24_v63 = vld [vmem:[%s3648_s0 + $0x30] sm:$0xff] }
  0x2f   :  { %2636 = vmatprep.subr.bf16.mxu1 %v2788_v17  ;;  %v103_v17 = vld [vmem:[%s3648_s0 + $0x2a8] sm:$0xff] }
  0x31   :  { %2525 = vmatpush3.bf16.msra.mxu0 %v2787_v15  ;;  %v102_v15 = vld [vmem:[%s3648_s0 + $0x2a0] sm:$0xff] }
  0x32   :  { %2637 = vmatpush3.bf16.msra.mxu1 %v2789_v20  ;;  %2526 = vmatprep.subr.bf16.mxu0 %v2790_v24  ;;  %v2183_v20 = vcombine.high %v98_v14, %v102_v15  ;;  %v107_v24 = vld [vmem:[%s3648_s0 + $0x2c8] sm:$0xff]  ;;  %v2182_v26 = vcombine.low %v98_v14, %v102_v15  ;;  %v36_v14 = vld [vmem:[%s3648_s0 + $0x90] sm:$0xff] }
  0x33   :  { %1354 = vmatmul.mubr.bf16.gmra.mxu0 %v2118_v3  ;;  %2638 = vmatprep.subr.bf16.mxu1 %v2792_v28  ;;  %v2160_v3 = vcombine.low %v75_v52, %v79_v53  ;;  %v2191_v28 = vcombine.high %v106_v22, %v110_v23  ;;  %v2192_v35 = vcombine.low %v107_v24, %v111_v25  ;;  %v40_v15 = vld [vmem:[%s3648_s0 + $0xb0] sm:$0xff] }
  0x34   :  { %1515 = vmatmul.mubr.bf16.gmra.mxu1 %v2120_v5  ;;  %1361 = vmatprep.mubr.bf16.mxu0 %v2127_v6  ;;  %v2169_v5 = vcombine.high %v83_v0, %v87_v1  ;;  %v90_v6 = vld [vmem:[%s3648_s0 + $0x240] sm:$0xff]  ;;  %v21_v0 = vld [vmem:[%s3648_s0 + $0x18] sm:$0xff] }
  0x35   :  { %1522 = vmatprep.mubr.bf16.mxu1 %v2129_v8  ;;  %2527 = vmatpush3.bf16.msra.mxu0 %v2791_v27  ;;  %v91_v8 = vld [vmem:[%s3648_s0 + $0x248] sm:$0xff]  ;;  %v2175_v12 = vcombine.high %v90_v6, %v94_v7  ;;  %v25_v1 = vld [vmem:[%s3648_s0 + $0x38] sm:$0xff] }
  0x36   :  { %2639 = vmatpush3.bf16.msra.mxu1 %v2793_v29  ;;  %2528 = vmatprep.subr.bf16.mxu0 %v2794_v34  ;;  %v2177_v13 = vcombine.high %v91_v8, %v95_v9  ;;  %v2193_v29 = vcombine.high %v107_v24, %v111_v25  ;;  %v2190_v34 = vcombine.low %v106_v22, %v110_v23  ;;  %v44_v22 = vld [vmem:[%s3648_s0 + $0xd0] sm:$0xff]  ;;  %v45_v24 = vld [vmem:[%s3648_s0 + $0xd8] sm:$0xff] }
  0x37   :  { %2640 = vmatprep.subr.bf16.mxu1 %v2796_v37  ;;  %v48_v23 = vld [vmem:[%s3648_s0 + $0xf0] sm:$0xff]  ;;  %v49_v25 = vld [vmem:[%s3648_s0 + $0xf8] sm:$0xff] }
  0x39   :  { %2529 = vmatpush3.bf16.msra.mxu0 %v2795_v36 }
  0x3a   :  { %2641 = vmatpush3.bf16.msra.mxu1 %v2797_v39  ;;  %2530 = vmatprep.subr.bf16.mxu0 %v2798_v46  ;;  %v126_v39 = vld [vmem:[%s3648_s0 + $0x360] sm:$0xff] }
  0x3b   :  { %1362 = vmatmul.mubr.bf16.gmra.mxu0 %v2126_v16  ;;  %2642 = vmatprep.subr.bf16.mxu1 %v2800_v48  ;;  %v99_v16 = vld [vmem:[%s3648_s0 + $0x288] sm:$0xff]  ;;  %v130_v46 = vld [vmem:[%s3648_s0 + $0x380] sm:$0xff]  ;;  %v2206_v50 = vcombine.low %v122_v38, %v126_v39 }
  0x3c   :  { %1523 = vmatmul.mubr.bf16.gmra.mxu1 %v2128_v18  ;;  %1369 = vmatprep.mubr.bf16.mxu0 %v2135_v19  ;;  %v2174_v18 = vcombine.low %v90_v6, %v94_v7  ;;  %v2176_v19 = vcombine.low %v91_v8, %v95_v9  ;;  %v2184_v27 = vcombine.low %v99_v16, %v103_v17  ;;  %v131_v48 = vld [vmem:[%s3648_s0 + $0x388] sm:$0xff]  ;;  %v28_v6 = vld [vmem:[%s3648_s0 + $0x50] sm:$0xff]  ;;  %v29_v8 = vld [vmem:[%s3648_s0 + $0x58] sm:$0xff] }
  0x3d   :  { %1530 = vmatprep.mubr.bf16.mxu1 %v2137_v21  ;;  %2531 = vmatpush3.bf16.msra.mxu0 %v2799_v47  ;;  %v2185_v21 = vcombine.high %v99_v16, %v103_v17  ;;  %v134_v47 = vld [vmem:[%s3648_s0 + $0x3a0] sm:$0xff]  ;;  %v32_v7 = vld [vmem:[%s3648_s0 + $0x70] sm:$0xff]  ;;  %v33_v9 = vld [vmem:[%s3648_s0 + $0x78] sm:$0xff] }
  0x3e   :  { %2643 = vmatpush3.bf16.msra.mxu1 %v2801_v49  ;;  %2532 = vmatprep.subr.bf16.mxu0 %v2802_v55  ;;  %v135_v49 = vld [vmem:[%s3648_s0 + $0x3a8] sm:$0xff]  ;;  %v2215_v52 = vcombine.high %v130_v46, %v134_v47  ;;  %v142_v55 = vld [vmem:[%s3648_s0 + $0x3e0] sm:$0xff]  ;;  %v37_v16 = vld [vmem:[%s3648_s0 + $0x98] sm:$0xff] }
  0x3f   :  { %2644 = vmatprep.subr.bf16.mxu1 %v2804_v60  ;;  %v2217_v53 = vcombine.high %v131_v48, %v135_v49  ;;  %v41_v17 = vld [vmem:[%s3648_s0 + $0xb8] sm:$0xff] }
  0x41   :  { %2533 = vmatpush3.bf16.msra.mxu0 %v2803_v58  ;;  %v2214_v58 = vcombine.low %v130_v46, %v134_v47  ;;  %v68_v46 = vld [vmem:[%s3648_s0 + $0x190] sm:$0xff] }
  0x42   :  { %2645 = vmatpush3.bf16.msra.mxu1 %v2805_v61  ;;  %v72_v47 = vld [vmem:[%s3648_s0 + $0x1b0] sm:$0xff] }
  0x43   :  { %1370 = vmatmul.mubr.bf16.gmra.mxu0 %v2134_v30  ;;  %v114_v30 = vld [vmem:[%s3648_s0 + $0x300] sm:$0xff] }
  0x44   :  { %1531 = vmatmul.mubr.bf16.gmra.mxu1 %v2136_v31  ;;  %1377 = vmatprep.mubr.bf16.mxu0 %v2143_v32  ;;  %v118_v31 = vld [vmem:[%s3648_s0 + $0x320] sm:$0xff]  ;;  %v115_v32 = vld [vmem:[%s3648_s0 + $0x308] sm:$0xff] }
  0x45   :  { %1538 = vmatprep.mubr.bf16.mxu1 %v2145_v33  ;;  %v119_v33 = vld [vmem:[%s3648_s0 + $0x328] sm:$0xff]  ;;  %v2199_v36 = vcombine.high %v114_v30, %v118_v31 }
  0x46   :  { %v2201_v37 = vcombine.high %v115_v32, %v119_v33 }
  0x4b   :  { %1378 = vmatmul.mubr.bf16.gmra.mxu0 %v2142_v42  ;;  %v2198_v42 = vcombine.low %v114_v30, %v118_v31  ;;  %v52_v30 = vld [vmem:[%s3648_s0 + $0x110] sm:$0xff] }
  0x4c   :  { %1539 = vmatmul.mubr.bf16.gmra.mxu1 %v2144_v43  ;;  %1385 = vmatprep.mubr.bf16.mxu0 %v2151_v44  ;;  %v2200_v43 = vcombine.low %v115_v32, %v119_v33  ;;  %v2207_v44 = vcombine.high %v122_v38, %v126_v39  ;;  %v56_v31 = vld [vmem:[%s3648_s0 + $0x130] sm:$0xff]  ;;  %v53_v32 = vld [vmem:[%s3648_s0 + $0x118] sm:$0xff] }
  0x4d   :  { %1546 = vmatprep.mubr.bf16.mxu1 %v2153_v45  ;;  %v2209_v45 = vcombine.high %v123_v40, %v127_v41  ;;  %v57_v33 = vld [vmem:[%s3648_s0 + $0x138] sm:$0xff]  ;;  %v60_v38 = vld [vmem:[%s3648_s0 + $0x150] sm:$0xff] }
  0x4e   :  { %v64_v39 = vld [vmem:[%s3648_s0 + $0x170] sm:$0xff]  ;;  %v61_v40 = vld [vmem:[%s3648_s0 + $0x158] sm:$0xff] }
  0x4f   :  { %v65_v41 = vld [vmem:[%s3648_s0 + $0x178] sm:$0xff] }
  0x53   :  { %1386 = vmatmul.mubr.bf16.gmra.mxu0 %v2150_v54  ;;  %v138_v54 = vld [vmem:[%s3648_s0 + $0x3c0] sm:$0xff] }
  0x54   :  { %1547 = vmatmul.mubr.bf16.gmra.mxu1 %v2152_v56  ;;  %1393 = vmatprep.mubr.bf16.mxu0 %v2159_v57  ;;  %v139_v56 = vld [vmem:[%s3648_s0 + $0x3c8] sm:$0xff]  ;;  %v2223_v60 = vcombine.high %v138_v54, %v142_v55 }
  0x55   :  { %1554 = vmatprep.mubr.bf16.mxu1 %v2161_v59  ;;  %v143_v57 = vld [vmem:[%s3648_s0 + $0x3e8] sm:$0xff]  ;;  %v2216_v59 = vcombine.low %v131_v48, %v135_v49  ;;  %v69_v48 = vld [vmem:[%s3648_s0 + $0x198] sm:$0xff] }
  0x56   :  { %v2225_v61 = vcombine.high %v139_v56, %v143_v57  ;;  %v73_v49 = vld [vmem:[%s3648_s0 + $0x1b8] sm:$0xff] }
  0x5b   :  { %1394 = vmatmul.mubr.bf16.gmra.mxu0 %v2158_v2  ;;  %v2222_v2 = vcombine.low %v138_v54, %v142_v55  ;;  %v76_v54 = vld [vmem:[%s3648_s0 + $0x1d0] sm:$0xff] }
  0x5c   :  { %1555 = vmatmul.mubr.bf16.gmra.mxu1 %v2160_v3  ;;  %1401 = vmatprep.mubr.bf16.mxu0 %v2167_v4  ;;  %v2224_v3 = vcombine.low %v139_v56, %v143_v57  ;;  %v2107_v4 = vcombine.high %v20_v62, %v24_v63  ;;  %v80_v55 = vld [vmem:[%s3648_s0 + $0x1f0] sm:$0xff]  ;;  %v77_v56 = vld [vmem:[%s3648_s0 + $0x1d8] sm:$0xff] }
  0x5d   :  { %1562 = vmatprep.mubr.bf16.mxu1 %v2169_v5  ;;  %v2109_v5 = vcombine.high %v21_v0, %v25_v1  ;;  %v81_v57 = vld [vmem:[%s3648_s0 + $0x1f8] sm:$0xff] }
  0x63   :  { %1402 = vmatmul.mubr.bf16.gmra.mxu0 %v2166_v10  ;;  %v2106_v10 = vcombine.low %v20_v62, %v24_v63  ;;  %v84_v62 = vld [vmem:[%s3648_s0 + $0x210] sm:$0xff] }
  0x64   :  { %1563 = vmatmul.mubr.bf16.gmra.mxu1 %v2168_v11  ;;  %1409 = vmatprep.mubr.bf16.mxu0 %v2175_v12  ;;  %v2108_v11 = vcombine.low %v21_v0, %v25_v1  ;;  %v2115_v12 = vcombine.high %v28_v6, %v32_v7  ;;  %v88_v63 = vld [vmem:[%s3648_s0 + $0x230] sm:$0xff]  ;;  %v85_v0 = vld [vmem:[%s3648_s0 + $0x218] sm:$0xff] }
  0x65   :  { %1570 = vmatprep.mubr.bf16.mxu1 %v2177_v13  ;;  %v2117_v13 = vcombine.high %v29_v8, %v33_v9  ;;  %v89_v1 = vld [vmem:[%s3648_s0 + $0x238] sm:$0xff] }
  0x6b   :  { %1410 = vmatmul.mubr.bf16.gmra.mxu0 %v2174_v18  ;;  %v2114_v18 = vcombine.low %v28_v6, %v32_v7  ;;  %v92_v6 = vld [vmem:[%s3648_s0 + $0x250] sm:$0xff] }
  0x6c   :  { %1571 = vmatmul.mubr.bf16.gmra.mxu1 %v2176_v19  ;;  %1417 = vmatprep.mubr.bf16.mxu0 %v2183_v20  ;;  %v2116_v19 = vcombine.low %v29_v8, %v33_v9  ;;  %v2123_v20 = vcombine.high %v36_v14, %v40_v15  ;;  %v96_v7 = vld [vmem:[%s3648_s0 + $0x270] sm:$0xff]  ;;  %v93_v8 = vld [vmem:[%s3648_s0 + $0x258] sm:$0xff] }
  0x6d   :  { %1578 = vmatprep.mubr.bf16.mxu1 %v2185_v21  ;;  %v2125_v21 = vcombine.high %v37_v16, %v41_v17  ;;  %v97_v9 = vld [vmem:[%s3648_s0 + $0x278] sm:$0xff] }
  0x73   :  { %1418 = vmatmul.mubr.bf16.gmra.mxu0 %v2182_v26  ;;  %v2122_v26 = vcombine.low %v36_v14, %v40_v15 }
  0x74   :  { %1579 = vmatmul.mubr.bf16.gmra.mxu1 %v2184_v27  ;;  %1425 = vmatprep.mubr.bf16.mxu0 %v2191_v28  ;;  %v2124_v27 = vcombine.low %v37_v16, %v41_v17  ;;  %v2131_v28 = vcombine.high %v44_v22, %v48_v23  ;;  %v3343_v16 = vld [vmem:[%s3649_s2] ss:$0 sm:$0xff] }
  0x75   :  { %1586 = vmatprep.mubr.bf16.mxu1 %v2193_v29  ;;  %v2133_v29 = vcombine.high %v45_v24, %v49_v25 }
  0x7b   :  { %1426 = vmatmul.mubr.bf16.gmra.mxu0 %v2190_v34  ;;  %v2130_v34 = vcombine.low %v44_v22, %v48_v23  ;;  %v101_v22 = vld [vmem:[%s3648_s0 + $0x298] sm:$0xff] }
  0x7c   :  { %1587 = vmatmul.mubr.bf16.gmra.mxu1 %v2192_v35  ;;  %1433 = vmatprep.mubr.bf16.mxu0 %v2199_v36  ;;  %v2132_v35 = vcombine.low %v45_v24, %v49_v25  ;;  %v2139_v36 = vcombine.high %v52_v30, %v56_v31  ;;  %v105_v23 = vld [vmem:[%s3648_s0 + $0x2b8] sm:$0xff] }
  0x7d   :  { %1594 = vmatprep.mubr.bf16.mxu1 %v2201_v37  ;;  %v2141_v37 = vcombine.high %v53_v32, %v57_v33 }
  0x83   :  { %1434 = vmatmul.mubr.bf16.gmra.mxu0 %v2198_v42  ;;  %v2138_v42 = vcombine.low %v52_v30, %v56_v31 }
  0x84   :  { %1595 = vmatmul.mubr.bf16.gmra.mxu1 %v2200_v43  ;;  %1441 = vmatprep.mubr.bf16.mxu0 %v2207_v44  ;;  %v2140_v43 = vcombine.low %v53_v32, %v57_v33  ;;  %v2147_v44 = vcombine.high %v60_v38, %v64_v39  ;;  %v2189_v32 = vcombine.high %v101_v22, %v105_v23 }
  0x85   :  { %1602 = vmatprep.mubr.bf16.mxu1 %v2209_v45  ;;  %v2149_v45 = vcombine.high %v61_v40, %v65_v41 }
  0x8b   :  { %1442 = vmatmul.mubr.bf16.gmra.mxu0 %v2206_v50  ;;  %v2146_v50 = vcombine.low %v60_v38, %v64_v39 }
  0x8c   :  { %1603 = vmatmul.mubr.bf16.gmra.mxu1 %v2208_v51  ;;  %1449 = vmatprep.mubr.bf16.mxu0 %v2215_v52  ;;  %v2148_v51 = vcombine.low %v61_v40, %v65_v41  ;;  %v2155_v52 = vcombine.high %v68_v46, %v72_v47  ;;  %v108_v41 = vld [vmem:[%s3648_s0 + $0x2d0] sm:$0xff] }
  0x8d   :  { %1610 = vmatprep.mubr.bf16.mxu1 %v2217_v53  ;;  %v2157_v53 = vcombine.high %v69_v48, %v73_v49 }
  0x93   :  { %1450 = vmatmul.mubr.bf16.gmra.mxu0 %v2214_v58  ;;  %v2154_v58 = vcombine.low %v68_v46, %v72_v47  ;;  %v109_v46 = vld [vmem:[%s3648_s0 + $0x2d8] sm:$0xff] }
  0x94   :  { %1611 = vmatmul.mubr.bf16.gmra.mxu1 %v2216_v59  ;;  %1457 = vmatprep.mubr.bf16.mxu0 %v2223_v60  ;;  %v2156_v59 = vcombine.low %v69_v48, %v73_v49  ;;  %v2163_v60 = vcombine.high %v76_v54, %v80_v55  ;;  %v113_v47 = vld [vmem:[%s3648_s0 + $0x2f8] sm:$0xff] }
  0x95   :  { %1618 = vmatprep.mubr.bf16.mxu1 %v2225_v61  ;;  %v2165_v61 = vcombine.high %v77_v56, %v81_v57 }
  0x9b   :  { %1458 = vmatmul.mubr.bf16.gmra.mxu0 %v2222_v2  ;;  %v2162_v2 = vcombine.low %v76_v54, %v80_v55 }
  0x9c   :  { %1619 = vmatmul.mubr.bf16.gmra.mxu1 %v2224_v3  ;;  %1659 = vmatprep.mubr.bf16.mxu0 %v2107_v4  ;;  %v2164_v3 = vcombine.low %v77_v56, %v81_v57  ;;  %v2171_v4 = vcombine.high %v84_v62, %v88_v63  ;;  %v2197_v56 = vcombine.high %v109_v46, %v113_v47 }
  0x9d   :  { %1820 = vmatprep.mubr.bf16.mxu1 %v2109_v5  ;;  %v2173_v5 = vcombine.high %v85_v0, %v89_v1 }
  0xa3   :  { %1660 = vmatmul.mubr.bf16.vlgmr.msra.gmra.mxu0 %v2106_v10  ;;  %v2170_v10 = vcombine.low %v84_v62, %v88_v63 }
  0xa4   :  { %1821 = vmatmul.mubr.bf16.vlgmr.msra.gmra.mxu1 %v2108_v11  ;;  %1667 = vmatprep.mubr.bf16.mxu0 %v2115_v12  ;;  %v2172_v11 = vcombine.low %v85_v0, %v89_v1  ;;  %v2179_v12 = vcombine.high %v92_v6, %v96_v7  ;;  %v116_v1 = vld [vmem:[%s3648_s0 + $0x310] sm:$0xff] }
  0xa5   :  { %1828 = vmatprep.mubr.bf16.mxu1 %v2117_v13  ;;  %v2181_v13 = vcombine.high %v93_v8, %v97_v9 }
  0xab   :  { %1668 = vmatmul.mubr.bf16.gmra.mxu0 %v2114_v18  ;;  %v100_v18 = vld [vmem:[%s3648_s0 + $0x290] sm:$0xff] }
  0xac   :  { %1829 = vmatmul.mubr.bf16.gmra.mxu1 %v2116_v19  ;;  %1675 = vmatprep.mubr.bf16.mxu0 %v2123_v20  ;;  %v104_v19 = vld [vmem:[%s3648_s0 + $0x2b0] sm:$0xff] }
  0xad   :  { %1836 = vmatprep.mubr.bf16.mxu1 %v2125_v21  ;;  %v2187_v30 = vcombine.high %v100_v18, %v104_v19 }
  0xb3   :  { %1676 = vmatmul.mubr.bf16.gmra.mxu0 %v2122_v26  ;;  %v2178_v26 = vcombine.low %v92_v6, %v96_v7  ;;  %v117_v6 = vld [vmem:[%s3648_s0 + $0x318] sm:$0xff] }
  0xb4   :  { %1837 = vmatmul.mubr.bf16.gmra.mxu1 %v2124_v27  ;;  %1683 = vmatprep.mubr.bf16.mxu0 %v2131_v28  ;;  %v121_v7 = vld [vmem:[%s3648_s0 + $0x338] sm:$0xff] }
  0xb5   :  { %1844 = vmatprep.mubr.bf16.mxu1 %v2133_v29  ;;  %v2180_v29 = vcombine.low %v93_v8, %v97_v9 }
  0xbb   :  { %1684 = vmatmul.mubr.bf16.gmra.mxu0 %v2130_v34 }
  0xbc   :  { %1845 = vmatmul.mubr.bf16.gmra.mxu1 %v2132_v35  ;;  %1691 = vmatprep.mubr.bf16.mxu0 %v2139_v36 }
  0xbd   :  { %1852 = vmatprep.mubr.bf16.mxu1 %v2141_v37 }
  0xc3   :  { %1692 = vmatmul.mubr.bf16.gmra.mxu0 %v2138_v42  ;;  %v112_v42 = vld [vmem:[%s3648_s0 + $0x2f0] sm:$0xff] }
  0xc4   :  { %1853 = vmatmul.mubr.bf16.gmra.mxu1 %v2140_v43  ;;  %1699 = vmatprep.mubr.bf16.mxu0 %v2147_v44  ;;  %v2195_v54 = vcombine.high %v108_v41, %v112_v42 }
  0xc5   :  { %1860 = vmatprep.mubr.bf16.mxu1 %v2149_v45 }
  0xcb   :  { %1700 = vmatmul.mubr.bf16.gmra.mxu0 %v2146_v50  ;;  %v2186_v50 = vcombine.low %v100_v18, %v104_v19 }
  0xcc   :  { %1861 = vmatmul.mubr.bf16.gmra.mxu1 %v2148_v51  ;;  %1707 = vmatprep.mubr.bf16.mxu0 %v2155_v52 }
  0xcd   :  { %1868 = vmatprep.mubr.bf16.mxu1 %v2157_v53  ;;  %v2188_v53 = vcombine.low %v101_v22, %v105_v23 }
  0xd3   :  { %1708 = vmatmul.mubr.bf16.gmra.mxu0 %v2154_v58 }
  0xd4   :  { %1869 = vmatmul.mubr.bf16.gmra.mxu1 %v2156_v59  ;;  %1715 = vmatprep.mubr.bf16.mxu0 %v2163_v60 }
  0xd5   :  { %1876 = vmatprep.mubr.bf16.mxu1 %v2165_v61 }
  0xdb   :  { %1716 = vmatmul.mubr.bf16.gmra.mxu0 %v2162_v2  ;;  %v120_v2 = vld [vmem:[%s3648_s0 + $0x330] sm:$0xff] }
  0xdc   :  { %1877 = vmatmul.mubr.bf16.gmra.mxu1 %v2164_v3  ;;  %1723 = vmatprep.mubr.bf16.mxu0 %v2171_v4 }
  0xdd   :  { %1884 = vmatprep.mubr.bf16.mxu1 %v2173_v5 }
  0xe3   :  { %v2310_v14 = vpop.f32.mrf.mxu0  ;;  %1724 = vmatmul.mubr.bf16.gmra.mxu0 %v2170_v10  ;;  %v2194_v10 = vcombine.low %v108_v41, %v112_v42 }
  0xe4   :  { %v2422_v15 = vpop.f32.mrf.mxu1  ;;  %1885 = vmatmul.mubr.bf16.gmra.mxu1 %v2172_v11  ;;  %1731 = vmatprep.mubr.bf16.mxu0 %v2179_v12 }
  0xe5   :  { %v2311_v17 = vpop.f32.mrf.mxu0  ;;  %1892 = vmatprep.mubr.bf16.mxu1 %v2181_v13  ;;  %v2196_v13 = vcombine.low %v109_v46, %v113_v47 }
  0xe6   :  { %v2312_v20 = vadd.f32 %v2311_v17, %v2310_v14  ;;  %v2423_v21 = vpop.f32.mrf.mxu1  ;;  %v2203_v14 = vcombine.high %v116_v1, %v120_v2  ;;  %v2205_v17 = vcombine.high %v117_v6, %v121_v7 }
  0xe7   :  { %v2424_v24 = vadd.f32 %v2423_v21, %v2422_v15  ;;  %v2313_v25 = vpop.f32.mrf.mxu0 }
  0xe8   :  { %v1340_v27 = vadd.f32 %v2312_v20, %v3343_v16  ;;  %v2425_v28 = vpop.f32.mrf.mxu1 }
  0xe9   :  { %v2314_v31 = vpop.f32.mrf.mxu0 }
  0xea   :  { %v3358_v33 = vadd.f32 %v2424_v24, %v1340_v27  ;;  %v2315_v34 = vadd.f32 %v2314_v31, %v2313_v25  ;;  %v2426_v35 = vpop.f32.mrf.mxu1  ;;  %v128_v27 = vld [vmem:[%s3648_s0 + $0x370] sm:$0xff]  ;;  %v125_v31 = vld [vmem:[%s3648_s0 + $0x358] sm:$0xff] }
  0xeb   :  { %v2427_v36 = vadd.f32 %v2426_v35, %v2425_v28  ;;  %v2316_v37 = vpop.f32.mrf.mxu0  ;;  %1732 = vmatmul.mubr.bf16.gmra.mxu0 %v2178_v26  ;;  %v124_v26 = vld [vmem:[%s3648_s0 + $0x350] sm:$0xff] }
  0xec   :  { %v1343_v38 = vadd.f32 %v2315_v34, %v3343_v16  ;;  %v2428_v39 = vpop.f32.mrf.mxu1  ;;  %1893 = vmatmul.mubr.bf16.gmra.mxu1 %v2180_v29  ;;  %1739 = vmatprep.mubr.bf16.mxu0 %v2187_v30 }
  0xed   :  { %v2317_v40 = vpop.f32.mrf.mxu0  ;;  %1900 = vmatprep.mubr.bf16.mxu1 %v2189_v32  ;;  %v129_v32 = vld [vmem:[%s3648_s0 + $0x378] sm:$0xff] }
  0xee   :  { %v3367_v43 = vadd.f32 %v2427_v36, %v1343_v38  ;;  %v2318_v44 = vadd.f32 %v2317_v40, %v2316_v37  ;;  %v2429_v45 = vpop.f32.mrf.mxu1  ;;  %v2202_v36 = vcombine.low %v116_v1, %v120_v2  ;;  %v2211_v40 = vcombine.high %v124_v26, %v128_v27 }
  0xef   :  { %v2430_v48 = vadd.f32 %v2429_v45, %v2428_v39  ;;  %v2319_v49 = vpop.f32.mrf.mxu0  ;;  %v2204_v39 = vcombine.low %v117_v6, %v121_v7  ;;  %v2213_v42 = vcombine.high %v125_v31, %v129_v32  ;;  %v2212_v1 = vcombine.low %v125_v31, %v129_v32 }
  0xf0   :  { %v1348_v51 = vadd.f32 %v2318_v44, %v3343_v16  ;;  %v2431_v52 = vpop.f32.mrf.mxu1 }
  0xf1   :  { %v2320_v55 = vpop.f32.mrf.mxu0 }
  0xf2   :  { %v3376_v57 = vadd.f32 %v2430_v48, %v1348_v51  ;;  %v2321_v58 = vadd.f32 %v2320_v55, %v2319_v49  ;;  %v2432_v59 = vpop.f32.mrf.mxu1 }
  0xf3   :  { %v2433_v60 = vadd.f32 %v2432_v59, %v2431_v52  ;;  %v2322_v61 = vpop.f32.mrf.mxu0  ;;  %1740 = vmatmul.mubr.bf16.gmra.mxu0 %v2186_v50  ;;  %v132_v52 = vld [vmem:[%s3648_s0 + $0x390] sm:$0xff]  ;;  %v137_v59 = vld [vmem:[%s3648_s0 + $0x3b8] sm:$0xff] }
  0xf4   :  { %v1351_v62 = vadd.f32 %v2321_v58, %v3343_v16  ;;  %v2434_v63 = vpop.f32.mrf.mxu1  ;;  %1901 = vmatmul.mubr.bf16.gmra.mxu1 %v2188_v53  ;;  %1747 = vmatprep.mubr.bf16.mxu0 %v2195_v54  ;;  %v136_v53 = vld [vmem:[%s3648_s0 + $0x3b0] sm:$0xff]  ;;  %v133_v58 = vld [vmem:[%s3648_s0 + $0x398] sm:$0xff] }
  0xf5   :  { %v2323_v0 = vpop.f32.mrf.mxu0  ;;  %1908 = vmatprep.mubr.bf16.mxu1 %v2197_v56  ;;  %v2219_v2 = vcombine.high %v132_v52, %v136_v53 }
  0xf6   :  { %v3385_v3 = vadd.f32 %v2433_v60, %v1351_v62  ;;  %v2324_v4 = vadd.f32 %v2323_v0, %v2322_v61  ;;  %v2435_v5 = vpop.f32.mrf.mxu1  ;;  %v2210_v62 = vcombine.low %v124_v26, %v128_v27 }
  0xf7   :  { %v2436_v8 = vadd.f32 %v2435_v5, %v2434_v63  ;;  %v2325_v9 = vpop.f32.mrf.mxu0  ;;  %v2221_v5 = vcombine.high %v133_v58, %v137_v59 }
  0xf8   :  { %v1356_v11 = vadd.f32 %v2324_v4, %v3343_v16  ;;  %v2437_v12 = vpop.f32.mrf.mxu1 }
  0xf9   :  { %v2326_v15 = vpop.f32.mrf.mxu0 }
  0xfa   :  { %v3394_v18 = vadd.f32 %v2436_v8, %v1356_v11  ;;  %v2327_v19 = vadd.f32 %v2326_v15, %v2325_v9  ;;  %v2438_v20 = vpop.f32.mrf.mxu1  ;;  %v144_v15 = vld [vmem:[%s3648_s0 + $0x3f0] sm:$0xff] }
  0xfb   :  { %v2439_v21 = vadd.f32 %v2438_v20, %v2437_v12  ;;  %v2328_v22 = vpop.f32.mrf.mxu0  ;;  %1748 = vmatmul.mubr.bf16.gmra.mxu0 %v2194_v10 }
  0xfc   :  { %v1359_v23 = vadd.f32 %v2327_v19, %v3343_v16  ;;  %v2440_v24 = vpop.f32.mrf.mxu1  ;;  %1909 = vmatmul.mubr.bf16.gmra.mxu1 %v2196_v13  ;;  %1755 = vmatprep.mubr.bf16.mxu0 %v2203_v14  ;;  %v140_v14 = vld [vmem:[%s3648_s0 + $0x3d0] sm:$0xff] }
  0xfd   :  { %v2329_v25 = vpop.f32.mrf.mxu0  ;;  %1916 = vmatprep.mubr.bf16.mxu1 %v2205_v17 }
  0xfe   :  { %v3403_v28 = vadd.f32 %v2439_v21, %v1359_v23  ;;  %v2330_v29 = vadd.f32 %v2329_v25, %v2328_v22  ;;  %v2441_v30 = vpop.f32.mrf.mxu1  ;;  %v141_v21 = vld [vmem:[%s3648_s0 + $0x3d8] sm:$0xff]  ;;  %v2218_v25 = vcombine.low %v132_v52, %v136_v53 }
  0xff   :  { %v2442_v34 = vadd.f32 %v2441_v30, %v2440_v24  ;;  %v2331_v35 = vpop.f32.mrf.mxu0  ;;  %v145_v22 = vld [vmem:[%s3648_s0 + $0x3f8] sm:$0xff]  ;;  %v2227_v30 = vcombine.high %v140_v14, %v144_v15 }
 0x100   :  { %v1364_v37 = vadd.f32 %v2330_v29, %v3343_v16  ;;  %v2443_v38 = vpop.f32.mrf.mxu1  ;;  %v2220_v29 = vcombine.low %v133_v58, %v137_v59  ;;  %v2229_v32 = vcombine.high %v141_v21, %v145_v22  ;;  %v2228_v52 = vcombine.low %v141_v21, %v145_v22 }
 0x101   :  { %v2332_v41 = vpop.f32.mrf.mxu0 }
 0x102   :  { %v3412_v44 = vadd.f32 %v2442_v34, %v1364_v37  ;;  %v2333_v45 = vadd.f32 %v2332_v41, %v2331_v35  ;;  %v2444_v46 = vpop.f32.mrf.mxu1 }
 0x103   :  { %v2445_v47 = vadd.f32 %v2444_v46, %v2443_v38  ;;  %v2334_v48 = vpop.f32.mrf.mxu0  ;;  %1756 = vmatmul.mubr.bf16.gmra.mxu0 %v2202_v36 }
 0x104   :  { %v1367_v49 = vadd.f32 %v2333_v45, %v3343_v16  ;;  %v2446_v50 = vpop.f32.mrf.mxu1  ;;  %1917 = vmatmul.mubr.bf16.gmra.mxu1 %v2204_v39  ;;  %1763 = vmatprep.mubr.bf16.mxu0 %v2211_v40 }
 0x105   :  { %v2335_v51 = vpop.f32.mrf.mxu0  ;;  %1924 = vmatprep.mubr.bf16.mxu1 %v2213_v42 }
 0x106   :  { %v3421_v54 = vadd.f32 %v2445_v47, %v1367_v49  ;;  %v2336_v55 = vadd.f32 %v2335_v51, %v2334_v48  ;;  %v2447_v56 = vpop.f32.mrf.mxu1  ;;  %v2226_v49 = vcombine.low %v140_v14, %v144_v15 }
 0x107   :  { %v2448_v60 = vadd.f32 %v2447_v56, %v2446_v50  ;;  %v2337_v61 = vpop.f32.mrf.mxu0 }
 0x108   :  { %v1372_v63 = vadd.f32 %v2336_v55, %v3343_v16  ;;  %v2449_v0 = vpop.f32.mrf.mxu1 }
 0x109   :  { %v2338_v4 = vpop.f32.mrf.mxu0 }
 0x10a   :  { %v3430_v6 = vadd.f32 %v2448_v60, %v1372_v63  ;;  %v2339_v7 = vadd.f32 %v2338_v4, %v2337_v61  ;;  %v2450_v8 = vpop.f32.mrf.mxu1 }
 0x10b   :  { %v2451_v9 = vadd.f32 %v2450_v8, %v2449_v0  ;;  %v2340_v10 = vpop.f32.mrf.mxu0  ;;  %1764 = vmatmul.mubr.bf16.gmra.mxu0 %v2210_v62 }
 0x10c   :  { %v1375_v11 = vadd.f32 %v2339_v7, %v3343_v16  ;;  %v2452_v12 = vpop.f32.mrf.mxu1  ;;  %1925 = vmatmul.mubr.bf16.gmra.mxu1 %v2212_v1  ;;  %1771 = vmatprep.mubr.bf16.mxu0 %v2219_v2 }
 0x10d   :  { %v2341_v13 = vpop.f32.mrf.mxu0  ;;  %1932 = vmatprep.mubr.bf16.mxu1 %v2221_v5 }
 0x10e   :  { %v3439_v17 = vadd.f32 %v2451_v9, %v1375_v11  ;;  %v2342_v19 = vadd.f32 %v2341_v13, %v2340_v10  ;;  %v2453_v20 = vpop.f32.mrf.mxu1 }
 0x10f   :  { %v2454_v23 = vadd.f32 %v2453_v20, %v2452_v12  ;;  %v2343_v24 = vpop.f32.mrf.mxu0 }
 0x110   :  { %v1380_v26 = vadd.f32 %v2342_v19, %v3343_v16  ;;  %v2455_v27 = vpop.f32.mrf.mxu1 }
 0x111   :  { %v2344_v31 = vpop.f32.mrf.mxu0 }
 0x112   :  { %v3448_v34 = vadd.f32 %v2454_v23, %v1380_v26  ;;  %v2345_v35 = vadd.f32 %v2344_v31, %v2343_v24  ;;  %v2456_v36 = vpop.f32.mrf.mxu1 }
 0x113   :  { %v2457_v37 = vadd.f32 %v2456_v36, %v2455_v27  ;;  %v2346_v38 = vpop.f32.mrf.mxu0  ;;  %1772 = vmatmul.mubr.bf16.gmra.mxu0 %v2218_v25 }
 0x114   :  { %v1383_v39 = vadd.f32 %v2345_v35, %v3343_v16  ;;  %v2458_v40 = vpop.f32.mrf.mxu1  ;;  %1933 = vmatmul.mubr.bf16.gmra.mxu1 %v2220_v29  ;;  %1779 = vmatprep.mubr.bf16.mxu0 %v2227_v30 }
 0x115   :  { %v2347_v41 = vpop.f32.mrf.mxu0  ;;  %1940 = vmatprep.mubr.bf16.mxu1 %v2229_v32 }
 0x116   :  { %v3451_v42 = vadd.f32 %v2457_v37, %v1383_v39  ;;  %v2348_v45 = vadd.f32 %v2347_v41, %v2346_v38  ;;  %v2459_v46 = vpop.f32.mrf.mxu1 }
 0x117   :  { %v2460_v47 = vadd.f32 %v2459_v46, %v2458_v40  ;;  %v2349_v48 = vpop.f32.mrf.mxu0 }
 0x118   :  { %v1388_v50 = vadd.f32 %v2348_v45, %v3343_v16  ;;  %v2461_v51 = vpop.f32.mrf.mxu1 }
 0x119   :  { %v2350_v53 = vpop.f32.mrf.mxu0 }
 0x11a   :  { %v3454_v55 = vadd.f32 %v2460_v47, %v1388_v50  ;;  %v2351_v56 = vadd.f32 %v2350_v53, %v2349_v48  ;;  %v2462_v58 = vpop.f32.mrf.mxu1 }
 0x11b   :  { %v2463_v59 = vadd.f32 %v2462_v58, %v2461_v51  ;;  %v2352_v60 = vpop.f32.mrf.mxu0  ;;  %1780 = vmatmul.mubr.bf16.gmra.mxu0 %v2226_v49 }
 0x11c   :  { %v1391_v61 = vadd.f32 %v2351_v56, %v3343_v16  ;;  %v2464_v62 = vpop.f32.mrf.mxu1  ;;  %1941 = vmatmul.mubr.bf16.gmra.mxu1 %v2228_v52 }
 0x11d   :  { %v2353_v63 = vpop.f32.mrf.mxu0 }
 0x11e   :  { %v3457_v0 = vadd.f32 %v2463_v59, %v1391_v61  ;;  %v2354_v1 = vadd.f32 %v2353_v63, %v2352_v60  ;;  %v2465_v2 = vpop.f32.mrf.mxu1 }
 0x11f   :  { %v2466_v4 = vadd.f32 %v2465_v2, %v2464_v62  ;;  %v2355_v5 = vpop.f32.mrf.mxu0 }
 0x120   :  { %v1396_v7 = vadd.f32 %v2354_v1, %v3343_v16  ;;  %v2467_v8 = vpop.f32.mrf.mxu1 }
 0x121   :  { %v2356_v9 = vpop.f32.mrf.mxu0 }
 0x122   :  { %v3460_v10 = vadd.f32 %v2466_v4, %v1396_v7  ;;  %v2357_v11 = vadd.f32 %v2356_v9, %v2355_v5  ;;  %v2468_v12 = vpop.f32.mrf.mxu1 }
 0x123   :  { %v2469_v13 = vadd.f32 %v2468_v12, %v2467_v8  ;;  %v2358_v14 = vpop.f32.mrf.mxu0 }
 0x124   :  { %v1399_v15 = vadd.f32 %v2357_v11, %v3343_v16  ;;  %v2470_v19 = vpop.f32.mrf.mxu1 }
 0x125   :  { %v2359_v20 = vpop.f32.mrf.mxu0 }
 0x126   :  { %v3463_v21 = vadd.f32 %v2469_v13, %v1399_v15  ;;  %v2360_v22 = vadd.f32 %v2359_v20, %v2358_v14  ;;  %v2471_v23 = vpop.f32.mrf.mxu1 }
 0x127   :  { %v2472_v24 = vadd.f32 %v2471_v23, %v2470_v19  ;;  %v2361_v25 = vpop.f32.mrf.mxu0 }
 0x128   :  { %v1404_v26 = vadd.f32 %v2360_v22, %v3343_v16  ;;  %v2473_v27 = vpop.f32.mrf.mxu1 }
 0x129   :  { %v2362_v29 = vpop.f32.mrf.mxu0 }
 0x12a   :  { %v3466_v30 = vadd.f32 %v2472_v24, %v1404_v26  ;;  %v2363_v31 = vadd.f32 %v2362_v29, %v2361_v25  ;;  %v2474_v32 = vpop.f32.mrf.mxu1 }
 0x12b   :  { %v2475_v35 = vadd.f32 %v2474_v32, %v2473_v27  ;;  %v2364_v36 = vpop.f32.mrf.mxu0 }
 0x12c   :  { %v1407_v37 = vadd.f32 %v2363_v31, %v3343_v16  ;;  %v2476_v38 = vpop.f32.mrf.mxu1 }
 0x12d   :  { %v2365_v39 = vpop.f32.mrf.mxu0 }
 0x12e   :  { %v3469_v40 = vadd.f32 %v2475_v35, %v1407_v37  ;;  %v2366_v41 = vadd.f32 %v2365_v39, %v2364_v36  ;;  %v2477_v45 = vpop.f32.mrf.mxu1 }
 0x12f   :  { %v2478_v46 = vadd.f32 %v2477_v45, %v2476_v38  ;;  %v2367_v47 = vpop.f32.mrf.mxu0 }
 0x130   :  { %v1412_v48 = vadd.f32 %v2366_v41, %v3343_v16  ;;  %v2479_v49 = vpop.f32.mrf.mxu1 }
 0x131   :  { %v2368_v50 = vpop.f32.mrf.mxu0 }
 0x132   :  { %v3472_v51 = vadd.f32 %v2478_v46, %v1412_v48  ;;  %v2369_v52 = vadd.f32 %v2368_v50, %v2367_v47  ;;  %v2480_v53 = vpop.f32.mrf.mxu1 }
 0x133   :  { %v2481_v56 = vadd.f32 %v2480_v53, %v2479_v49  ;;  %v2370_v58 = vpop.f32.mrf.mxu0 }
 0x134   :  { %v1415_v59 = vadd.f32 %v2369_v52, %v3343_v16  ;;  %v2482_v60 = vpop.f32.mrf.mxu1 }
 0x135   :  { %v2371_v61 = vpop.f32.mrf.mxu0 }
 0x136   :  { %v3475_v62 = vadd.f32 %v2481_v56, %v1415_v59  ;;  %v2372_v63 = vadd.f32 %v2371_v61, %v2370_v58  ;;  %v2483_v1 = vpop.f32.mrf.mxu1 }
 0x137   :  { %v2484_v2 = vadd.f32 %v2483_v1, %v2482_v60  ;;  %v2373_v4 = vpop.f32.mrf.mxu0 }
 0x138   :  { %v1420_v5 = vadd.f32 %v2372_v63, %v3343_v16  ;;  %v2485_v7 = vpop.f32.mrf.mxu1 }
 0x139   :  { %v2374_v8 = vpop.f32.mrf.mxu0 }
 0x13a   :  { %v3478_v9 = vadd.f32 %v2484_v2, %v1420_v5  ;;  %v2375_v11 = vadd.f32 %v2374_v8, %v2373_v4  ;;  %v2486_v12 = vpop.f32.mrf.mxu1 }
 0x13b   :  { %v2487_v13 = vadd.f32 %v2486_v12, %v2485_v7  ;;  %v2376_v14 = vpop.f32.mrf.mxu0 }
 0x13c   :  { %v1423_v15 = vadd.f32 %v2375_v11, %v3343_v16  ;;  %v2488_v19 = vpop.f32.mrf.mxu1 }
 0x13d   :  { %v2377_v20 = vpop.f32.mrf.mxu0 }
 0x13e   :  { %v3481_v22 = vadd.f32 %v2487_v13, %v1423_v15  ;;  %v2378_v23 = vadd.f32 %v2377_v20, %v2376_v14  ;;  %v2489_v24 = vpop.f32.mrf.mxu1 }
 0x13f   :  { %v2490_v25 = vadd.f32 %v2489_v24, %v2488_v19  ;;  %v2379_v26 = vpop.f32.mrf.mxu0 }
 0x140   :  { %v1428_v27 = vadd.f32 %v2378_v23, %v3343_v16  ;;  %v2491_v29 = vpop.f32.mrf.mxu1 }
 0x141   :  { %v2380_v31 = vpop.f32.mrf.mxu0 }
 0x142   :  { %v3484_v32 = vadd.f32 %v2490_v25, %v1428_v27  ;;  %v2381_v35 = vadd.f32 %v2380_v31, %v2379_v26  ;;  %v2492_v36 = vpop.f32.mrf.mxu1 }
 0x143   :  { %v2493_v37 = vadd.f32 %v2492_v36, %v2491_v29  ;;  %v2382_v38 = vpop.f32.mrf.mxu0 }
 0x144   :  { %v1431_v39 = vadd.f32 %v2381_v35, %v3343_v16  ;;  %v2494_v41 = vpop.f32.mrf.mxu1 }
 0x145   :  { %v2383_v45 = vpop.f32.mrf.mxu0 }
 0x146   :  { %v3487_v46 = vadd.f32 %v2493_v37, %v1431_v39  ;;  %v2384_v47 = vadd.f32 %v2383_v45, %v2382_v38  ;;  %v2495_v48 = vpop.f32.mrf.mxu1 }
 0x147   :  { %v2496_v49 = vadd.f32 %v2495_v48, %v2494_v41  ;;  %v2385_v50 = vpop.f32.mrf.mxu0 }
 0x148   :  { %v1436_v52 = vadd.f32 %v2384_v47, %v3343_v16  ;;  %v2497_v53 = vpop.f32.mrf.mxu1 }
 0x149   :  { %v2386_v56 = vpop.f32.mrf.mxu0 }
 0x14a   :  { %v3490_v58 = vadd.f32 %v2496_v49, %v1436_v52  ;;  %v2387_v59 = vadd.f32 %v2386_v56, %v2385_v50  ;;  %v2498_v60 = vpop.f32.mrf.mxu1 }
 0x14b   :  { %v2499_v61 = vadd.f32 %v2498_v60, %v2497_v53  ;;  %v2388_v63 = vpop.f32.mrf.mxu0 }
 0x14c   :  { %v1439_v1 = vadd.f32 %v2387_v59, %v3343_v16  ;;  %v2500_v2 = vpop.f32.mrf.mxu1 }
 0x14d   :  { %v2389_v4 = vpop.f32.mrf.mxu0 }
 0x14e   :  { %v3493_v5 = vadd.f32 %v2499_v61, %v1439_v1  ;;  %v2390_v7 = vadd.f32 %v2389_v4, %v2388_v63  ;;  %v2501_v8 = vpop.f32.mrf.mxu1 }
 0x14f   :  { %v2502_v11 = vadd.f32 %v2501_v8, %v2500_v2  ;;  %v2391_v12 = vpop.f32.mrf.mxu0 }
 0x150   :  { %v1444_v13 = vadd.f32 %v2390_v7, %v3343_v16  ;;  %v2503_v14 = vpop.f32.mrf.mxu1 }
 0x151   :  { %v2392_v15 = vpop.f32.mrf.mxu0 }
 0x152   :  { %v3496_v19 = vadd.f32 %v2502_v11, %v1444_v13  ;;  %v2393_v20 = vadd.f32 %v2392_v15, %v2391_v12  ;;  %v2504_v23 = vpop.f32.mrf.mxu1 }
 0x153   :  { %v2505_v24 = vadd.f32 %v2504_v23, %v2503_v14  ;;  %v2394_v25 = vpop.f32.mrf.mxu0 }
 0x154   :  { %v1447_v26 = vadd.f32 %v2393_v20, %v3343_v16  ;;  %v2506_v27 = vpop.f32.mrf.mxu1 }
 0x155   :  { %v2395_v29 = vpop.f32.mrf.mxu0 }
 0x156   :  { %v3499_v31 = vadd.f32 %v2505_v24, %v1447_v26  ;;  %v2396_v35 = vadd.f32 %v2395_v29, %v2394_v25  ;;  %v2507_v36 = vpop.f32.mrf.mxu1 }
 0x157   :  { %v2508_v37 = vadd.f32 %v2507_v36, %v2506_v27  ;;  %v2397_v38 = vpop.f32.mrf.mxu0 }
 0x158   :  { %v1452_v39 = vadd.f32 %v2396_v35, %v3343_v16  ;;  %v2509_v41 = vpop.f32.mrf.mxu1 }
 0x159   :  { %v2398_v45 = vpop.f32.mrf.mxu0 }
 0x15a   :  { %v3502_v47 = vadd.f32 %v2508_v37, %v1452_v39  ;;  %v2399_v48 = vadd.f32 %v2398_v45, %v2397_v38  ;;  %v2510_v49 = vpop.f32.mrf.mxu1 }
 0x15b   :  { %v2511_v50 = vadd.f32 %v2510_v49, %v2509_v41  ;;  %v2400_v52 = vpop.f32.mrf.mxu0 }
 0x15c   :  { %v1455_v53 = vadd.f32 %v2399_v48, %v3343_v16  ;;  %v2512_v56 = vpop.f32.mrf.mxu1 }
 0x15d   :  { %v2401_v59 = vpop.f32.mrf.mxu0 }
 0x15e   :  { %v3505_v60 = vadd.f32 %v2511_v50, %v1455_v53  ;;  %v2402_v61 = vadd.f32 %v2401_v59, %v2400_v52  ;;  %v2513_v63 = vpop.f32.mrf.mxu1 }
 0x15f   :  { %v2514_v1 = vadd.f32 %v2513_v63, %v2512_v56  ;;  %v2403_v2 = vpop.f32.mrf.mxu0 }
 0x160   :  { %v1460_v4 = vadd.f32 %v2402_v61, %v3343_v16  ;;  %v2515_v7 = vpop.f32.mrf.mxu1 }
 0x161   :  { %v2404_v8 = vpop.f32.mrf.mxu0 }
 0x162   :  { %v3508_v11 = vadd.f32 %v2514_v1, %v1460_v4  ;;  %v2405_v12 = vadd.f32 %v2404_v8, %v2403_v2  ;;  %v2516_v13 = vpop.f32.mrf.mxu1 }
 0x163   :  { %v2517_v14 = vadd.f32 %v2516_v13, %v2515_v7  ;;  %v2534_v15 = vpop.f32.mrf.mxu0 }
 0x164   :  { %v1463_v20 = vadd.f32 %v2405_v12, %v3343_v16  ;;  %v2646_v23 = vpop.f32.mrf.mxu1 }
 0x165   :  { %v2535_v24 = vpop.f32.mrf.mxu0 }
 0x166   :  { %v3511_v25 = vadd.f32 %v2517_v14, %v1463_v20  ;;  %v2536_v26 = vadd.f32 %v2535_v24, %v2534_v15  ;;  %v2647_v27 = vpop.f32.mrf.mxu1 }
 0x167   :  { %v2537_v29 = vpop.f32.mrf.mxu0  ;;  %v2648_v36 = vadd.f32 %v2647_v27, %v2646_v23 }
 0x168   :  { %v1662_v35 = vadd.f32 %v2536_v26, %v3358_v33  ;;  %v2649_v37 = vpop.f32.mrf.mxu1 }
 0x169   :  { %v2538_v38 = vpop.f32.mrf.mxu0 }
 0x16a   :  { %v1823_v39 = vadd.f32 %v2648_v36, %v1662_v35  ;;  %v2539_v41 = vadd.f32 %v2538_v38, %v2537_v29  ;;  %v2650_v45 = vpop.f32.mrf.mxu1 }
 0x16b   :  { %v2540_v48 = vpop.f32.mrf.mxu0  ;;  %v2651_v49 = vadd.f32 %v2650_v45, %v2649_v37 }
 0x16c   :  { %1949 = vst [vmem:[%s3650_s3] sm:$0xff] %v1823_v39  ;;  %v1665_v16 = vadd.f32 %v2539_v41, %v3367_v43  ;;  %v2652_v50 = vpop.f32.mrf.mxu1  ;;  %v2018_v33 = vmul.f32 %v1823_v39, %v1823_v39 }
 0x16d   :  { %v2541_v52 = vpop.f32.mrf.mxu0 }
 0x16e   :  { %v1826_v53 = vadd.f32 %v2651_v49, %v1665_v16  ;;  %v2542_v56 = vadd.f32 %v2541_v52, %v2540_v48  ;;  %v2653_v59 = vpop.f32.mrf.mxu1 }
 0x16f   :  { %v2543_v61 = vpop.f32.mrf.mxu0  ;;  %v2654_v4 = vadd.f32 %v2653_v59, %v2652_v50 }
 0x170   :  { %1950 = vst [vmem:[%s3650_s3 + $0x8] sm:$0xff] %v1826_v53  ;;  %v1981_v63 = vadd.f32 %v1826_v53, %v1823_v39  ;;  %v2019_v1 = vmul.f32 %v1826_v53, %v1826_v53  ;;  %v1670_v2 = vadd.f32 %v2542_v56, %v3376_v57  ;;  %v2655_v7 = vpop.f32.mrf.mxu1 }
 0x171   :  { %v2544_v8 = vpop.f32.mrf.mxu0 }
 0x172   :  { %v2050_v43 = vadd.f32 %v2019_v1, %v2018_v33  ;;  %v1831_v12 = vadd.f32 %v2654_v4, %v1670_v2  ;;  %v2545_v13 = vadd.f32 %v2544_v8, %v2543_v61  ;;  %v2656_v14 = vpop.f32.mrf.mxu1 }
 0x173   :  { %v2546_v15 = vpop.f32.mrf.mxu0  ;;  %v2657_v26 = vadd.f32 %v2656_v14, %v2655_v7 }
 0x174   :  { %1951 = vst [vmem:[%s3650_s3 + $0x10] sm:$0xff] %v1831_v12  ;;  %v1982_v20 = vadd.f32 %v1981_v63, %v1831_v12  ;;  %v2020_v23 = vmul.f32 %v1831_v12, %v1831_v12  ;;  %v1673_v24 = vadd.f32 %v2545_v13, %v3385_v3  ;;  %v2658_v27 = vpop.f32.mrf.mxu1 }
 0x175   :  { %v2547_v29 = vpop.f32.mrf.mxu0 }
 0x176   :  { %v2051_v57 = vadd.f32 %v2050_v43, %v2020_v23  ;;  %v1834_v35 = vadd.f32 %v2657_v26, %v1673_v24  ;;  %v2548_v36 = vadd.f32 %v2547_v29, %v2546_v15  ;;  %v2659_v37 = vpop.f32.mrf.mxu1 }
 0x177   :  { %v2549_v38 = vpop.f32.mrf.mxu0  ;;  %v2660_v48 = vadd.f32 %v2659_v37, %v2658_v27 }
 0x178   :  { %1952 = vst [vmem:[%s3650_s3 + $0x18] sm:$0xff] %v1834_v35  ;;  %v1983_v39 = vadd.f32 %v1982_v20, %v1834_v35  ;;  %v2021_v41 = vmul.f32 %v1834_v35, %v1834_v35  ;;  %v1678_v45 = vadd.f32 %v2548_v36, %v3394_v18  ;;  %v2661_v16 = vpop.f32.mrf.mxu1 }
 0x179   :  { %v2550_v49 = vpop.f32.mrf.mxu0 }
 0x17a   :  { %v2052_v3 = vadd.f32 %v2051_v57, %v2021_v41  ;;  %v1839_v50 = vadd.f32 %v2660_v48, %v1678_v45  ;;  %v2551_v52 = vadd.f32 %v2550_v49, %v2549_v38  ;;  %v2662_v53 = vpop.f32.mrf.mxu1 }
 0x17b   :  { %v2552_v56 = vpop.f32.mrf.mxu0  ;;  %v2663_v63 = vadd.f32 %v2662_v53, %v2661_v16 }
 0x17c   :  { %1953 = vst [vmem:[%s3650_s3 + $0x20] sm:$0xff] %v1839_v50  ;;  %v1984_v59 = vadd.f32 %v1983_v39, %v1839_v50  ;;  %v2022_v33 = vmul.f32 %v1839_v50, %v1839_v50  ;;  %v1681_v61 = vadd.f32 %v2551_v52, %v3403_v28  ;;  %v2664_v1 = vpop.f32.mrf.mxu1 }
 0x17d   :  { %v2553_v2 = vpop.f32.mrf.mxu0 }
 0x17e   :  { %v2053_v18 = vadd.f32 %v2052_v3, %v2022_v33  ;;  %v1842_v4 = vadd.f32 %v2663_v63, %v1681_v61  ;;  %v2554_v7 = vadd.f32 %v2553_v2, %v2552_v56  ;;  %v2665_v8 = vpop.f32.mrf.mxu1 }
 0x17f   :  { %v2555_v43 = vpop.f32.mrf.mxu0  ;;  %v2666_v15 = vadd.f32 %v2665_v8, %v2664_v1 }
 0x180   :  { %1954 = vst [vmem:[%s3650_s3 + $0x28] sm:$0xff] %v1842_v4  ;;  %v1985_v12 = vadd.f32 %v1984_v59, %v1842_v4  ;;  %v2023_v13 = vmul.f32 %v1842_v4, %v1842_v4  ;;  %v1686_v14 = vadd.f32 %v2554_v7, %v3412_v44  ;;  %v2667_v20 = vpop.f32.mrf.mxu1 }
 0x181   :  { %v2556_v23 = vpop.f32.mrf.mxu0 }
 0x182   :  { %v2054_v28 = vadd.f32 %v2053_v18, %v2023_v13  ;;  %v1847_v24 = vadd.f32 %v2666_v15, %v1686_v14  ;;  %v2557_v26 = vadd.f32 %v2556_v23, %v2555_v43  ;;  %v2668_v27 = vpop.f32.mrf.mxu1 }
 0x183   :  { %v2558_v29 = vpop.f32.mrf.mxu0  ;;  %v2669_v37 = vadd.f32 %v2668_v27, %v2667_v20 }
 0x184   :  { %1955 = vst [vmem:[%s3650_s3 + $0x30] sm:$0xff] %v1847_v24  ;;  %v1986_v57 = vadd.f32 %v1985_v12, %v1847_v24  ;;  %v2024_v35 = vmul.f32 %v1847_v24, %v1847_v24  ;;  %v1689_v36 = vadd.f32 %v2557_v26, %v3421_v54  ;;  %v2670_v38 = vpop.f32.mrf.mxu1 }
 0x185   :  { %v2559_v39 = vpop.f32.mrf.mxu0 }
 0x186   :  { %v2055_v44 = vadd.f32 %v2054_v28, %v2024_v35  ;;  %v1850_v41 = vadd.f32 %v2669_v37, %v1689_v36  ;;  %v2560_v45 = vadd.f32 %v2559_v39, %v2558_v29  ;;  %v2671_v48 = vpop.f32.mrf.mxu1 }
 0x187   :  { %v2561_v16 = vpop.f32.mrf.mxu0  ;;  %v2672_v52 = vadd.f32 %v2671_v48, %v2670_v38 }
 0x188   :  { %1956 = vst [vmem:[%s3650_s3 + $0x38] sm:$0xff] %v1850_v41  ;;  %v1987_v49 = vadd.f32 %v1986_v57, %v1850_v41  ;;  %v2025_v3 = vmul.f32 %v1850_v41, %v1850_v41  ;;  %v1694_v50 = vadd.f32 %v2560_v45, %v3430_v6  ;;  %v2673_v53 = vpop.f32.mrf.mxu1 }
 0x189   :  { %v2562_v56 = vpop.f32.mrf.mxu0 }
 0x18a   :  { %v2056_v54 = vadd.f32 %v2055_v44, %v2025_v3  ;;  %v1855_v59 = vadd.f32 %v2672_v52, %v1694_v50  ;;  %v2563_v33 = vadd.f32 %v2562_v56, %v2561_v16  ;;  %v2674_v61 = vpop.f32.mrf.mxu1 }
 0x18b   :  { %v2564_v63 = vpop.f32.mrf.mxu0  ;;  %v2675_v4 = vadd.f32 %v2674_v61, %v2673_v53 }
 0x18c   :  { %1957 = vst [vmem:[%s3650_s3 + $0x40] sm:$0xff] %v1855_v59  ;;  %v1988_v1 = vadd.f32 %v1987_v49, %v1855_v59  ;;  %v2026_v2 = vmul.f32 %v1855_v59, %v1855_v59  ;;  %v1697_v18 = vadd.f32 %v2563_v33, %v3439_v17  ;;  %v2676_v7 = vpop.f32.mrf.mxu1 }
 0x18d   :  { %v2565_v8 = vpop.f32.mrf.mxu0 }
 0x18e   :  { %v2057_v6 = vadd.f32 %v2056_v54, %v2026_v2  ;;  %v1858_v43 = vadd.f32 %v2675_v4, %v1697_v18  ;;  %v2566_v12 = vadd.f32 %v2565_v8, %v2564_v63  ;;  %v2677_v13 = vpop.f32.mrf.mxu1 }
 0x18f   :  { %v2567_v14 = vpop.f32.mrf.mxu0  ;;  %v2678_v28 = vadd.f32 %v2677_v13, %v2676_v7 }
 0x190   :  { %1958 = vst [vmem:[%s3650_s3 + $0x48] sm:$0xff] %v1858_v43  ;;  %v1989_v15 = vadd.f32 %v1988_v1, %v1858_v43  ;;  %v2027_v20 = vmul.f32 %v1858_v43, %v1858_v43  ;;  %v1702_v23 = vadd.f32 %v2566_v12, %v3448_v34  ;;  %v2679_v24 = vpop.f32.mrf.mxu1 }
 0x191   :  { %v2568_v26 = vpop.f32.mrf.mxu0 }
 0x192   :  { %v2058_v17 = vadd.f32 %v2057_v6, %v2027_v20  ;;  %v1863_v27 = vadd.f32 %v2678_v28, %v1702_v23  ;;  %v2569_v29 = vadd.f32 %v2568_v26, %v2567_v14  ;;  %v2680_v57 = vpop.f32.mrf.mxu1 }
 0x193   :  { %v2570_v35 = vpop.f32.mrf.mxu0  ;;  %v2681_v39 = vadd.f32 %v2680_v57, %v2679_v24 }
 0x194   :  { %1959 = vst [vmem:[%s3650_s3 + $0x50] sm:$0xff] %v1863_v27  ;;  %v1990_v36 = vadd.f32 %v1989_v15, %v1863_v27  ;;  %v2028_v37 = vmul.f32 %v1863_v27, %v1863_v27  ;;  %v1705_v38 = vadd.f32 %v2569_v29, %v3451_v42  ;;  %v2682_v44 = vpop.f32.mrf.mxu1 }
 0x195   :  { %v2571_v41 = vpop.f32.mrf.mxu0 }
 0x196   :  { %v2059_v34 = vadd.f32 %v2058_v17, %v2028_v37  ;;  %v1866_v45 = vadd.f32 %v2681_v39, %v1705_v38  ;;  %v2572_v48 = vadd.f32 %v2571_v41, %v2570_v35  ;;  %v2683_v16 = vpop.f32.mrf.mxu1 }
 0x197   :  { %v2573_v49 = vpop.f32.mrf.mxu0  ;;  %v2684_v53 = vadd.f32 %v2683_v16, %v2682_v44 }
 0x198   :  { %1960 = vst [vmem:[%s3650_s3 + $0x58] sm:$0xff] %v1866_v45  ;;  %v1991_v3 = vadd.f32 %v1990_v36, %v1866_v45  ;;  %v2029_v50 = vmul.f32 %v1866_v45, %v1866_v45  ;;  %v1710_v52 = vadd.f32 %v2572_v48, %v3454_v55  ;;  %v2685_v56 = vpop.f32.mrf.mxu1 }
 0x199   :  { %v2574_v54 = vpop.f32.mrf.mxu0 }
 0x19a   :  { %v2060_v42 = vadd.f32 %v2059_v34, %v2029_v50  ;;  %v1871_v59 = vadd.f32 %v2684_v53, %v1710_v52  ;;  %v2575_v33 = vadd.f32 %v2574_v54, %v2573_v49  ;;  %v2686_v61 = vpop.f32.mrf.mxu1 }
 0x19b   :  { %v2576_v63 = vpop.f32.mrf.mxu0  ;;  %v2687_v4 = vadd.f32 %v2686_v61, %v2685_v56 }
 0x19c   :  { %1961 = vst [vmem:[%s3650_s3 + $0x60] sm:$0xff] %v1871_v59  ;;  %v1992_v1 = vadd.f32 %v1991_v3, %v1871_v59  ;;  %v2030_v2 = vmul.f32 %v1871_v59, %v1871_v59  ;;  %v1713_v18 = vadd.f32 %v2575_v33, %v3457_v0  ;;  %v2688_v7 = vpop.f32.mrf.mxu1 }
 0x19d   :  { %v2577_v8 = vpop.f32.mrf.mxu0 }
 0x19e   :  { %v2061_v55 = vadd.f32 %v2060_v42, %v2030_v2  ;;  %v1874_v6 = vadd.f32 %v2687_v4, %v1713_v18  ;;  %v2578_v43 = vadd.f32 %v2577_v8, %v2576_v63  ;;  %v2689_v12 = vpop.f32.mrf.mxu1 }
 0x19f   :  { %v2579_v13 = vpop.f32.mrf.mxu0  ;;  %v2690_v23 = vadd.f32 %v2689_v12, %v2688_v7 }
 0x1a0   :  { %1962 = vst [vmem:[%s3650_s3 + $0x68] sm:$0xff] %v1874_v6  ;;  %v1993_v14 = vadd.f32 %v1992_v1, %v1874_v6  ;;  %v2031_v15 = vmul.f32 %v1874_v6, %v1874_v6  ;;  %v1718_v20 = vadd.f32 %v2578_v43, %v3460_v10  ;;  %v2691_v28 = vpop.f32.mrf.mxu1 }
 0x1a1   :  { %v2580_v24 = vpop.f32.mrf.mxu0 }
 0x1a2   :  { %v2062_v0 = vadd.f32 %v2061_v55, %v2031_v15  ;;  %v1879_v26 = vadd.f32 %v2690_v23, %v1718_v20  ;;  %v2581_v17 = vadd.f32 %v2580_v24, %v2579_v13  ;;  %v2692_v27 = vpop.f32.mrf.mxu1 }
 0x1a3   :  { %v2582_v29 = vpop.f32.mrf.mxu0  ;;  %v2693_v37 = vadd.f32 %v2692_v27, %v2691_v28 }
 0x1a4   :  { %1963 = vst [vmem:[%s3650_s3 + $0x70] sm:$0xff] %v1879_v26  ;;  %v1994_v57 = vadd.f32 %v1993_v14, %v1879_v26  ;;  %v2032_v35 = vmul.f32 %v1879_v26, %v1879_v26  ;;  %v1721_v36 = vadd.f32 %v2581_v17, %v3463_v21  ;;  %v2694_v38 = vpop.f32.mrf.mxu1 }
 0x1a5   :  { %v2583_v39 = vpop.f32.mrf.mxu0 }
 0x1a6   :  { %v2063_v10 = vadd.f32 %v2062_v0, %v2032_v35  ;;  %v1882_v44 = vadd.f32 %v2693_v37, %v1721_v36  ;;  %v2584_v41 = vadd.f32 %v2583_v39, %v2582_v29  ;;  %v2695_v34 = vpop.f32.mrf.mxu1 }
 0x1a7   :  { %v2585_v45 = vpop.f32.mrf.mxu0  ;;  %v2696_v3 = vadd.f32 %v2695_v34, %v2694_v38 }
 0x1a8   :  { %1964 = vst [vmem:[%s3650_s3 + $0x78] sm:$0xff] %v1882_v44  ;;  %v1995_v48 = vadd.f32 %v1994_v57, %v1882_v44  ;;  %v2033_v16 = vmul.f32 %v1882_v44, %v1882_v44  ;;  %v1726_v49 = vadd.f32 %v2584_v41, %v3466_v30  ;;  %v2697_v50 = vpop.f32.mrf.mxu1 }
 0x1a9   :  { %v2586_v52 = vpop.f32.mrf.mxu0 }
 0x1aa   :  { %v2064_v21 = vadd.f32 %v2063_v10, %v2033_v16  ;;  %v1887_v53 = vadd.f32 %v2696_v3, %v1726_v49  ;;  %v2587_v56 = vadd.f32 %v2586_v52, %v2585_v45  ;;  %v2698_v54 = vpop.f32.mrf.mxu1 }
 0x1ab   :  { %v2588_v42 = vpop.f32.mrf.mxu0  ;;  %v2699_v63 = vadd.f32 %v2698_v54, %v2697_v50 }
 0x1ac   :  { %1965 = vst [vmem:[%s3650_s3 + $0x80] sm:$0xff] %v1887_v53  ;;  %v1996_v59 = vadd.f32 %v1995_v48, %v1887_v53  ;;  %v2034_v33 = vmul.f32 %v1887_v53, %v1887_v53  ;;  %v1729_v61 = vadd.f32 %v2587_v56, %v3469_v40  ;;  %v2700_v1 = vpop.f32.mrf.mxu1 }
 0x1ad   :  { %v2589_v2 = vpop.f32.mrf.mxu0 }
 0x1ae   :  { %v2065_v30 = vadd.f32 %v2064_v21, %v2034_v33  ;;  %v1890_v18 = vadd.f32 %v2699_v63, %v1729_v61  ;;  %v2590_v4 = vadd.f32 %v2589_v2, %v2588_v42  ;;  %v2701_v7 = vpop.f32.mrf.mxu1 }
 0x1af   :  { %v2591_v8 = vpop.f32.mrf.mxu0  ;;  %v2702_v12 = vadd.f32 %v2701_v7, %v2700_v1 }
 0x1b0   :  { %1966 = vst [vmem:[%s3650_s3 + $0x88] sm:$0xff] %v1890_v18  ;;  %v1997_v55 = vadd.f32 %v1996_v59, %v1890_v18  ;;  %v2035_v6 = vmul.f32 %v1890_v18, %v1890_v18  ;;  %v1734_v43 = vadd.f32 %v2590_v4, %v3472_v51  ;;  %v2703_v13 = vpop.f32.mrf.mxu1 }
 0x1b1   :  { %v2592_v14 = vpop.f32.mrf.mxu0 }
 0x1b2   :  { %v2066_v40 = vadd.f32 %v2065_v30, %v2035_v6  ;;  %v1895_v15 = vadd.f32 %v2702_v12, %v1734_v43  ;;  %v2593_v20 = vadd.f32 %v2592_v14, %v2591_v8  ;;  %v2704_v23 = vpop.f32.mrf.mxu1 }
 0x1b3   :  { %v2594_v28 = vpop.f32.mrf.mxu0  ;;  %v2705_v17 = vadd.f32 %v2704_v23, %v2703_v13 }
 0x1b4   :  { %1967 = vst [vmem:[%s3650_s3 + $0x90] sm:$0xff] %v1895_v15  ;;  %v1998_v24 = vadd.f32 %v1997_v55, %v1895_v15  ;;  %v2036_v0 = vmul.f32 %v1895_v15, %v1895_v15  ;;  %v1737_v26 = vadd.f32 %v2593_v20, %v3475_v62  ;;  %v2706_v27 = vpop.f32.mrf.mxu1 }
 0x1b5   :  { %v2595_v29 = vpop.f32.mrf.mxu0 }
 0x1b6   :  { %v2067_v51 = vadd.f32 %v2066_v40, %v2036_v0  ;;  %v1898_v57 = vadd.f32 %v2705_v17, %v1737_v26  ;;  %v2596_v35 = vadd.f32 %v2595_v29, %v2594_v28  ;;  %v2707_v36 = vpop.f32.mrf.mxu1 }
 0x1b7   :  { %v2597_v37 = vpop.f32.mrf.mxu0  ;;  %v2708_v44 = vadd.f32 %v2707_v36, %v2706_v27 }
 0x1b8   :  { %1968 = vst [vmem:[%s3650_s3 + $0x98] sm:$0xff] %v1898_v57  ;;  %v1999_v38 = vadd.f32 %v1998_v24, %v1898_v57  ;;  %v2037_v39 = vmul.f32 %v1898_v57, %v1898_v57  ;;  %v1742_v10 = vadd.f32 %v2596_v35, %v3478_v9  ;;  %v2709_v41 = vpop.f32.mrf.mxu1 }
 0x1b9   :  { %v2598_v34 = vpop.f32.mrf.mxu0 }
 0x1ba   :  { %v2068_v62 = vadd.f32 %v2067_v51, %v2037_v39  ;;  %v1903_v45 = vadd.f32 %v2708_v44, %v1742_v10  ;;  %v2599_v48 = vadd.f32 %v2598_v34, %v2597_v37  ;;  %v2710_v16 = vpop.f32.mrf.mxu1 }
 0x1bb   :  { %v2600_v49 = vpop.f32.mrf.mxu0  ;;  %v2711_v21 = vadd.f32 %v2710_v16, %v2709_v41 }
 0x1bc   :  { %1969 = vst [vmem:[%s3650_s3 + $0xa0] sm:$0xff] %v1903_v45  ;;  %v2000_v3 = vadd.f32 %v1999_v38, %v1903_v45  ;;  %v2038_v50 = vmul.f32 %v1903_v45, %v1903_v45  ;;  %v1745_v52 = vadd.f32 %v2599_v48, %v3481_v22  ;;  %v2712_v53 = vpop.f32.mrf.mxu1 }
 0x1bd   :  { %v2601_v56 = vpop.f32.mrf.mxu0 }
 0x1be   :  { %v2069_v9 = vadd.f32 %v2068_v62, %v2038_v50  ;;  %v1906_v54 = vadd.f32 %v2711_v21, %v1745_v52  ;;  %v2602_v42 = vadd.f32 %v2601_v56, %v2600_v49  ;;  %v2713_v59 = vpop.f32.mrf.mxu1 }
 0x1bf   :  { %v2603_v33 = vpop.f32.mrf.mxu0  ;;  %v2714_v2 = vadd.f32 %v2713_v59, %v2712_v53 }
 0x1c0   :  { %1970 = vst [vmem:[%s3650_s3 + $0xa8] sm:$0xff] %v1906_v54  ;;  %v2001_v61 = vadd.f32 %v2000_v3, %v1906_v54  ;;  %v2039_v63 = vmul.f32 %v1906_v54, %v1906_v54  ;;  %v1750_v1 = vadd.f32 %v2602_v42, %v3484_v32  ;;  %v2715_v30 = vpop.f32.mrf.mxu1 }
 0x1c1   :  { %v2604_v18 = vpop.f32.mrf.mxu0 }
 0x1c2   :  { %v2070_v22 = vadd.f32 %v2069_v9, %v2039_v63  ;;  %v1911_v4 = vadd.f32 %v2714_v2, %v1750_v1  ;;  %v2605_v7 = vadd.f32 %v2604_v18, %v2603_v33  ;;  %v2716_v8 = vpop.f32.mrf.mxu1 }
 0x1c3   :  { %v2606_v55 = vpop.f32.mrf.mxu0  ;;  %v2717_v13 = vadd.f32 %v2716_v8, %v2715_v30 }
 0x1c4   :  { %1971 = vst [vmem:[%s3650_s3 + $0xb0] sm:$0xff] %v1911_v4  ;;  %v2002_v6 = vadd.f32 %v2001_v61, %v1911_v4  ;;  %v2040_v43 = vmul.f32 %v1911_v4, %v1911_v4  ;;  %v1753_v12 = vadd.f32 %v2605_v7, %v3487_v46  ;;  %v2718_v14 = vpop.f32.mrf.mxu1 }
 0x1c5   :  { %v2607_v40 = vpop.f32.mrf.mxu0 }
 0x1c6   :  { %v2071_v32 = vadd.f32 %v2070_v22, %v2040_v43  ;;  %v1914_v15 = vadd.f32 %v2717_v13, %v1753_v12  ;;  %v2608_v20 = vadd.f32 %v2607_v40, %v2606_v55  ;;  %v2719_v23 = vpop.f32.mrf.mxu1 }
 0x1c7   :  { %v2609_v28 = vpop.f32.mrf.mxu0  ;;  %v2720_v17 = vadd.f32 %v2719_v23, %v2718_v14 }
 0x1c8   :  { %1972 = vst [vmem:[%s3650_s3 + $0xb8] sm:$0xff] %v1914_v15  ;;  %v2003_v24 = vadd.f32 %v2002_v6, %v1914_v15  ;;  %v2041_v0 = vmul.f32 %v1914_v15, %v1914_v15  ;;  %v1758_v26 = vadd.f32 %v2608_v20, %v3490_v58  ;;  %v2721_v27 = vpop.f32.mrf.mxu1 }
 0x1c9   :  { %v2610_v29 = vpop.f32.mrf.mxu0 }
 0x1ca   :  { %v2072_v46 = vadd.f32 %v2071_v32, %v2041_v0  ;;  %v1919_v51 = vadd.f32 %v2720_v17, %v1758_v26  ;;  %v2611_v57 = vadd.f32 %v2610_v29, %v2609_v28  ;;  %v2722_v35 = vpop.f32.mrf.mxu1 }
 0x1cb   :  { %v2612_v36 = vpop.f32.mrf.mxu0  ;;  %v2723_v10 = vadd.f32 %v2722_v35, %v2721_v27 }
 0x1cc   :  { %1973 = vst [vmem:[%s3650_s3 + $0xc0] sm:$0xff] %v1919_v51  ;;  %v2004_v37 = vadd.f32 %v2003_v24, %v1919_v51  ;;  %v2042_v38 = vmul.f32 %v1919_v51, %v1919_v51  ;;  %v1761_v39 = vadd.f32 %v2611_v57, %v3493_v5  ;;  %v2724_v44 = vpop.f32.mrf.mxu1 }
 0x1cd   :  { %v2613_v41 = vpop.f32.mrf.mxu0 }
 0x1ce   :  { %v2073_v58 = vadd.f32 %v2072_v46, %v2042_v38  ;;  %v1922_v34 = vadd.f32 %v2723_v10, %v1761_v39  ;;  %v2614_v62 = vadd.f32 %v2613_v41, %v2612_v36  ;;  %v2725_v45 = vpop.f32.mrf.mxu1 }
 0x1cf   :  { %v2615_v48 = vpop.f32.mrf.mxu0  ;;  %v2726_v50 = vadd.f32 %v2725_v45, %v2724_v44 }
 0x1d0   :  { %1974 = vst [vmem:[%s3650_s3 + $0xc8] sm:$0xff] %v1922_v34  ;;  %v2005_v16 = vadd.f32 %v2004_v37, %v1922_v34  ;;  %v2043_v49 = vmul.f32 %v1922_v34, %v1922_v34  ;;  %v1766_v3 = vadd.f32 %v2614_v62, %v3496_v19  ;;  %v2727_v52 = vpop.f32.mrf.mxu1 }
 0x1d1   :  { %v2616_v21 = vpop.f32.mrf.mxu0 }
 0x1d2   :  { %v2074_v5 = vadd.f32 %v2073_v58, %v2043_v49  ;;  %v1927_v53 = vadd.f32 %v2726_v50, %v1766_v3  ;;  %v2617_v56 = vadd.f32 %v2616_v21, %v2615_v48  ;;  %v2728_v9 = vpop.f32.mrf.mxu1 }
 0x1d3   :  { %v2618_v54 = vpop.f32.mrf.mxu0  ;;  %v2729_v61 = vadd.f32 %v2728_v9, %v2727_v52 }
 0x1d4   :  { %1975 = vst [vmem:[%s3650_s3 + $0xd0] sm:$0xff] %v1927_v53  ;;  %v2006_v42 = vadd.f32 %v2005_v16, %v1927_v53  ;;  %v2044_v59 = vmul.f32 %v1927_v53, %v1927_v53  ;;  %v1769_v33 = vadd.f32 %v2617_v56, %v3499_v31  ;;  %v2730_v63 = vpop.f32.mrf.mxu1 }
 0x1d5   :  { %v2619_v1 = vpop.f32.mrf.mxu0 }
 0x1d6   :  { %v2075_v19 = vadd.f32 %v2074_v5, %v2044_v59  ;;  %v1930_v2 = vadd.f32 %v2729_v61, %v1769_v33  ;;  %v2620_v30 = vadd.f32 %v2619_v1, %v2618_v54  ;;  %v2731_v18 = vpop.f32.mrf.mxu1 }
 0x1d7   :  { %v2621_v22 = vpop.f32.mrf.mxu0  ;;  %v2732_v55 = vadd.f32 %v2731_v18, %v2730_v63 }
 0x1d8   :  { %1976 = vst [vmem:[%s3650_s3 + $0xd8] sm:$0xff] %v1930_v2  ;;  %v2007_v4 = vadd.f32 %v2006_v42, %v1930_v2  ;;  %v2045_v7 = vmul.f32 %v1930_v2, %v1930_v2  ;;  %v1774_v8 = vadd.f32 %v2620_v30, %v3502_v47  ;;  %v2733_v6 = vpop.f32.mrf.mxu1 }
 0x1d9   :  { %v2622_v43 = vpop.f32.mrf.mxu0 }
 0x1da   :  { %v2076_v31 = vadd.f32 %v2075_v19, %v2045_v7  ;;  %v1935_v12 = vadd.f32 %v2732_v55, %v1774_v8  ;;  %v2623_v13 = vadd.f32 %v2622_v43, %v2621_v22  ;;  %v2734_v14 = vpop.f32.mrf.mxu1 }
 0x1db   :  { %v2624_v40 = vpop.f32.mrf.mxu0  ;;  %v2735_v23 = vadd.f32 %v2734_v14, %v2733_v6 }
 0x1dc   :  { %1977 = vst [vmem:[%s3650_s3 + $0xe0] sm:$0xff] %v1935_v12  ;;  %v2008_v32 = vadd.f32 %v2007_v4, %v1935_v12  ;;  %v2046_v15 = vmul.f32 %v1935_v12, %v1935_v12  ;;  %v1777_v20 = vadd.f32 %v2623_v13, %v3505_v60  ;;  %v2736_v28 = vpop.f32.mrf.mxu1 }
 0x1dd   :  { %v2625_v24 = vpop.f32.mrf.mxu0 }
 0x1de   :  { %v2077_v47 = vadd.f32 %v2076_v31, %v2046_v15  ;;  %v1938_v0 = vadd.f32 %v2735_v23, %v1777_v20  ;;  %v2626_v26 = vadd.f32 %v2625_v24, %v2624_v40  ;;  %v2737_v17 = vpop.f32.mrf.mxu1 }
 0x1df   :  { %v2627_v27 = vpop.f32.mrf.mxu0  ;;  %v2738_v57 = vadd.f32 %v2737_v17, %v2736_v28 }
 0x1e0   :  { %1978 = vst [vmem:[%s3650_s3 + $0xe8] sm:$0xff] %v1938_v0  ;;  %v2009_v29 = vadd.f32 %v2008_v32, %v1938_v0  ;;  %v2047_v46 = vmul.f32 %v1938_v0, %v1938_v0  ;;  %v1782_v51 = vadd.f32 %v2626_v26, %v3508_v11  ;;  %v2739_v35 = vpop.f32.mrf.mxu1 }
 0x1e1   :  { %v2628_v36 = vpop.f32.mrf.mxu0 }
 0x1e2   :  { %v2078_v60 = vadd.f32 %v2077_v47, %v2047_v46  ;;  %v1943_v37 = vadd.f32 %v2738_v57, %v1782_v51  ;;  %v2629_v38 = vadd.f32 %v2628_v36, %v2627_v27  ;;  %v2740_v39 = vpop.f32.mrf.mxu1 }
 0x1e3   :  { %v2741_v58 = vadd.f32 %v2740_v39, %v2739_v35 }
 0x1e4   :  { %1979 = vst [vmem:[%s3650_s3 + $0xf0] sm:$0xff] %v1943_v37  ;;  %v2010_v10 = vadd.f32 %v2009_v29, %v1943_v37  ;;  %v2048_v44 = vmul.f32 %v1943_v37, %v1943_v37  ;;  %v1785_v41 = vadd.f32 %v2629_v38, %v3511_v25 }
 0x1e6   :  { %v2079_v34 = vadd.f32 %v2078_v60, %v2048_v44  ;;  %v1946_v62 = vadd.f32 %v2741_v58, %v1785_v41 }
 0x1e8   :  { %1980 = vst [vmem:[%s3650_s3 + $0xf8] sm:$0xff] %v1946_v62  ;;  %v2011_v11 = vadd.f32 %v2010_v10, %v1946_v62  ;;  %v2049_v45 = vmul.f32 %v1946_v62, %v1946_v62 }
 0x1ea   :  { %v2012_v48 = vrot.slane %v2011_v11, 4  ;;  %v2080_v16 = vadd.f32 %v2079_v34, %v2049_v45 }
 0x1ec   :  { %v2013_v49 = vadd.f32 %v2012_v48, %v2011_v11  ;;  %v2081_v3 = vrot.slane %v2080_v16, 4 }
 0x1ee   :  { %v2014_v50 = vrot.slane %v2013_v49, 2  ;;  %v2082_v52 = vadd.f32 %v2081_v3, %v2080_v16 }
 0x1f0   :  { %v2015_v21 = vadd.f32 %v2014_v50, %v2013_v49  ;;  %v2083_v5 = vrot.slane %v2082_v52, 2 }
 0x1f2   :  { %v2016_v53 = vrot.slane %v2015_v21, 1  ;;  %v2084_v56 = vadd.f32 %v2083_v5, %v2082_v52 }
 0x1f4   :  { %v2017_v25 = vadd.f32 %v2016_v53, %v2015_v21  ;;  %v2085_v9 = vrot.slane %v2084_v56, 1 }
 0x1f6   :  { %v2086_v54 = vadd.f32 %v2085_v9, %v2084_v56  ;;  %2087 = vst [vmem:[%s3651_s4] sm:$0xff] %v2017_v25 }
 0x1f8   :  { %2088 = vst [vmem:[%s3652_s5] sm:$0xff] %v2086_v54 }

// kernel: discriminator_forward.5
= control target key start
LH: loop header
LB: loop body
LE: loop exit
PB: predicated region body
PF: predicated region fallthrough
CT: control target
= control target key end

     0   :  { %s972_s0 = inlined_call_operand.vmem [shape: f32[4,64,128], index: 0, kind: input, shape index: {}]   ;;  %s973_s1 = inlined_call_operand.vmem [shape: f32[1,1,128], index: 1, kind: input, shape index: {}]   ;;  %s974_s2 = inlined_call_operand.vmem [shape: f32[1,1,128], index: 2, kind: input, shape index: {}]   ;;  %s975_s3 = inlined_call_operand.vmem [shape: f32[1,64,128], index: 3, kind: input, shape index: {}]   ;;  %s976_s4 = inlined_call_operand.<no memory space> [shape: f32[1,1], index: 4, kind: input, shape index: {}]   ;;  %s977_s5 = inlined_call_operand.vmem [shape: f32[4,1], index: 5, kind: output, shape index: {}]  }
   0x1   :  { %v30_v0 = vld [vmem:[%s972_s0 + $0x40] sm:$0xff]  ;;  %v31_v5 = vld [vmem:[%s972_s0 + $0x48] sm:$0xff]  ;;  %v32_v9 = vld [vmem:[%s972_s0 + $0x50] sm:$0xff] }
   0x2   :  { %v610_v1 = vld [vmem:[%s973_s1] ss:$0 sm:$0xff]  ;;  %v23_v8 = vld [vmem:[%s972_s0 + $0x8] sm:$0xff]  ;;  %v24_v13 = vld [vmem:[%s972_s0 + $0x10] sm:$0xff] }
   0x3   :  { %v615_v2 = vld [vmem:[%s974_s2] ss:$0 sm:$0xff]  ;;  %v69_v3 = vmul.f32 %v610_v1, %v30_v0  ;;  %v70_v7 = vmul.f32 %v610_v1, %v31_v5  ;;  %v62_v11 = vmul.f32 %v610_v1, %v23_v8  ;;  %v71_v12 = vmul.f32 %v610_v1, %v32_v9  ;;  %v39_v14 = vld [vmem:[%s972_s0 + $0x88] sm:$0xff]  ;;  %v33_v33 = vld [vmem:[%s972_s0 + $0x58] sm:$0xff] }
   0x4   :  { %v22_v4 = vld [vmem:[%s972_s0] sm:$0xff]  ;;  %v63_v17 = vmul.f32 %v610_v1, %v24_v13  ;;  %v78_v18 = vmul.f32 %v610_v1, %v39_v14  ;;  %v655_v26 = vld [vmem:[%s975_s3 + $0x8] sm:$0xff]  ;;  %v25_v37 = vld [vmem:[%s972_s0 + $0x18] sm:$0xff]  ;;  %v72_v47 = vmul.f32 %v610_v1, %v33_v33 }
   0x5   :  { %v61_v6 = vmul.f32 %v610_v1, %v22_v4  ;;  %v108_v10 = vadd.f32 %v615_v2, %v69_v3  ;;  %v109_v16 = vadd.f32 %v615_v2, %v70_v7  ;;  %v648_v20 = vld [vmem:[%s975_s3] sm:$0xff]  ;;  %v101_v21 = vadd.f32 %v615_v2, %v62_v11  ;;  %v40_v43 = vld [vmem:[%s972_s0 + $0x90] sm:$0xff]  ;;  %v47_v4 = vld [vmem:[%s972_s0 + $0xc8] sm:$0xff] }
   0x6   :  { %v110_v22 = vadd.f32 %v615_v2, %v71_v12  ;;  %v38_v28 = vld [vmem:[%s972_s0 + $0x80] sm:$0xff]  ;;  %v102_v36 = vadd.f32 %v615_v2, %v63_v17  ;;  %v117_v40 = vadd.f32 %v615_v2, %v78_v18  ;;  %v683_v45 = vld [vmem:[%s975_s3 + $0x10] sm:$0xff]  ;;  %v64_v50 = vmul.f32 %v610_v1, %v25_v37  ;;  %v714_v11 = vld [vmem:[%s975_s3 + $0x18] sm:$0xff] }
   0x7   :  { %v100_v15 = vadd.f32 %v615_v2, %v61_v6  ;;  %vm140_vm0 = vcmp.gt.f32.partialorder %v108_v10, 0.0  ;;  %v172_v19 = vmul.f32 0.2, %v108_v10  ;;  %vm141_vm2 = vcmp.gt.f32.partialorder %v109_v16, 0.0  ;;  %v46_v42 = vld [vmem:[%s972_s0 + $0xc0] sm:$0xff]  ;;  %v41_v6 = vld [vmem:[%s972_s0 + $0x98] sm:$0xff] }
   0x8   :  { %v173_v24 = vmul.f32 0.2, %v109_v16  ;;  %vm133_vm3 = vcmp.gt.f32.partialorder %v101_v21, 0.0  ;;  %v165_v27 = vmul.f32 0.2, %v101_v21  ;;  %vm142_vm4 = vcmp.gt.f32.partialorder %v110_v22, 0.0 }
   0x9   :  { %vm132_vm1 = vcmp.gt.f32.partialorder %v100_v15, 0.0  ;;  %v164_v23 = vmul.f32 0.2, %v100_v15  ;;  %v204_v25 = vsel %vm140_vm0, %v108_v10, %v172_v19  ;;  %v174_v32 = vmul.f32 0.2, %v110_v22  ;;  %v26_v55 = vld [vmem:[%s972_s0 + $0x20] sm:$0xff] }
   0xa   :  { %v244_v29 = vmul.f32 %v648_v20, %v204_v25  ;;  %v205_v31 = vsel %vm141_vm2, %v109_v16, %v173_v24  ;;  %v197_v35 = vsel %vm133_vm3, %v101_v21, %v165_v27  ;;  %v77_v41 = vmul.f32 %v610_v1, %v38_v28  ;;  %v34_v7 = vld [vmem:[%s972_s0 + $0x60] sm:$0xff]  ;;  %v27_v19 = vld [vmem:[%s972_s0 + $0x28] sm:$0xff]  ;;  %v48_v21 = vld [vmem:[%s972_s0 + $0xd0] sm:$0xff] }
   0xb   :  { %v196_v30 = vsel %vm132_vm1, %v100_v15, %v164_v23  ;;  %v245_v38 = vmul.f32 %v655_v26, %v205_v31  ;;  %v237_v39 = vmul.f32 %v655_v26, %v197_v35  ;;  %v206_v44 = vsel %vm142_vm4, %v110_v22, %v174_v32  ;;  %v42_v27 = vld [vmem:[%s972_s0 + $0xa0] sm:$0xff]  ;;  %v35_v32 = vld [vmem:[%s972_s0 + $0x68] sm:$0xff] }
   0xc   :  { %v236_v34 = vmul.f32 %v648_v20, %v196_v30  ;;  %284 = vadd.xlane.f32.xlu1 %v244_v29  ;;  %vm134_vm5 = vcmp.gt.f32.partialorder %v102_v36, 0.0  ;;  %v166_v46 = vmul.f32 0.2, %v102_v36  ;;  %vm149_vm6 = vcmp.gt.f32.partialorder %v117_v40, 0.0  ;;  %v743_v37 = vld [vmem:[%s975_s3 + $0x20] sm:$0xff] }
   0xd   :  { %v181_v48 = vmul.f32 0.2, %v117_v40  ;;  %v116_v49 = vadd.f32 %v615_v2, %v77_v41  ;;  %v111_v52 = vadd.f32 %v615_v2, %v72_v47  ;;  %v85_v53 = vmul.f32 %v610_v1, %v46_v42 }
   0xe   :  { %268 = vadd.xlane.f32.xlu0 %v236_v34  ;;  %v198_v51 = vsel %vm134_vm5, %v102_v36, %v166_v46  ;;  %v79_v54 = vmul.f32 %v610_v1, %v40_v43  ;;  %v246_v56 = vmul.f32 %v683_v45, %v206_v44  ;;  %v103_v61 = vadd.f32 %v615_v2, %v64_v50  ;;  %v28_v46 = vld [vmem:[%s972_s0 + $0x30] sm:$0xff] }
   0xf   :  { %v238_v57 = vmul.f32 %v683_v45, %v198_v51  ;;  %vm148_vm7 = vcmp.gt.f32.partialorder %v116_v49, 0.0  ;;  %v180_v58 = vmul.f32 0.2, %v116_v49  ;;  %v213_v59 = vsel %vm149_vm6, %v117_v40, %v181_v48 }
  0x10   :  { %286 = vadd.xlane.f32.xlu1 %v245_v38  ;;  %vm143_vm8 = vcmp.gt.f32.partialorder %v111_v52, 0.0  ;;  %v175_v60 = vmul.f32 0.2, %v111_v52  ;;  %v124_v63 = vadd.f32 %v615_v2, %v85_v53  ;;  %v118_v0 = vadd.f32 %v615_v2, %v79_v54 }
  0x11   :  { %v212_v62 = vsel %vm148_vm7, %v116_v49, %v180_v58  ;;  %v65_v3 = vmul.f32 %v610_v1, %v26_v55  ;;  %vm135_vm9 = vcmp.gt.f32.partialorder %v103_v61, 0.0  ;;  %v167_v5 = vmul.f32 0.2, %v103_v61  ;;  %v43_v58 = vld [vmem:[%s972_s0 + $0xa8] sm:$0xff] }
  0x12   :  { %270 = vadd.xlane.f32.xlu0 %v237_v39  ;;  %v253_v8 = vmul.f32 %v655_v26, %v213_v59  ;;  %v252_v9 = vmul.f32 %v648_v20, %v212_v62  ;;  %v207_v10 = vsel %vm143_vm8, %v111_v52, %v175_v60  ;;  %vm156_vm10 = vcmp.gt.f32.partialorder %v124_v63, 0.0  ;;  %v36_v60 = vld [vmem:[%s972_s0 + $0x70] sm:$0xff] }
  0x13   :  { %v188_v12 = vmul.f32 0.2, %v124_v63  ;;  %v104_v13 = vadd.f32 %v615_v2, %v65_v3  ;;  %v86_v14 = vmul.f32 %v610_v1, %v47_v4  ;;  %v199_v15 = vsel %vm135_vm9, %v103_v61, %v167_v5 }
  0x14   :  { %288 = vadd.xlane.f32.xlu1 %v246_v56  ;;  %v182_v16 = vmul.f32 0.2, %v118_v0  ;;  %v80_v17 = vmul.f32 %v610_v1, %v41_v6  ;;  %v73_v18 = vmul.f32 %v610_v1, %v34_v7  ;;  %vm150_vm11 = vcmp.gt.f32.partialorder %v118_v0, 0.0 }
  0x15   :  { %vm136_vm12 = vcmp.gt.f32.partialorder %v104_v13, 0.0  ;;  %v168_v22 = vmul.f32 0.2, %v104_v13  ;;  %v247_v23 = vmul.f32 %v714_v11, %v207_v10  ;;  %v125_v24 = vadd.f32 %v615_v2, %v86_v14  ;;  %v50_v10 = vld [vmem:[%s972_s0 + $0xe0] sm:$0xff] }
  0x16   :  { %272 = vadd.xlane.f32.xlu0 %v238_v57  ;;  %v119_v25 = vadd.f32 %v615_v2, %v80_v17  ;;  %v239_v28 = vmul.f32 %v714_v11, %v199_v15  ;;  %v220_v29 = vsel %vm156_vm10, %v124_v63, %v188_v12  ;;  %v66_v30 = vmul.f32 %v610_v1, %v27_v19 }
  0x17   :  { %v87_v31 = vmul.f32 %v610_v1, %v48_v21  ;;  %v214_v33 = vsel %vm150_vm11, %v118_v0, %v182_v16  ;;  %v200_v34 = vsel %vm136_vm12, %v104_v13, %v168_v22  ;;  %v189_v35 = vmul.f32 0.2, %v125_v24 }
  0x18   :  { %302 = vadd.xlane.f32.xlu1 %v253_v8  ;;  %v112_v36 = vadd.f32 %v615_v2, %v73_v18  ;;  %vm157_vm13 = vcmp.gt.f32.partialorder %v125_v24, 0.0  ;;  %v183_v38 = vmul.f32 0.2, %v119_v25  ;;  %v105_v39 = vadd.f32 %v615_v2, %v66_v30 }
  0x19   :  { %v81_v40 = vmul.f32 %v610_v1, %v42_v27  ;;  %v260_v41 = vmul.f32 %v648_v20, %v220_v29  ;;  %vm151_vm14 = vcmp.gt.f32.partialorder %v119_v25, 0.0  ;;  %v126_v42 = vadd.f32 %v615_v2, %v87_v31  ;;  %v49_v20 = vld [vmem:[%s972_s0 + $0xd8] sm:$0xff] }
  0x1a   :  { %300 = vadd.xlane.f32.xlu0 %v252_v9  ;;  %v74_v43 = vmul.f32 %v610_v1, %v35_v32  ;;  %v254_v44 = vmul.f32 %v683_v45, %v214_v33  ;;  %v240_v47 = vmul.f32 %v743_v37, %v200_v34  ;;  %v221_v48 = vsel %vm157_vm13, %v125_v24, %v189_v35  ;;  %v29_v9 = vld [vmem:[%s972_s0 + $0x38] sm:$0xff] }
  0x1b   :  { %v176_v49 = vmul.f32 0.2, %v112_v36  ;;  %v215_v50 = vsel %vm151_vm14, %v119_v25, %v183_v38  ;;  %vm144_vm15 = vcmp.gt.f32.partialorder %v112_v36, 0.0  ;;  %v169_v51 = vmul.f32 0.2, %v105_v39  ;;  %v37_v25 = vld [vmem:[%s972_s0 + $0x78] sm:$0xff] }
  0x1c   :  { %290 = vadd.xlane.f32.xlu1 %v247_v23  ;;  %v120_v52 = vadd.f32 %v615_v2, %v81_v40  ;;  %vm137_vm0 = vcmp.gt.f32.partialorder %v105_v39, 0.0  ;;  %v190_v53 = vmul.f32 0.2, %v126_v42  ;;  %v113_v54 = vadd.f32 %v615_v2, %v74_v43 }
  0x1d   :  { %v67_v55 = vmul.f32 %v610_v1, %v28_v46  ;;  %v261_v56 = vmul.f32 %v655_v26, %v221_v48  ;;  %vm158_vm1 = vcmp.gt.f32.partialorder %v126_v42, 0.0  ;;  %v88_v57 = vmul.f32 %v610_v1, %v49_v20  ;;  %v773_v26 = vld [vmem:[%s975_s3 + $0x28] sm:$0xff]  ;;  %v53_v20 = vld [vmem:[%s972_s0 + $0xf8] sm:$0xff] }
  0x1e   :  { %274 = vadd.xlane.f32.xlu0 %v239_v28  ;;  %v208_v59 = vsel %vm144_vm15, %v112_v36, %v176_v49  ;;  %v255_v61 = vmul.f32 %v714_v11, %v215_v50  ;;  %v201_v62 = vsel %vm137_vm0, %v105_v39, %v169_v51  ;;  %vm152_vm2 = vcmp.gt.f32.partialorder %v120_v52, 0.0  ;;  %v804_v28 = vld [vmem:[%s975_s3 + $0x30] sm:$0xff]  ;;  %v45_v36 = vld [vmem:[%s972_s0 + $0xb8] sm:$0xff]  ;;  %v51_v39 = vld [vmem:[%s972_s0 + $0xe8] sm:$0xff] }
  0x1f   :  { %v184_v63 = vmul.f32 0.2, %v120_v52  ;;  %v222_v0 = vsel %vm158_vm1, %v126_v42, %v190_v53  ;;  %v177_v3 = vmul.f32 0.2, %v113_v54  ;;  %v106_v4 = vadd.f32 %v615_v2, %v67_v55  ;;  %v235_v53 = vld [vmem:[%s975_s3 + $0x38] sm:$0xff] }
  0x20   :  { %316 = vadd.xlane.f32.xlu1 %v260_v41  ;;  %v82_v5 = vmul.f32 %v610_v1, %v43_v58  ;;  %v248_v6 = vmul.f32 %v743_v37, %v208_v59  ;;  %vm145_vm3 = vcmp.gt.f32.partialorder %v113_v54, 0.0  ;;  %v127_v7 = vadd.f32 %v615_v2, %v88_v57 }
  0x21   :  { %v75_v8 = vmul.f32 %v610_v1, %v36_v60  ;;  %v241_v12 = vmul.f32 %v773_v26, %v201_v62  ;;  %v262_v13 = vmul.f32 %v683_v45, %v222_v0  ;;  %v216_v14 = vsel %vm152_vm2, %v120_v52, %v184_v63  ;;  %v44_v45 = vld [vmem:[%s972_s0 + $0xb0] sm:$0xff] }
  0x22   :  { %304 = vadd.xlane.f32.xlu0 %v254_v44  ;;  %v209_v15 = vsel %vm145_vm3, %v113_v54, %v177_v3  ;;  %v170_v16 = vmul.f32 0.2, %v106_v4  ;;  %v121_v17 = vadd.f32 %v615_v2, %v82_v5  ;;  %v68_v18 = vmul.f32 %v610_v1, %v29_v9 }
  0x23   :  { %vm138_vm4 = vcmp.gt.f32.partialorder %v106_v4, 0.0  ;;  %v191_v19 = vmul.f32 0.2, %v127_v7  ;;  %v114_v21 = vadd.f32 %v615_v2, %v75_v8  ;;  %v89_v22 = vmul.f32 %v610_v1, %v50_v10 }
  0x24   :  { %276 = vadd.xlane.f32.xlu1 %v240_v47  ;;  %vm159_vm5 = vcmp.gt.f32.partialorder %v127_v7, 0.0  ;;  %v256_v23 = vmul.f32 %v743_v37, %v216_v14  ;;  %v249_v24 = vmul.f32 %v773_v26, %v209_v15  ;;  %v202_v27 = vsel %vm138_vm4, %v106_v4, %v170_v16 }
  0x25   :  { %vm153_vm6 = vcmp.gt.f32.partialorder %v121_v17, 0.0  ;;  %v185_v29 = vmul.f32 0.2, %v121_v17  ;;  %v107_v30 = vadd.f32 %v615_v2, %v68_v18  ;;  %v223_v31 = vsel %vm159_vm5, %v127_v7, %v191_v19 }
  0x26   :  { %318 = vadd.xlane.f32.xlu0 %v261_v56  ;;  %v178_v32 = vmul.f32 0.2, %v114_v21  ;;  %v128_v33 = vadd.f32 %v615_v2, %v89_v22  ;;  %v83_v34 = vmul.f32 %v610_v1, %v44_v45  ;;  %vm146_vm7 = vcmp.gt.f32.partialorder %v114_v21, 0.0 }
  0x27   :  { %v76_v35 = vmul.f32 %v610_v1, %v37_v25  ;;  %v242_v38 = vmul.f32 %v804_v28, %v202_v27  ;;  %v263_v40 = vmul.f32 %v714_v11, %v223_v31  ;;  %v217_v41 = vsel %vm153_vm6, %v121_v17, %v185_v29  ;;  %v52_v11 = vld [vmem:[%s972_s0 + $0xf0] sm:$0xff] }
  0x28   :  { %306 = vadd.xlane.f32.xlu1 %v255_v61  ;;  %vm139_vm8 = vcmp.gt.f32.partialorder %v107_v30, 0.0  ;;  %v171_v42 = vmul.f32 0.2, %v107_v30  ;;  %v210_v43 = vsel %vm146_vm7, %v114_v21, %v178_v32  ;;  %v192_v44 = vmul.f32 0.2, %v128_v33 }
  0x29   :  { %v122_v46 = vadd.f32 %v615_v2, %v83_v34  ;;  %v84_v47 = vmul.f32 %v610_v1, %v45_v36  ;;  %vm160_vm9 = vcmp.gt.f32.partialorder %v128_v33, 0.0  ;;  %v115_v48 = vadd.f32 %v615_v2, %v76_v35 }
  0x2a   :  { %292 = vadd.xlane.f32.xlu0 %v248_v6  ;;  %v90_v49 = vmul.f32 %v610_v1, %v51_v39  ;;  %v257_v50 = vmul.f32 %v773_v26, %v217_v41  ;;  %v250_v51 = vmul.f32 %v804_v28, %v210_v43  ;;  %v203_v52 = vsel %vm139_vm8, %v107_v30, %v171_v42 }
  0x2b   :  { %v224_v54 = vsel %vm160_vm9, %v128_v33, %v192_v44  ;;  %v186_v55 = vmul.f32 0.2, %v122_v46  ;;  %v123_v56 = vadd.f32 %v615_v2, %v84_v47  ;;  %v92_v57 = vmul.f32 %v610_v1, %v53_v20 }
  0x2c   :  { %278 = vadd.xlane.f32.xlu1 %v241_v12  ;;  %vm154_vm10 = vcmp.gt.f32.partialorder %v122_v46, 0.0  ;;  %v179_v58 = vmul.f32 0.2, %v115_v48  ;;  %v129_v59 = vadd.f32 %v615_v2, %v90_v49  ;;  %v91_v60 = vmul.f32 %v610_v1, %v52_v11 }
  0x2d   :  { %vm147_vm11 = vcmp.gt.f32.partialorder %v115_v48, 0.0  ;;  %v243_v61 = vmul.f32 %v235_v53, %v203_v52  ;;  %v264_v62 = vmul.f32 %v743_v37, %v224_v54  ;;  %v218_v63 = vsel %vm154_vm10, %v122_v46, %v186_v55 }
  0x2e   :  { %320 = vadd.xlane.f32.xlu0 %v262_v13  ;;  %v187_v0 = vmul.f32 0.2, %v123_v56  ;;  %v131_v3 = vadd.f32 %v615_v2, %v92_v57  ;;  %v211_v4 = vsel %vm147_vm11, %v115_v48, %v179_v58  ;;  %vm155_vm12 = vcmp.gt.f32.partialorder %v123_v56, 0.0 }
  0x2f   :  { %v193_v5 = vmul.f32 0.2, %v129_v59  ;;  %v130_v6 = vadd.f32 %v615_v2, %v91_v60  ;;  %vm161_vm13 = vcmp.gt.f32.partialorder %v129_v59, 0.0  ;;  %v258_v7 = vmul.f32 %v804_v28, %v218_v63 }
  0x30   :  { %308 = vadd.xlane.f32.xlu1 %v256_v23  ;;  %v251_v1 = vmul.f32 %v235_v53, %v211_v4  ;;  %v219_v8 = vsel %vm155_vm12, %v123_v56, %v187_v0  ;;  %v195_v9 = vmul.f32 0.2, %v131_v3  ;;  %vm163_vm14 = vcmp.gt.f32.partialorder %v131_v3, 0.0 }
  0x31   :  { %v225_v10 = vsel %vm161_vm13, %v129_v59, %v193_v5  ;;  %v194_v12 = vmul.f32 0.2, %v130_v6  ;;  %vm162_vm15 = vcmp.gt.f32.partialorder %v130_v6, 0.0  ;;  %v259_v37 = vmul.f32 %v235_v53, %v219_v8 }
  0x32   :  { %294 = vadd.xlane.f32.xlu0 %v249_v24  ;;  %v265_v13 = vmul.f32 %v773_v26, %v225_v10  ;;  %v227_v14 = vsel %vm163_vm14, %v131_v3, %v195_v9  ;;  %v10_v17 = vstv %s976_s4  ;;  %v364_v35 = vlaneseq }
  0x33   :  { %v226_v15 = vsel %vm162_vm15, %v130_v6, %v194_v12  ;;  %v267_v2 = vmul.f32 %v235_v53, %v227_v14  ;;  %11 = vst [vmem:[#allocation2] sm:$0x1] %v10_v17  ;;  %vm375_vm0 = vcmask 130112   ;;  %vm382_vm1 = vcmask 195712  }
  0x34   :  { %280 = vadd.xlane.f32.xlu1 %v242_v38  ;;  %v266_v16 = vmul.f32 %v804_v28, %v226_v15  ;;  %v365_v39 = vand.u32 127, %v364_v35  ;;  %v367_v44 = vshrl.u32 %v364_v35, 7  ;;  %vm389_vm2 = vcmask 261312  }
  0x35   :  { %vm396_vm3 = vcmask 326912   ;;  %vm403_vm4 = vcmask 392512   ;;  %vm410_vm5 = vcmask 458112   ;;  %vm417_vm6 = vcmask 523712  }
  0x36   :  { %322 = vadd.xlane.f32.xlu0 %v263_v40  ;;  %v370_v41 = vadd.s32 4294967288, %v365_v39  ;;  %v377_v42 = vadd.s32 4294967280, %v365_v39  ;;  %v384_v47 = vadd.s32 4294967272, %v365_v39  ;;  %v391_v49 = vadd.s32 4294967264, %v365_v39 }
  0x37   :  { %v398_v20 = vadd.s32 4294967256, %v365_v39  ;;  %v368_v52 = vsub.s32 %v365_v39, %v367_v44  ;;  %vm536_vm7 = vcmask 1041409   ;;  %vm538_vm8 = vcmask 1042434  }
  0x38   :  { %310 = vadd.xlane.f32.xlu1 %v257_v50  ;;  %v373_v48 = vsub.s32 %v370_v41, %v367_v44  ;;  %v882_v11 = vsub.s32 %v377_v42, %v367_v44  ;;  %v405_v50 = vadd.s32 4294967248, %v365_v39  ;;  %v888_v54 = vsub.s32 %v384_v47, %v367_v44 }
  0x39   :  { %v890_v56 = vsub.s32 %v391_v49, %v367_v44  ;;  %v892_v57 = vsub.s32 %v398_v20, %v367_v44  ;;  %vm540_vm9 = vcmask 1043459   ;;  %vm543_vm10 = vcmask 519168  }
  0x3a   :  { %296 = vadd.xlane.f32.xlu0 %v250_v51  ;;  %v895_v60 = vsub.s32 %v405_v50, %v367_v44  ;;  %vm561_vm11 = vcmask 3072  }
  0x3c   :  { %282 = vadd.xlane.f32.xlu1 %v243_v61  ;;  %v412_v61 = vadd.s32 4294967240, %v365_v39 }
  0x3e   :  { %324 = vadd.xlane.f32.xlu0 %v264_v62  ;;  %v415_v14 = vsub.s32 %v412_v61, %v367_v44 }
  0x40   :  { %312 = vadd.xlane.f32.xlu1 %v258_v7 }
  0x42   :  { %298 = vadd.xlane.f32.xlu0 %v251_v1 }
  0x44   :  { %314 = vadd.xlane.f32.xlu1 %v259_v37 }
  0x46   :  { %326 = vadd.xlane.f32.xlu0 %v265_v13 }
  0x48   :  { %330 = vadd.xlane.f32.xlu1 %v267_v2 }
  0x4a   :  { %328 = vadd.xlane.f32.xlu0 %v266_v16 }
  0x95   :  { %v285_v18 = vpop.xlane.xlu1 %284 }
  0x96   :  { %v422_v63 = vrot.slane %v285_v18, %v368_v52 }
  0x97   :  { %v846_v19 = vpop.xlane.xlu0 %268 }
  0x98   :  { %v369_v6 = vrot.slane %v846_v19, %v368_v52 }
  0x99   :  { %v287_v21 = vpop.xlane.xlu1 %286 }
  0x9a   :  { %v426_v55 = vrot.slane %v287_v21, %v373_v48 }
  0x9b   :  { %v271_v22 = vpop.xlane.xlu0 %270 }
  0x9c   :  { %v374_v58 = vrot.slane %v271_v22, %v373_v48  ;;  %v427_v9 = vsel %vm375_vm0, %v426_v55, %v422_v63 }
  0x9d   :  { %v289_v26 = vpop.xlane.xlu1 %288 }
  0x9e   :  { %v431_v59 = vrot.slane %v289_v26, %v882_v11  ;;  %v376_v37 = vsel %vm375_vm0, %v374_v58, %v369_v6 }
  0x9f   :  { %v848_v45 = vpop.xlane.xlu0 %272 }
  0xa0   :  { %v381_v0 = vrot.slane %v848_v45, %v882_v11  ;;  %v432_v13 = vsel %vm382_vm1, %v431_v59, %v427_v9 }
  0xa1   :  { %v850_v23 = vpop.xlane.xlu1 %302 }
  0xa2   :  { %v465_v3 = vrot.slane %v850_v23, %v373_v48  ;;  %v383_v2 = vsel %vm382_vm1, %v381_v0, %v376_v37 }
  0xa3   :  { %v852_v24 = vpop.xlane.xlu0 %300 }
  0xa4   :  { %v461_v4 = vrot.slane %v852_v24, %v368_v52 }
  0xa5   :  { %v854_v25 = vpop.xlane.xlu1 %290 }
  0xa6   :  { %v436_v7 = vrot.slane %v854_v25, %v888_v54  ;;  %v466_v16 = vsel %vm375_vm0, %v465_v3, %v461_v4 }
  0xa7   :  { %v856_v27 = vpop.xlane.xlu0 %274 }
  0xa8   :  { %v388_v1 = vrot.slane %v856_v27, %v888_v54  ;;  %v437_v21 = vsel %vm389_vm2, %v436_v7, %v432_v13  ;;  %v569_v7 = vld [vmem:[#allocation2] ss:$0 sm:$0xff] }
  0xa9   :  { %v858_v28 = vpop.xlane.xlu1 %316 }
  0xaa   :  { %v500_v17 = vrot.slane %v858_v28, %v368_v52  ;;  %v390_v22 = vsel %vm389_vm2, %v388_v1, %v383_v2 }
  0xab   :  { %v860_v29 = vpop.xlane.xlu0 %304 }
  0xac   :  { %v470_v8 = vrot.slane %v860_v29, %v882_v11 }
  0xad   :  { %v862_v30 = vpop.xlane.xlu1 %276 }
  0xae   :  { %v395_v10 = vrot.slane %v862_v30, %v890_v56  ;;  %v471_v26 = vsel %vm382_vm1, %v470_v8, %v466_v16 }
  0xaf   :  { %v864_v31 = vpop.xlane.xlu0 %318 }
  0xb0   :  { %v504_v12 = vrot.slane %v864_v31, %v373_v48  ;;  %v397_v23 = vsel %vm396_vm3, %v395_v10, %v390_v22 }
  0xb1   :  { %v866_v32 = vpop.xlane.xlu1 %306 }
  0xb2   :  { %v475_v18 = vrot.slane %v866_v32, %v888_v54  ;;  %v505_v24 = vsel %vm375_vm0, %v504_v12, %v500_v17 }
  0xb3   :  { %v868_v33 = vpop.xlane.xlu0 %292 }
  0xb4   :  { %v441_v45 = vrot.slane %v868_v33, %v890_v56  ;;  %v476_v33 = vsel %vm389_vm2, %v475_v18, %v471_v26 }
  0xb5   :  { %v870_v34 = vpop.xlane.xlu1 %278 }
  0xb6   :  { %v402_v28 = vrot.slane %v870_v34, %v892_v57  ;;  %v442_v34 = vsel %vm396_vm3, %v441_v45, %v437_v21 }
  0xb7   :  { %v872_v36 = vpop.xlane.xlu0 %320 }
  0xb8   :  { %v509_v29 = vrot.slane %v872_v36, %v882_v11  ;;  %v404_v49 = vsel %vm403_vm4, %v402_v28, %v397_v23 }
  0xb9   :  { %v874_v38 = vpop.xlane.xlu1 %308 }
  0xba   :  { %v480_v25 = vrot.slane %v874_v38, %v890_v56  ;;  %v510_v20 = vsel %vm382_vm1, %v509_v29, %v505_v24 }
  0xbb   :  { %v876_v40 = vpop.xlane.xlu0 %294 }
  0xbc   :  { %v446_v27 = vrot.slane %v876_v40, %v892_v57  ;;  %v481_v44 = vsel %vm396_vm3, %v480_v25, %v476_v33 }
  0xbd   :  { %v878_v43 = vpop.xlane.xlu1 %280 }
  0xbe   :  { %v409_v36 = vrot.slane %v878_v43, %v895_v60  ;;  %v447_v47 = vsel %vm403_vm4, %v446_v27, %v442_v34 }
  0xbf   :  { %v880_v46 = vpop.xlane.xlu0 %322 }
  0xc0   :  { %v514_v35 = vrot.slane %v880_v46, %v888_v54 }
  0xc1   :  { %v884_v51 = vpop.xlane.xlu1 %310 }
  0xc2   :  { %v485_v30 = vrot.slane %v884_v51, %v892_v57  ;;  %v515_v51 = vsel %vm389_vm2, %v514_v35, %v510_v20 }
  0xc3   :  { %v886_v53 = vpop.xlane.xlu0 %296 }
  0xc4   :  { %v451_v31 = vrot.slane %v886_v53, %v895_v60  ;;  %v486_v11 = vsel %vm403_vm4, %v485_v30, %v481_v44 }
  0xc5   :  { %v897_v62 = vpop.xlane.xlu1 %282 }
  0xc6   :  { %v416_v48 = vrot.slane %v897_v62, %v415_v14  ;;  %v452_v50 = vsel %vm410_vm5, %v451_v31, %v447_v47 }
  0xc7   :  { %v325_v5 = vpop.xlane.xlu0 %324 }
  0xc8   :  { %v519_v41 = vrot.slane %v325_v5, %v890_v56  ;;  %v411_v56 = vsel %vm410_vm5, %v409_v36, %v404_v49 }
  0xc9   :  { %v313_v15 = vpop.xlane.xlu1 %312  ;;  %v418_v61 = vsel %vm417_vm6, %v416_v48, %v411_v56 }
  0xca   :  { %v490_v38 = vrot.slane %v313_v15, %v895_v60 }
  0xcb   :  { %v299_v19 = vpop.xlane.xlu0 %298 }
  0xcc   :  { %v456_v39 = vrot.slane %v299_v19, %v415_v14  ;;  %v491_v52 = vsel %vm410_vm5, %v490_v38, %v486_v11 }
  0xcd   :  { %v315_v32 = vpop.xlane.xlu1 %314 }
  0xce   :  { %v495_v42 = vrot.slane %v315_v32, %v415_v14  ;;  %v457_v53 = vsel %vm417_vm6, %v456_v39, %v452_v50 }
  0xcf   :  { %v327_v40 = vpop.xlane.xlu0 %326  ;;  %v537_v0 = vsel %vm536_vm7, %v457_v53, %v418_v61 }
  0xd0   :  { %v524_v46 = vrot.slane %v327_v40, %v892_v57  ;;  %v520_v57 = vsel %vm396_vm3, %v519_v41, %v515_v51  ;;  %v496_v58 = vsel %vm417_vm6, %v495_v42, %v491_v52 }
  0xd1   :  { %v331_v43 = vpop.xlane.xlu1 %330  ;;  %v539_v4 = vsel %vm538_vm8, %v496_v58, %v537_v0 }
  0xd2   :  { %v534_v55 = vrot.slane %v331_v43, %v415_v14  ;;  %v525_v62 = vsel %vm403_vm4, %v524_v46, %v520_v57 }
  0xd3   :  { %v329_v54 = vpop.xlane.xlu0 %328 }
  0xd4   :  { %v529_v59 = vrot.slane %v329_v54, %v895_v60 }
  0xd6   :  { %v530_v63 = vsel %vm410_vm5, %v529_v59, %v525_v62 }
  0xd7   :  { %v535_v3 = vsel %vm417_vm6, %v534_v55, %v530_v63 }
  0xd8   :  { %v541_v5 = vsel %vm540_vm9, %v535_v3, %v539_v4 }
  0xd9   :  { %v544_v6 = vsel %vm543_vm10, %v541_v5, 0.0 }
  0xda   :  { %545 = vadd.xlane.f32.xlu0 %v544_v6 }
 0x163   :  { %v546_v1 = vpop.xlane.xlu0 %545 }
 0x164   :  { %v554_v60 = vadd.f32 %v569_v7, %v546_v1 }
 0x166   :  { %v555_v8 = vsub.f32 0.0, %v554_v60 }
 0x168   :  { %v556_v9 = vmul.f32 1.442695, %v555_v8 }
 0x16a   :  { %570 = vpow2.f32 %v556_v9 }
 0x177   :  { %v571_v10 = vpop.eup %570 }
 0x178   :  { %v558_v12 = vadd.f32 1.0, %v571_v10 }
 0x17a   :  { %572 = vrcp.f32 %v558_v12 }
 0x187   :  { %v573_v37 = vpop.eup %572 }
 0x188   :  { %562 = vst.msk [vmem:[%s977_s5] sm:$0xf] %vm561_vm11, %v573_v37 }

</bundles_post_ra>
